<compile_context>
chip_gen: v6e
topology: v6e:2x2x1
jax: 0.10.0
libtpu: 0.0.40
codegen_flags: <defaults>
</compile_context>

<pallas_src>
import functools

import jax
import jax.numpy as jnp
from jax.experimental import pallas as pl
from jax.experimental.pallas import tpu as pltpu


def _round_up(v: int, m: int) -> int:
    return ((v + m - 1) // m) * m


def cbam_kernel(x_ref, w1_ref, b1_ref, w2_ref, b2_ref, wconv_ref, bn_ref,
                masks_ref, o_ref, pad_ref, *, W, pad_lo):
    # x_ref / o_ref: (Bblk, C, H*W) lane-dense blocks.
    Bblk, C, HW = x_ref.shape
    inv_hw = 1.0 / float(HW)
    inv_c = 1.0 / float(C)

    # Zero the padded conv scratch every step (tiny; keeps the batch grid axis
    # safely "parallel" -- no cross-step scratch state).
    pad_ref[...] = jnp.zeros_like(pad_ref)

    # ---------------- Channel gate ----------------
    # Per-image global avg / max pooling kept as (C, 1) columns so the channel
    # axis lives on sublanes (matches the broadcast needed later).
    avg_cols = []
    max_cols = []
    for b in range(Bblk):
        xb = x_ref[b].astype(jnp.float32)                          # (C, HW)
        avg_cols.append(jnp.sum(xb, axis=1, keepdims=True) * inv_hw)
        max_cols.append(jnp.max(xb, axis=1, keepdims=True))
    pooled = jnp.concatenate(avg_cols + max_cols, axis=1)          # (C, 2*Bblk)

    # Shared MLP: one matmul per layer for all avg/max columns of all images.
    h = jnp.dot(w1_ref[...], pooled,
                preferred_element_type=jnp.float32) + b1_ref[...]  # (mid, 2*Bblk)
    h = jnp.maximum(h, 0.0)                                        # ReLU
    z = jnp.dot(w2_ref[...], h,
                preferred_element_type=jnp.float32) + b2_ref[...]  # (C, 2*Bblk)
    att_c = jax.nn.sigmoid(z[:, 0:Bblk] + z[:, Bblk:2 * Bblk])     # (C, Bblk)

    # ---------------- Spatial gate ----------------
    # Channel-gated maps reduced over C -> flat (Bblk, HW) max / mean maps.
    row_max = []
    row_mean = []
    for b in range(Bblk):
        yb = x_ref[b].astype(jnp.float32) * att_c[:, b:b + 1]      # (C, HW)
        row_max.append(jnp.max(yb, axis=0, keepdims=True))         # (1, HW)
        row_mean.append(jnp.sum(yb, axis=0, keepdims=True) * inv_c)
    sp_max = jnp.concatenate(row_max, axis=0)                      # (Bblk, HW)
    sp_mean = jnp.concatenate(row_mean, axis=0)                    # (Bblk, HW)

    # One aligned write places both conv input channels of all images into the
    # pre-zeroed padded buffer.
    pad_ref[:, :, pl.ds(pad_lo, HW)] = jnp.stack([sp_max, sp_mean], axis=0)

    masks = masks_ref[...]                                         # (7, 1, HW)
    scale = bn_ref[0]                                              # folded BN scale
    shift = bn_ref[1]                                              # folded BN shift

    # 7x7 conv (in_ch=2: [max, mean], out_ch=1, bias=False) in the flat domain.
    # Each tap = one static-offset slice of the padded scratch (both channels,
    # all images at once) + a horizontal-validity mask.
    acc = jnp.zeros((Bblk, HW), jnp.float32)
    for kh in range(7):
        for kw in range(7):
            off = pad_lo + (kh - 3) * W + (kw - 3)
            win = pad_ref[:, :, pl.ds(off, HW)]                    # (2, Bblk, HW)
            w_m = wconv_ref[kh * 7 + kw]                           # scalar taps (SMEM)
            w_a = wconv_ref[49 + kh * 7 + kw]
            contrib = w_m * win[0] + w_a * win[1]
            if kw != 3:                                            # kw == 3 -> all valid
                contrib = contrib * masks[kw]
            acc = acc + contrib

    att_s = jax.nn.sigmoid(acc * scale + shift)                    # (Bblk, HW)

    # Final output: x * channel_att * spatial_att, lane-dense unmasked stores.
    for b in range(Bblk):
        yb = x_ref[b].astype(jnp.float32) * att_c[:, b:b + 1]      # (C, HW)
        o_ref[b] = (yb * att_s[b:b + 1, :]).astype(o_ref.dtype)


def cbam_forward(x, w1, b1, w2, b2, wconv, bn_scale, bn_shift, block_b=None):
    """CBAM forward (eval-mode BN folded into scale/shift)."""
    B, C, H, W = x.shape
    HW = H * W

    if block_b is None:
        # Largest divisor of B with a comfortably sized block (cap 8 images,
        # <= ~4 MiB) to amortize per-grid-step overhead.
        bytes_per_img = C * HW * jnp.dtype(x.dtype).itemsize
        cap = max(1, min(B, 8, (4 << 20) // max(1, bytes_per_img)))
        block_b = next(d for d in range(cap, 0, -1) if B % d == 0)
    assert B % block_b == 0
    n_blocks = B // block_b

    # Padded, lane-aligned flat-spatial scratch geometry (static).
    pad_lo = _round_up(3 * W + 3, 128)
    pad_len = _round_up(pad_lo + HW + 3 * W + 3, 128)

    x_flat = x.reshape(B, C, HW)
    w1f = jnp.asarray(w1, jnp.float32)                     # (mid, C)
    w2f = jnp.asarray(w2, jnp.float32)                     # (C, mid)
    b1c = jnp.asarray(b1, jnp.float32).reshape(-1, 1)      # (mid, 1)
    b2c = jnp.asarray(b2, jnp.float32).reshape(-1, 1)      # (C, 1)
    # Flat conv taps: first 49 pair with the channel-max map, next 49 with the
    # channel-mean map (matches torch.cat((max, mean), dim=1)).
    wconv_flat = jnp.concatenate(
        [wconv[0, 0].reshape(-1), wconv[0, 1].reshape(-1)]).astype(jnp.float32)
    bn_ss = jnp.array([bn_scale, bn_shift], jnp.float32)

    # Host-built column-validity masks for the 7 horizontal tap offsets.
    col = jnp.arange(HW, dtype=jnp.int32) % W
    masks = jnp.stack(
        [((col + (kw - 3) >= 0) & (col + (kw - 3) < W)).astype(jnp.float32)
         for kw in range(7)], axis=0).reshape(7, 1, HW)

    kernel = functools.partial(cbam_kernel, W=W, pad_lo=pad_lo)

    out_flat = pl.pallas_call(
        kernel,
        out_shape=jax.ShapeDtypeStruct((B, C, HW), x.dtype),
        grid=(n_blocks,),
        in_specs=[
            pl.BlockSpec((block_b, C, HW), lambda i: (i, 0, 0)),   # x (lane-dense)
            pl.BlockSpec(memory_space=pltpu.MemorySpace.VMEM),     # w1 (mid, C)
            pl.BlockSpec(memory_space=pltpu.MemorySpace.VMEM),     # b1 (mid, 1)
            pl.BlockSpec(memory_space=pltpu.MemorySpace.VMEM),     # w2 (C, mid)
            pl.BlockSpec(memory_space=pltpu.MemorySpace.VMEM),     # b2 (C, 1)
            pl.BlockSpec(memory_space=pltpu.MemorySpace.SMEM),     # conv taps (98,)
            pl.BlockSpec(memory_space=pltpu.MemorySpace.SMEM),     # bn scale/shift (2,)
            pl.BlockSpec(memory_space=pltpu.MemorySpace.VMEM),     # masks (7, 1, HW)
        ],
        out_specs=pl.BlockSpec((block_b, C, HW), lambda i: (i, 0, 0)),
        scratch_shapes=[pltpu.VMEM((2, block_b, pad_len), jnp.float32)],
        compiler_params=pltpu.CompilerParams(dimension_semantics=("parallel",)),
    )(x_flat, w1f, b1c, w2f, b2c, wconv_flat, bn_ss, masks)

    return out_flat.reshape(B, C, H, W)


def cbam_ref(x, w1, b1, w2, b2, wconv, bn_scale, bn_shift):
    """Pure-JAX reference mirroring the PyTorch forward (eval-mode BN)."""
    avg = x.mean(axis=(2, 3))                              # (B, C)
    mx = x.max(axis=(2, 3))                                # (B, C)

    def mlp(v):
        h = jax.nn.relu(v @ w1.T + b1)
        return h @ w2.T + b2

    att_c = jax.nn.sigmoid(mlp(avg) + mlp(mx))             # (B, C)
    y = x * att_c[:, :, None, None]

    sp_max = y.max(axis=1, keepdims=True)
    sp_mean = y.mean(axis=1, keepdims=True)
    att_in = jnp.concatenate([sp_max, sp_mean], axis=1)    # (B, 2, H, W)
    conv = jax.lax.conv_general_dilated(
        att_in, wconv, window_strides=(1, 1), padding=[(3, 3), (3, 3)],
        dimension_numbers=("NCHW", "OIHW", "NCHW"))
    att_s = jax.nn.sigmoid(conv * bn_scale + bn_shift)
    return y * att_s


if __name__ == "__main__":
    B, C, H, W = 2, 32, 16, 16
    reduction_ratio = 8                                    # mid = C // r = 4
    mid = C // reduction_ratio

    key = jax.random.PRNGKey(0)
    ks = jax.random.split(key, 6)
    x = jax.random.normal(ks[0], (B, C, H, W), jnp.float32)
    w1 = jax.random.normal(ks[1], (mid, C), jnp.float32) * 0.1   # fc1 weight
    b1 = jax.random.normal(ks[2], (mid,), jnp.float32) * 0.1     # fc1 bias
    w2 = jax.random.normal(ks[3], (C, mid), jnp.float32) * 0.1   # fc2 weight
    b2 = jax.random.normal(ks[4], (C,), jnp.float32) * 0.1       # fc2 bias
    wconv = jax.random.normal(ks[5], (1, 2, 7, 7), jnp.float32) * 0.1  # conv7x7, no bias

    # BatchNorm2d(1), eval mode, fresh stats: mean=0, var=1, gamma=1, beta=0.
    bn_eps = 1e-5
    bn_scale = float(1.0 / (1.0 + bn_eps) ** 0.5)
    bn_shift = 0.0

    out = cbam_forward(x, w1, b1, w2, b2, wconv, bn_scale, bn_shift)
    out = jax.block_until_ready(out)

    ref = cbam_ref(x, w1, b1, w2, b2, wconv, bn_scale, bn_shift)
    err = float(jnp.max(jnp.abs(out - ref)))
    assert jnp.allclose(out, ref, atol=1e-3, rtol=1e-3), f"max abs err = {err}"

    print("KERNEL_OK")
</pallas_src>

<mosaic_0001>
module attributes {stable_mosaic.version = 11 : i64} {
  func.func @cbam_kernel(%arg0: i32, %arg1: memref<2x32x256xf32, #tpu.memory_space<vmem>>, %arg2: memref<4x32xf32, #tpu.memory_space<vmem>>, %arg3: memref<4x1xf32, #tpu.memory_space<vmem>>, %arg4: memref<32x4xf32, #tpu.memory_space<vmem>>, %arg5: memref<32x1xf32, #tpu.memory_space<vmem>>, %arg6: memref<98xf32, #tpu.memory_space<smem>>, %arg7: memref<2xf32, #tpu.memory_space<smem>>, %arg8: memref<7x1x256xf32, #tpu.memory_space<vmem>>, %arg9: memref<2x32x256xf32, #tpu.memory_space<vmem>>, %arg10: memref<2x2x512xf32, #tpu.memory_space<vmem>>) attributes {dimension_semantics = [#tpu.dimension_semantics<parallel>], iteration_bounds = array<i64: 1>, scalar_prefetch = 0 : i64, scratch_operands = 1 : i64, tpu.core_type = #tpu.core_type<tc>, window_params = [{transform_indices = @transform_0, window_bounds = array<i64: 2, 32, 256>}, {pipeline_mode = #tpu.pipeline_mode<synchronous>, transform_indices = @transform_1, window_bounds = array<i64: 4, 32>}, {pipeline_mode = #tpu.pipeline_mode<synchronous>, transform_indices = @transform_2, window_bounds = array<i64: 4, 1>}, {pipeline_mode = #tpu.pipeline_mode<synchronous>, transform_indices = @transform_3, window_bounds = array<i64: 32, 4>}, {pipeline_mode = #tpu.pipeline_mode<synchronous>, transform_indices = @transform_4, window_bounds = array<i64: 32, 1>}, {transform_indices = @transform_5, window_bounds = array<i64: 98>}, {transform_indices = @transform_6, window_bounds = array<i64: 2>}, {pipeline_mode = #tpu.pipeline_mode<synchronous>, transform_indices = @transform_7, window_bounds = array<i64: 7, 1, 256>}, {transform_indices = @transform_8, window_bounds = array<i64: 2, 32, 256>}]} {
    %cst = arith.constant 0.000000e+00 : f32
    %0 = vector.broadcast %cst : f32 to vector<2x2x512xf32>
    %c0 = arith.constant 0 : index
    %c0_0 = arith.constant 0 : index
    %c0_1 = arith.constant 0 : index
    %1 = vector.load %arg10[%c0, %c0_0, %c0_1] : memref<2x2x512xf32, #tpu.memory_space<vmem>>, vector<2x2x512xf32>
    tpu.vector_store %arg10[%c0, %c0_0, %c0_1], %0 {strides = array<i32>} : memref<2x2x512xf32, #tpu.memory_space<vmem>>, vector<2x2x512xf32>,
    %c0_2 = arith.constant 0 : index
    %c0_3 = arith.constant 0 : index
    %c0_4 = arith.constant 0 : index
    %2 = vector.load %arg1[%c0_2, %c0_3, %c0_4] : memref<2x32x256xf32, #tpu.memory_space<vmem>>, vector<1x32x256xf32>
    %3 = vector.shape_cast %2 : vector<1x32x256xf32> to vector<32x256xf32>
    %cst_5 = arith.constant dense<0.000000e+00> : vector<32xf32>
    %4 = vector.multi_reduction <add>, %3, %cst_5 [1] : vector<32x256xf32> to vector<32xf32>
    %5 = vector.shape_cast %4 : vector<32xf32> to vector<32x1xf32>
    %cst_6 = arith.constant 3.906250e-03 : f32
    %6 = vector.broadcast %cst_6 : f32 to vector<32x1xf32>
    %7 = arith.mulf %5, %6 : vector<32x1xf32>
    %cst_7 = arith.constant dense<0xFF800000> : vector<32xf32>
    %8 = vector.multi_reduction <maximumf>, %3, %cst_7 [1] : vector<32x256xf32> to vector<32xf32>
    %9 = vector.shape_cast %8 : vector<32xf32> to vector<32x1xf32>
    %c1 = arith.constant 1 : index
    %c0_8 = arith.constant 0 : index
    %c0_9 = arith.constant 0 : index
    %10 = vector.load %arg1[%c1, %c0_8, %c0_9] : memref<2x32x256xf32, #tpu.memory_space<vmem>>, vector<1x32x256xf32>
    %11 = vector.shape_cast %10 : vector<1x32x256xf32> to vector<32x256xf32>
    %cst_10 = arith.constant dense<0.000000e+00> : vector<32xf32>
    %12 = vector.multi_reduction <add>, %11, %cst_10 [1] : vector<32x256xf32> to vector<32xf32>
    %13 = vector.shape_cast %12 : vector<32xf32> to vector<32x1xf32>
    %cst_11 = arith.constant 3.906250e-03 : f32
    %14 = vector.broadcast %cst_11 : f32 to vector<32x1xf32>
    %15 = arith.mulf %13, %14 : vector<32x1xf32>
    %cst_12 = arith.constant dense<0xFF800000> : vector<32xf32>
    %16 = vector.multi_reduction <maximumf>, %11, %cst_12 [1] : vector<32x256xf32> to vector<32xf32>
    %17 = vector.shape_cast %16 : vector<32xf32> to vector<32x1xf32>
    %18 = tpu.concatenate %7, %15, %9, %17 in 1 : vector<32x1xf32>, vector<32x1xf32>, vector<32x1xf32>, vector<32x1xf32> -> vector<32x4xf32>
    %c0_13 = arith.constant 0 : index
    %c0_14 = arith.constant 0 : index
    %19 = vector.load %arg2[%c0_13, %c0_14] : memref<4x32xf32, #tpu.memory_space<vmem>>, vector<4x32xf32>
    %cst_15 = arith.constant dense<0.000000e+00> : vector<4x4xf32>
    %20 = tpu.matmul %19, %18, %cst_15 {dimension_numbers = #tpu.dot_dimension_numbers<[1], [0], [0], [1], [0, 0, 1, 1], [], []>} : vector<4x32xf32>, vector<32x4xf32>, vector<4x4xf32> -> vector<4x4xf32>
    %c0_16 = arith.constant 0 : index
    %c0_17 = arith.constant 0 : index
    %21 = vector.load %arg3[%c0_16, %c0_17] : memref<4x1xf32, #tpu.memory_space<vmem>>, vector<4x1xf32>
    %22 = vector.broadcast %21 : vector<4x1xf32> to vector<4x4xf32>
    %23 = arith.addf %20, %22 : vector<4x4xf32>
    %cst_18 = arith.constant 0.000000e+00 : f32
    %24 = vector.broadcast %cst_18 : f32 to vector<4x4xf32>
    %25 = arith.maximumf %23, %24 : vector<4x4xf32>
    %c0_19 = arith.constant 0 : index
    %c0_20 = arith.constant 0 : index
    %26 = vector.load %arg4[%c0_19, %c0_20] : memref<32x4xf32, #tpu.memory_space<vmem>>, vector<32x4xf32>
    %cst_21 = arith.constant dense<0.000000e+00> : vector<32x4xf32>
    %27 = tpu.matmul %26, %25, %cst_21 {dimension_numbers = #tpu.dot_dimension_numbers<[1], [0], [0], [1], [0, 0, 1, 1], [], []>} : vector<32x4xf32>, vector<4x4xf32>, vector<32x4xf32> -> vector<32x4xf32>
    %c0_22 = arith.constant 0 : index
    %c0_23 = arith.constant 0 : index
    %28 = vector.load %arg5[%c0_22, %c0_23] : memref<32x1xf32, #tpu.memory_space<vmem>>, vector<32x1xf32>
    %29 = vector.broadcast %28 : vector<32x1xf32> to vector<32x4xf32>
    %30 = arith.addf %27, %29 : vector<32x4xf32>
    %31 = vector.extract_strided_slice %30 {offsets = [0, 0], sizes = [32, 2], strides = [1, 1]} : vector<32x4xf32> to vector<32x2xf32>
    %32 = vector.extract_strided_slice %30 {offsets = [0, 2], sizes = [32, 2], strides = [1, 1]} : vector<32x4xf32> to vector<32x2xf32>
    %33 = arith.addf %31, %32 : vector<32x2xf32>
    %34 = arith.negf %33 : vector<32x2xf32>
    %35 = math.exp %34 : vector<32x2xf32>
    %cst_24 = arith.constant 1.000000e+00 : f32
    %36 = vector.broadcast %cst_24 : f32 to vector<32x2xf32>
    %37 = arith.addf %36, %35 : vector<32x2xf32>
    %38 = arith.divf %36, %37 : vector<32x2xf32>
    %c0_25 = arith.constant 0 : index
    %c0_26 = arith.constant 0 : index
    %c0_27 = arith.constant 0 : index
    %39 = vector.load %arg1[%c0_25, %c0_26, %c0_27] : memref<2x32x256xf32, #tpu.memory_space<vmem>>, vector<1x32x256xf32>
    %40 = vector.shape_cast %39 : vector<1x32x256xf32> to vector<32x256xf32>
    %41 = vector.extract_strided_slice %38 {offsets = [0, 0], sizes = [32, 1], strides = [1, 1]} : vector<32x2xf32> to vector<32x1xf32>
    %42 = vector.broadcast %41 : vector<32x1xf32> to vector<32x256xf32>
    %43 = arith.mulf %40, %42 : vector<32x256xf32>
    %cst_28 = arith.constant dense<0xFF800000> : vector<256xf32>
    %44 = vector.multi_reduction <maximumf>, %43, %cst_28 [0] : vector<32x256xf32> to vector<256xf32>
    %45 = vector.shape_cast %44 : vector<256xf32> to vector<1x256xf32>
    %cst_29 = arith.constant dense<0.000000e+00> : vector<256xf32>
    %46 = vector.multi_reduction <add>, %43, %cst_29 [0] : vector<32x256xf32> to vector<256xf32>
    %47 = vector.shape_cast %46 : vector<256xf32> to vector<1x256xf32>
    %cst_30 = arith.constant 3.125000e-02 : f32
    %48 = vector.broadcast %cst_30 : f32 to vector<1x256xf32>
    %49 = arith.mulf %47, %48 : vector<1x256xf32>
    %c1_31 = arith.constant 1 : index
    %c0_32 = arith.constant 0 : index
    %c0_33 = arith.constant 0 : index
    %50 = vector.load %arg1[%c1_31, %c0_32, %c0_33] : memref<2x32x256xf32, #tpu.memory_space<vmem>>, vector<1x32x256xf32>
    %51 = vector.shape_cast %50 : vector<1x32x256xf32> to vector<32x256xf32>
    %52 = vector.extract_strided_slice %38 {offsets = [0, 1], sizes = [32, 1], strides = [1, 1]} : vector<32x2xf32> to vector<32x1xf32>
    %53 = vector.broadcast %52 : vector<32x1xf32> to vector<32x256xf32>
    %54 = arith.mulf %51, %53 : vector<32x256xf32>
    %cst_34 = arith.constant dense<0xFF800000> : vector<256xf32>
    %55 = vector.multi_reduction <maximumf>, %54, %cst_34 [0] : vector<32x256xf32> to vector<256xf32>
    %56 = vector.shape_cast %55 : vector<256xf32> to vector<1x256xf32>
    %cst_35 = arith.constant dense<0.000000e+00> : vector<256xf32>
    %57 = vector.multi_reduction <add>, %54, %cst_35 [0] : vector<32x256xf32> to vector<256xf32>
    %58 = vector.shape_cast %57 : vector<256xf32> to vector<1x256xf32>
    %cst_36 = arith.constant 3.125000e-02 : f32
    %59 = vector.broadcast %cst_36 : f32 to vector<1x256xf32>
    %60 = arith.mulf %58, %59 : vector<1x256xf32>
    %61 = tpu.concatenate %45, %56 in 0 : vector<1x256xf32>, vector<1x256xf32> -> vector<2x256xf32>
    %62 = tpu.concatenate %49, %60 in 0 : vector<1x256xf32>, vector<1x256xf32> -> vector<2x256xf32>
    %63 = vector.shape_cast %61 : vector<2x256xf32> to vector<1x2x256xf32>
    %64 = vector.shape_cast %62 : vector<2x256xf32> to vector<1x2x256xf32>
    %65 = tpu.concatenate %63, %64 in 0 : vector<1x2x256xf32>, vector<1x2x256xf32> -> vector<2x2x256xf32>
    %c0_37 = arith.constant 0 : index
    %c0_38 = arith.constant 0 : index
    %c128 = arith.constant 128 : index
    %66 = vector.load %arg10[%c0_37, %c0_38, %c128] : memref<2x2x512xf32, #tpu.memory_space<vmem>>, vector<2x2x256xf32>
    tpu.vector_store %arg10[%c0_37, %c0_38, %c128], %65 {strides = array<i32>} : memref<2x2x512xf32, #tpu.memory_space<vmem>>, vector<2x2x256xf32>,
    %c0_39 = arith.constant 0 : index
    %c0_40 = arith.constant 0 : index
    %c0_41 = arith.constant 0 : index
    %67 = vector.load %arg8[%c0_39, %c0_40, %c0_41] : memref<7x1x256xf32, #tpu.memory_space<vmem>>, vector<7x1x256xf32>
    %c0_42 = arith.constant 0 : index
    %68 = memref.load %arg7[%c0_42] : memref<2xf32, #tpu.memory_space<smem>>
    %c1_43 = arith.constant 1 : index
    %69 = memref.load %arg7[%c1_43] : memref<2xf32, #tpu.memory_space<smem>>
    %cst_44 = arith.constant 0.000000e+00 : f32
    %70 = vector.broadcast %cst_44 : f32 to vector<2x256xf32>
    %c0_45 = arith.constant 0 : index
    %c0_46 = arith.constant 0 : index
    %c77 = arith.constant 77 : index
    %71 = vector.load %arg10[%c0_45, %c0_46, %c77] : memref<2x2x512xf32, #tpu.memory_space<vmem>>, vector<2x2x256xf32>
    %c0_47 = arith.constant 0 : index
    %72 = memref.load %arg6[%c0_47] : memref<98xf32, #tpu.memory_space<smem>>
    %c49 = arith.constant 49 : index
    %73 = memref.load %arg6[%c49] : memref<98xf32, #tpu.memory_space<smem>>
    %74 = vector.extract_strided_slice %71 {offsets = [0, 0, 0], sizes = [1, 2, 256], strides = [1, 1, 1]} : vector<2x2x256xf32> to vector<1x2x256xf32>
    %75 = vector.shape_cast %74 : vector<1x2x256xf32> to vector<2x256xf32>
    %76 = vector.broadcast %72 : f32 to vector<2x256xf32>
    %77 = arith.mulf %76, %75 : vector<2x256xf32>
    %78 = vector.extract_strided_slice %71 {offsets = [1, 0, 0], sizes = [1, 2, 256], strides = [1, 1, 1]} : vector<2x2x256xf32> to vector<1x2x256xf32>
    %79 = vector.shape_cast %78 : vector<1x2x256xf32> to vector<2x256xf32>
    %80 = vector.broadcast %73 : f32 to vector<2x256xf32>
    %81 = arith.mulf %80, %79 : vector<2x256xf32>
    %82 = arith.addf %77, %81 : vector<2x256xf32>
    %83 = vector.extract_strided_slice %67 {offsets = [0, 0, 0], sizes = [1, 1, 256], strides = [1, 1, 1]} : vector<7x1x256xf32> to vector<1x1x256xf32>
    %84 = vector.shape_cast %83 : vector<1x1x256xf32> to vector<1x256xf32>
    %85 = vector.broadcast %84 : vector<1x256xf32> to vector<2x256xf32>
    %86 = arith.mulf %82, %85 : vector<2x256xf32>
    %87 = arith.addf %70, %86 : vector<2x256xf32>
    %c0_48 = arith.constant 0 : index
    %c0_49 = arith.constant 0 : index
    %c78 = arith.constant 78 : index
    %88 = vector.load %arg10[%c0_48, %c0_49, %c78] : memref<2x2x512xf32, #tpu.memory_space<vmem>>, vector<2x2x256xf32>
    %c1_50 = arith.constant 1 : index
    %89 = memref.load %arg6[%c1_50] : memref<98xf32, #tpu.memory_space<smem>>
    %c50 = arith.constant 50 : index
    %90 = memref.load %arg6[%c50] : memref<98xf32, #tpu.memory_space<smem>>
    %91 = vector.extract_strided_slice %88 {offsets = [0, 0, 0], sizes = [1, 2, 256], strides = [1, 1, 1]} : vector<2x2x256xf32> to vector<1x2x256xf32>
    %92 = vector.shape_cast %91 : vector<1x2x256xf32> to vector<2x256xf32>
    %93 = vector.broadcast %89 : f32 to vector<2x256xf32>
    %94 = arith.mulf %93, %92 : vector<2x256xf32>
    %95 = vector.extract_strided_slice %88 {offsets = [1, 0, 0], sizes = [1, 2, 256], strides = [1, 1, 1]} : vector<2x2x256xf32> to vector<1x2x256xf32>
    %96 = vector.shape_cast %95 : vector<1x2x256xf32> to vector<2x256xf32>
    %97 = vector.broadcast %90 : f32 to vector<2x256xf32>
    %98 = arith.mulf %97, %96 : vector<2x256xf32>
    %99 = arith.addf %94, %98 : vector<2x256xf32>
    %100 = vector.extract_strided_slice %67 {offsets = [1, 0, 0], sizes = [1, 1, 256], strides = [1, 1, 1]} : vector<7x1x256xf32> to vector<1x1x256xf32>
    %101 = vector.shape_cast %100 : vector<1x1x256xf32> to vector<1x256xf32>
    %102 = vector.broadcast %101 : vector<1x256xf32> to vector<2x256xf32>
    %103 = arith.mulf %99, %102 : vector<2x256xf32>
    %104 = arith.addf %87, %103 : vector<2x256xf32>
    %c0_51 = arith.constant 0 : index
    %c0_52 = arith.constant 0 : index
    %c79 = arith.constant 79 : index
    %105 = vector.load %arg10[%c0_51, %c0_52, %c79] : memref<2x2x512xf32, #tpu.memory_space<vmem>>, vector<2x2x256xf32>
    %c2 = arith.constant 2 : index
    %106 = memref.load %arg6[%c2] : memref<98xf32, #tpu.memory_space<smem>>
    %c51 = arith.constant 51 : index
    %107 = memref.load %arg6[%c51] : memref<98xf32, #tpu.memory_space<smem>>
    %108 = vector.extract_strided_slice %105 {offsets = [0, 0, 0], sizes = [1, 2, 256], strides = [1, 1, 1]} : vector<2x2x256xf32> to vector<1x2x256xf32>
    %109 = vector.shape_cast %108 : vector<1x2x256xf32> to vector<2x256xf32>
    %110 = vector.broadcast %106 : f32 to vector<2x256xf32>
    %111 = arith.mulf %110, %109 : vector<2x256xf32>
    %112 = vector.extract_strided_slice %105 {offsets = [1, 0, 0], sizes = [1, 2, 256], strides = [1, 1, 1]} : vector<2x2x256xf32> to vector<1x2x256xf32>
    %113 = vector.shape_cast %112 : vector<1x2x256xf32> to vector<2x256xf32>
    %114 = vector.broadcast %107 : f32 to vector<2x256xf32>
    %115 = arith.mulf %114, %113 : vector<2x256xf32>
    %116 = arith.addf %111, %115 : vector<2x256xf32>
    %117 = vector.extract_strided_slice %67 {offsets = [2, 0, 0], sizes = [1, 1, 256], strides = [1, 1, 1]} : vector<7x1x256xf32> to vector<1x1x256xf32>
    %118 = vector.shape_cast %117 : vector<1x1x256xf32> to vector<1x256xf32>
    %119 = vector.broadcast %118 : vector<1x256xf32> to vector<2x256xf32>
    %120 = arith.mulf %116, %119 : vector<2x256xf32>
    %121 = arith.addf %104, %120 : vector<2x256xf32>
    %c0_53 = arith.constant 0 : index
    %c0_54 = arith.constant 0 : index
    %c80 = arith.constant 80 : index
    %122 = vector.load %arg10[%c0_53, %c0_54, %c80] : memref<2x2x512xf32, #tpu.memory_space<vmem>>, vector<2x2x256xf32>
    %c3 = arith.constant 3 : index
    %123 = memref.load %arg6[%c3] : memref<98xf32, #tpu.memory_space<smem>>
    %c52 = arith.constant 52 : index
    %124 = memref.load %arg6[%c52] : memref<98xf32, #tpu.memory_space<smem>>
    %125 = vector.extract_strided_slice %122 {offsets = [0, 0, 0], sizes = [1, 2, 256], strides = [1, 1, 1]} : vector<2x2x256xf32> to vector<1x2x256xf32>
    %126 = vector.shape_cast %125 : vector<1x2x256xf32> to vector<2x256xf32>
    %127 = vector.broadcast %123 : f32 to vector<2x256xf32>
    %128 = arith.mulf %127, %126 : vector<2x256xf32>
    %129 = vector.extract_strided_slice %122 {offsets = [1, 0, 0], sizes = [1, 2, 256], strides = [1, 1, 1]} : vector<2x2x256xf32> to vector<1x2x256xf32>
    %130 = vector.shape_cast %129 : vector<1x2x256xf32> to vector<2x256xf32>
    %131 = vector.broadcast %124 : f32 to vector<2x256xf32>
    %132 = arith.mulf %131, %130 : vector<2x256xf32>
    %133 = arith.addf %128, %132 : vector<2x256xf32>
    %134 = arith.addf %121, %133 : vector<2x256xf32>
    %c0_55 = arith.constant 0 : index
    %c0_56 = arith.constant 0 : index
    %c81 = arith.constant 81 : index
    %135 = vector.load %arg10[%c0_55, %c0_56, %c81] : memref<2x2x512xf32, #tpu.memory_space<vmem>>, vector<2x2x256xf32>
    %c4 = arith.constant 4 : index
    %136 = memref.load %arg6[%c4] : memref<98xf32, #tpu.memory_space<smem>>
    %c53 = arith.constant 53 : index
    %137 = memref.load %arg6[%c53] : memref<98xf32, #tpu.memory_space<smem>>
    %138 = vector.extract_strided_slice %135 {offsets = [0, 0, 0], sizes = [1, 2, 256], strides = [1, 1, 1]} : vector<2x2x256xf32> to vector<1x2x256xf32>
    %139 = vector.shape_cast %138 : vector<1x2x256xf32> to vector<2x256xf32>
    %140 = vector.broadcast %136 : f32 to vector<2x256xf32>
    %141 = arith.mulf %140, %139 : vector<2x256xf32>
    %142 = vector.extract_strided_slice %135 {offsets = [1, 0, 0], sizes = [1, 2, 256], strides = [1, 1, 1]} : vector<2x2x256xf32> to vector<1x2x256xf32>
    %143 = vector.shape_cast %142 : vector<1x2x256xf32> to vector<2x256xf32>
    %144 = vector.broadcast %137 : f32 to vector<2x256xf32>
    %145 = arith.mulf %144, %143 : vector<2x256xf32>
    %146 = arith.addf %141, %145 : vector<2x256xf32>
    %147 = vector.extract_strided_slice %67 {offsets = [4, 0, 0], sizes = [1, 1, 256], strides = [1, 1, 1]} : vector<7x1x256xf32> to vector<1x1x256xf32>
    %148 = vector.shape_cast %147 : vector<1x1x256xf32> to vector<1x256xf32>
    %149 = vector.broadcast %148 : vector<1x256xf32> to vector<2x256xf32>
    %150 = arith.mulf %146, %149 : vector<2x256xf32>
    %151 = arith.addf %134, %150 : vector<2x256xf32>
    %c0_57 = arith.constant 0 : index
    %c0_58 = arith.constant 0 : index
    %c82 = arith.constant 82 : index
    %152 = vector.load %arg10[%c0_57, %c0_58, %c82] : memref<2x2x512xf32, #tpu.memory_space<vmem>>, vector<2x2x256xf32>
    %c5 = arith.constant 5 : index
    %153 = memref.load %arg6[%c5] : memref<98xf32, #tpu.memory_space<smem>>
    %c54 = arith.constant 54 : index
    %154 = memref.load %arg6[%c54] : memref<98xf32, #tpu.memory_space<smem>>
    %155 = vector.extract_strided_slice %152 {offsets = [0, 0, 0], sizes = [1, 2, 256], strides = [1, 1, 1]} : vector<2x2x256xf32> to vector<1x2x256xf32>
    %156 = vector.shape_cast %155 : vector<1x2x256xf32> to vector<2x256xf32>
    %157 = vector.broadcast %153 : f32 to vector<2x256xf32>
    %158 = arith.mulf %157, %156 : vector<2x256xf32>
    %159 = vector.extract_strided_slice %152 {offsets = [1, 0, 0], sizes = [1, 2, 256], strides = [1, 1, 1]} : vector<2x2x256xf32> to vector<1x2x256xf32>
    %160 = vector.shape_cast %159 : vector<1x2x256xf32> to vector<2x256xf32>
    %161 = vector.broadcast %154 : f32 to vector<2x256xf32>
    %162 = arith.mulf %161, %160 : vector<2x256xf32>
    %163 = arith.addf %158, %162 : vector<2x256xf32>
    %164 = vector.extract_strided_slice %67 {offsets = [5, 0, 0], sizes = [1, 1, 256], strides = [1, 1, 1]} : vector<7x1x256xf32> to vector<1x1x256xf32>
    %165 = vector.shape_cast %164 : vector<1x1x256xf32> to vector<1x256xf32>
    %166 = vector.broadcast %165 : vector<1x256xf32> to vector<2x256xf32>
    %167 = arith.mulf %163, %166 : vector<2x256xf32>
    %168 = arith.addf %151, %167 : vector<2x256xf32>
    %c0_59 = arith.constant 0 : index
    %c0_60 = arith.constant 0 : index
    %c83 = arith.constant 83 : index
    %169 = vector.load %arg10[%c0_59, %c0_60, %c83] : memref<2x2x512xf32, #tpu.memory_space<vmem>>, vector<2x2x256xf32>
    %c6 = arith.constant 6 : index
    %170 = memref.load %arg6[%c6] : memref<98xf32, #tpu.memory_space<smem>>
    %c55 = arith.constant 55 : index
    %171 = memref.load %arg6[%c55] : memref<98xf32, #tpu.memory_space<smem>>
    %172 = vector.extract_strided_slice %169 {offsets = [0, 0, 0], sizes = [1, 2, 256], strides = [1, 1, 1]} : vector<2x2x256xf32> to vector<1x2x256xf32>
    %173 = vector.shape_cast %172 : vector<1x2x256xf32> to vector<2x256xf32>
    %174 = vector.broadcast %170 : f32 to vector<2x256xf32>
    %175 = arith.mulf %174, %173 : vector<2x256xf32>
    %176 = vector.extract_strided_slice %169 {offsets = [1, 0, 0], sizes = [1, 2, 256], strides = [1, 1, 1]} : vector<2x2x256xf32> to vector<1x2x256xf32>
    %177 = vector.shape_cast %176 : vector<1x2x256xf32> to vector<2x256xf32>
    %178 = vector.broadcast %171 : f32 to vector<2x256xf32>
    %179 = arith.mulf %178, %177 : vector<2x256xf32>
    %180 = arith.addf %175, %179 : vector<2x256xf32>
    %181 = vector.extract_strided_slice %67 {offsets = [6, 0, 0], sizes = [1, 1, 256], strides = [1, 1, 1]} : vector<7x1x256xf32> to vector<1x1x256xf32>
    %182 = vector.shape_cast %181 : vector<1x1x256xf32> to vector<1x256xf32>
    %183 = vector.broadcast %182 : vector<1x256xf32> to vector<2x256xf32>
    %184 = arith.mulf %180, %183 : vector<2x256xf32>
    %185 = arith.addf %168, %184 : vector<2x256xf32>
    %c0_61 = arith.constant 0 : index
    %c0_62 = arith.constant 0 : index
    %c93 = arith.constant 93 : index
    %186 = vector.load %arg10[%c0_61, %c0_62, %c93] : memref<2x2x512xf32, #tpu.memory_space<vmem>>, vector<2x2x256xf32>
    %c7 = arith.constant 7 : index
    %187 = memref.load %arg6[%c7] : memref<98xf32, #tpu.memory_space<smem>>
    %c56 = arith.constant 56 : index
    %188 = memref.load %arg6[%c56] : memref<98xf32, #tpu.memory_space<smem>>
    %189 = vector.extract_strided_slice %186 {offsets = [0, 0, 0], sizes = [1, 2, 256], strides = [1, 1, 1]} : vector<2x2x256xf32> to vector<1x2x256xf32>
    %190 = vector.shape_cast %189 : vector<1x2x256xf32> to vector<2x256xf32>
    %191 = vector.broadcast %187 : f32 to vector<2x256xf32>
    %192 = arith.mulf %191, %190 : vector<2x256xf32>
    %193 = vector.extract_strided_slice %186 {offsets = [1, 0, 0], sizes = [1, 2, 256], strides = [1, 1, 1]} : vector<2x2x256xf32> to vector<1x2x256xf32>
    %194 = vector.shape_cast %193 : vector<1x2x256xf32> to vector<2x256xf32>
    %195 = vector.broadcast %188 : f32 to vector<2x256xf32>
    %196 = arith.mulf %195, %194 : vector<2x256xf32>
    %197 = arith.addf %192, %196 : vector<2x256xf32>
    %198 = vector.extract_strided_slice %67 {offsets = [0, 0, 0], sizes = [1, 1, 256], strides = [1, 1, 1]} : vector<7x1x256xf32> to vector<1x1x256xf32>
    %199 = vector.shape_cast %198 : vector<1x1x256xf32> to vector<1x256xf32>
    %200 = vector.broadcast %199 : vector<1x256xf32> to vector<2x256xf32>
    %201 = arith.mulf %197, %200 : vector<2x256xf32>
    %202 = arith.addf %185, %201 : vector<2x256xf32>
    %c0_63 = arith.constant 0 : index
    %c0_64 = arith.constant 0 : index
    %c94 = arith.constant 94 : index
    %203 = vector.load %arg10[%c0_63, %c0_64, %c94] : memref<2x2x512xf32, #tpu.memory_space<vmem>>, vector<2x2x256xf32>
    %c8 = arith.constant 8 : index
    %204 = memref.load %arg6[%c8] : memref<98xf32, #tpu.memory_space<smem>>
    %c57 = arith.constant 57 : index
    %205 = memref.load %arg6[%c57] : memref<98xf32, #tpu.memory_space<smem>>
    %206 = vector.extract_strided_slice %203 {offsets = [0, 0, 0], sizes = [1, 2, 256], strides = [1, 1, 1]} : vector<2x2x256xf32> to vector<1x2x256xf32>
    %207 = vector.shape_cast %206 : vector<1x2x256xf32> to vector<2x256xf32>
    %208 = vector.broadcast %204 : f32 to vector<2x256xf32>
    %209 = arith.mulf %208, %207 : vector<2x256xf32>
    %210 = vector.extract_strided_slice %203 {offsets = [1, 0, 0], sizes = [1, 2, 256], strides = [1, 1, 1]} : vector<2x2x256xf32> to vector<1x2x256xf32>
    %211 = vector.shape_cast %210 : vector<1x2x256xf32> to vector<2x256xf32>
    %212 = vector.broadcast %205 : f32 to vector<2x256xf32>
    %213 = arith.mulf %212, %211 : vector<2x256xf32>
    %214 = arith.addf %209, %213 : vector<2x256xf32>
    %215 = vector.extract_strided_slice %67 {offsets = [1, 0, 0], sizes = [1, 1, 256], strides = [1, 1, 1]} : vector<7x1x256xf32> to vector<1x1x256xf32>
    %216 = vector.shape_cast %215 : vector<1x1x256xf32> to vector<1x256xf32>
    %217 = vector.broadcast %216 : vector<1x256xf32> to vector<2x256xf32>
    %218 = arith.mulf %214, %217 : vector<2x256xf32>
    %219 = arith.addf %202, %218 : vector<2x256xf32>
    %c0_65 = arith.constant 0 : index
    %c0_66 = arith.constant 0 : index
    %c95 = arith.constant 95 : index
    %220 = vector.load %arg10[%c0_65, %c0_66, %c95] : memref<2x2x512xf32, #tpu.memory_space<vmem>>, vector<2x2x256xf32>
    %c9 = arith.constant 9 : index
    %221 = memref.load %arg6[%c9] : memref<98xf32, #tpu.memory_space<smem>>
    %c58 = arith.constant 58 : index
    %222 = memref.load %arg6[%c58] : memref<98xf32, #tpu.memory_space<smem>>
    %223 = vector.extract_strided_slice %220 {offsets = [0, 0, 0], sizes = [1, 2, 256], strides = [1, 1, 1]} : vector<2x2x256xf32> to vector<1x2x256xf32>
    %224 = vector.shape_cast %223 : vector<1x2x256xf32> to vector<2x256xf32>
    %225 = vector.broadcast %221 : f32 to vector<2x256xf32>
    %226 = arith.mulf %225, %224 : vector<2x256xf32>
    %227 = vector.extract_strided_slice %220 {offsets = [1, 0, 0], sizes = [1, 2, 256], strides = [1, 1, 1]} : vector<2x2x256xf32> to vector<1x2x256xf32>
    %228 = vector.shape_cast %227 : vector<1x2x256xf32> to vector<2x256xf32>
    %229 = vector.broadcast %222 : f32 to vector<2x256xf32>
    %230 = arith.mulf %229, %228 : vector<2x256xf32>
    %231 = arith.addf %226, %230 : vector<2x256xf32>
    %232 = vector.extract_strided_slice %67 {offsets = [2, 0, 0], sizes = [1, 1, 256], strides = [1, 1, 1]} : vector<7x1x256xf32> to vector<1x1x256xf32>
    %233 = vector.shape_cast %232 : vector<1x1x256xf32> to vector<1x256xf32>
    %234 = vector.broadcast %233 : vector<1x256xf32> to vector<2x256xf32>
    %235 = arith.mulf %231, %234 : vector<2x256xf32>
    %236 = arith.addf %219, %235 : vector<2x256xf32>
    %c0_67 = arith.constant 0 : index
    %c0_68 = arith.constant 0 : index
    %c96 = arith.constant 96 : index
    %237 = vector.load %arg10[%c0_67, %c0_68, %c96] : memref<2x2x512xf32, #tpu.memory_space<vmem>>, vector<2x2x256xf32>
    %c10 = arith.constant 10 : index
    %238 = memref.load %arg6[%c10] : memref<98xf32, #tpu.memory_space<smem>>
    %c59 = arith.constant 59 : index
    %239 = memref.load %arg6[%c59] : memref<98xf32, #tpu.memory_space<smem>>
    %240 = vector.extract_strided_slice %237 {offsets = [0, 0, 0], sizes = [1, 2, 256], strides = [1, 1, 1]} : vector<2x2x256xf32> to vector<1x2x256xf32>
    %241 = vector.shape_cast %240 : vector<1x2x256xf32> to vector<2x256xf32>
    %242 = vector.broadcast %238 : f32 to vector<2x256xf32>
    %243 = arith.mulf %242, %241 : vector<2x256xf32>
    %244 = vector.extract_strided_slice %237 {offsets = [1, 0, 0], sizes = [1, 2, 256], strides = [1, 1, 1]} : vector<2x2x256xf32> to vector<1x2x256xf32>
    %245 = vector.shape_cast %244 : vector<1x2x256xf32> to vector<2x256xf32>
    %246 = vector.broadcast %239 : f32 to vector<2x256xf32>
    %247 = arith.mulf %246, %245 : vector<2x256xf32>
    %248 = arith.addf %243, %247 : vector<2x256xf32>
    %249 = arith.addf %236, %248 : vector<2x256xf32>
    %c0_69 = arith.constant 0 : index
    %c0_70 = arith.constant 0 : index
    %c97 = arith.constant 97 : index
    %250 = vector.load %arg10[%c0_69, %c0_70, %c97] : memref<2x2x512xf32, #tpu.memory_space<vmem>>, vector<2x2x256xf32>
    %c11 = arith.constant 11 : index
    %251 = memref.load %arg6[%c11] : memref<98xf32, #tpu.memory_space<smem>>
    %c60 = arith.constant 60 : index
    %252 = memref.load %arg6[%c60] : memref<98xf32, #tpu.memory_space<smem>>
    %253 = vector.extract_strided_slice %250 {offsets = [0, 0, 0], sizes = [1, 2, 256], strides = [1, 1, 1]} : vector<2x2x256xf32> to vector<1x2x256xf32>
    %254 = vector.shape_cast %253 : vector<1x2x256xf32> to vector<2x256xf32>
    %255 = vector.broadcast %251 : f32 to vector<2x256xf32>
    %256 = arith.mulf %255, %254 : vector<2x256xf32>
    %257 = vector.extract_strided_slice %250 {offsets = [1, 0, 0], sizes = [1, 2, 256], strides = [1, 1, 1]} : vector<2x2x256xf32> to vector<1x2x256xf32>
    %258 = vector.shape_cast %257 : vector<1x2x256xf32> to vector<2x256xf32>
    %259 = vector.broadcast %252 : f32 to vector<2x256xf32>
    %260 = arith.mulf %259, %258 : vector<2x256xf32>
    %261 = arith.addf %256, %260 : vector<2x256xf32>
    %262 = vector.extract_strided_slice %67 {offsets = [4, 0, 0], sizes = [1, 1, 256], strides = [1, 1, 1]} : vector<7x1x256xf32> to vector<1x1x256xf32>
    %263 = vector.shape_cast %262 : vector<1x1x256xf32> to vector<1x256xf32>
    %264 = vector.broadcast %263 : vector<1x256xf32> to vector<2x256xf32>
    %265 = arith.mulf %261, %264 : vector<2x256xf32>
    %266 = arith.addf %249, %265 : vector<2x256xf32>
    %c0_71 = arith.constant 0 : index
    %c0_72 = arith.constant 0 : index
    %c98 = arith.constant 98 : index
    %267 = vector.load %arg10[%c0_71, %c0_72, %c98] : memref<2x2x512xf32, #tpu.memory_space<vmem>>, vector<2x2x256xf32>
    %c12 = arith.constant 12 : index
    %268 = memref.load %arg6[%c12] : memref<98xf32, #tpu.memory_space<smem>>
    %c61 = arith.constant 61 : index
    %269 = memref.load %arg6[%c61] : memref<98xf32, #tpu.memory_space<smem>>
    %270 = vector.extract_strided_slice %267 {offsets = [0, 0, 0], sizes = [1, 2, 256], strides = [1, 1, 1]} : vector<2x2x256xf32> to vector<1x2x256xf32>
    %271 = vector.shape_cast %270 : vector<1x2x256xf32> to vector<2x256xf32>
    %272 = vector.broadcast %268 : f32 to vector<2x256xf32>
    %273 = arith.mulf %272, %271 : vector<2x256xf32>
    %274 = vector.extract_strided_slice %267 {offsets = [1, 0, 0], sizes = [1, 2, 256], strides = [1, 1, 1]} : vector<2x2x256xf32> to vector<1x2x256xf32>
    %275 = vector.shape_cast %274 : vector<1x2x256xf32> to vector<2x256xf32>
    %276 = vector.broadcast %269 : f32 to vector<2x256xf32>
    %277 = arith.mulf %276, %275 : vector<2x256xf32>
    %278 = arith.addf %273, %277 : vector<2x256xf32>
    %279 = vector.extract_strided_slice %67 {offsets = [5, 0, 0], sizes = [1, 1, 256], strides = [1, 1, 1]} : vector<7x1x256xf32> to vector<1x1x256xf32>
    %280 = vector.shape_cast %279 : vector<1x1x256xf32> to vector<1x256xf32>
    %281 = vector.broadcast %280 : vector<1x256xf32> to vector<2x256xf32>
    %282 = arith.mulf %278, %281 : vector<2x256xf32>
    %283 = arith.addf %266, %282 : vector<2x256xf32>
    %c0_73 = arith.constant 0 : index
    %c0_74 = arith.constant 0 : index
    %c99 = arith.constant 99 : index
    %284 = vector.load %arg10[%c0_73, %c0_74, %c99] : memref<2x2x512xf32, #tpu.memory_space<vmem>>, vector<2x2x256xf32>
    %c13 = arith.constant 13 : index
    %285 = memref.load %arg6[%c13] : memref<98xf32, #tpu.memory_space<smem>>
    %c62 = arith.constant 62 : index
    %286 = memref.load %arg6[%c62] : memref<98xf32, #tpu.memory_space<smem>>
    %287 = vector.extract_strided_slice %284 {offsets = [0, 0, 0], sizes = [1, 2, 256], strides = [1, 1, 1]} : vector<2x2x256xf32> to vector<1x2x256xf32>
    %288 = vector.shape_cast %287 : vector<1x2x256xf32> to vector<2x256xf32>
    %289 = vector.broadcast %285 : f32 to vector<2x256xf32>
    %290 = arith.mulf %289, %288 : vector<2x256xf32>
    %291 = vector.extract_strided_slice %284 {offsets = [1, 0, 0], sizes = [1, 2, 256], strides = [1, 1, 1]} : vector<2x2x256xf32> to vector<1x2x256xf32>
    %292 = vector.shape_cast %291 : vector<1x2x256xf32> to vector<2x256xf32>
    %293 = vector.broadcast %286 : f32 to vector<2x256xf32>
    %294 = arith.mulf %293, %292 : vector<2x256xf32>
    %295 = arith.addf %290, %294 : vector<2x256xf32>
    %296 = vector.extract_strided_slice %67 {offsets = [6, 0, 0], sizes = [1, 1, 256], strides = [1, 1, 1]} : vector<7x1x256xf32> to vector<1x1x256xf32>
    %297 = vector.shape_cast %296 : vector<1x1x256xf32> to vector<1x256xf32>
    %298 = vector.broadcast %297 : vector<1x256xf32> to vector<2x256xf32>
    %299 = arith.mulf %295, %298 : vector<2x256xf32>
    %300 = arith.addf %283, %299 : vector<2x256xf32>
    %c0_75 = arith.constant 0 : index
    %c0_76 = arith.constant 0 : index
    %c109 = arith.constant 109 : index
    %301 = vector.load %arg10[%c0_75, %c0_76, %c109] : memref<2x2x512xf32, #tpu.memory_space<vmem>>, vector<2x2x256xf32>
    %c14 = arith.constant 14 : index
    %302 = memref.load %arg6[%c14] : memref<98xf32, #tpu.memory_space<smem>>
    %c63 = arith.constant 63 : index
    %303 = memref.load %arg6[%c63] : memref<98xf32, #tpu.memory_space<smem>>
    %304 = vector.extract_strided_slice %301 {offsets = [0, 0, 0], sizes = [1, 2, 256], strides = [1, 1, 1]} : vector<2x2x256xf32> to vector<1x2x256xf32>
    %305 = vector.shape_cast %304 : vector<1x2x256xf32> to vector<2x256xf32>
    %306 = vector.broadcast %302 : f32 to vector<2x256xf32>
    %307 = arith.mulf %306, %305 : vector<2x256xf32>
    %308 = vector.extract_strided_slice %301 {offsets = [1, 0, 0], sizes = [1, 2, 256], strides = [1, 1, 1]} : vector<2x2x256xf32> to vector<1x2x256xf32>
    %309 = vector.shape_cast %308 : vector<1x2x256xf32> to vector<2x256xf32>
    %310 = vector.broadcast %303 : f32 to vector<2x256xf32>
    %311 = arith.mulf %310, %309 : vector<2x256xf32>
    %312 = arith.addf %307, %311 : vector<2x256xf32>
    %313 = vector.extract_strided_slice %67 {offsets = [0, 0, 0], sizes = [1, 1, 256], strides = [1, 1, 1]} : vector<7x1x256xf32> to vector<1x1x256xf32>
    %314 = vector.shape_cast %313 : vector<1x1x256xf32> to vector<1x256xf32>
    %315 = vector.broadcast %314 : vector<1x256xf32> to vector<2x256xf32>
    %316 = arith.mulf %312, %315 : vector<2x256xf32>
    %317 = arith.addf %300, %316 : vector<2x256xf32>
    %c0_77 = arith.constant 0 : index
    %c0_78 = arith.constant 0 : index
    %c110 = arith.constant 110 : index
    %318 = vector.load %arg10[%c0_77, %c0_78, %c110] : memref<2x2x512xf32, #tpu.memory_space<vmem>>, vector<2x2x256xf32>
    %c15 = arith.constant 15 : index
    %319 = memref.load %arg6[%c15] : memref<98xf32, #tpu.memory_space<smem>>
    %c64 = arith.constant 64 : index
    %320 = memref.load %arg6[%c64] : memref<98xf32, #tpu.memory_space<smem>>
    %321 = vector.extract_strided_slice %318 {offsets = [0, 0, 0], sizes = [1, 2, 256], strides = [1, 1, 1]} : vector<2x2x256xf32> to vector<1x2x256xf32>
    %322 = vector.shape_cast %321 : vector<1x2x256xf32> to vector<2x256xf32>
    %323 = vector.broadcast %319 : f32 to vector<2x256xf32>
    %324 = arith.mulf %323, %322 : vector<2x256xf32>
    %325 = vector.extract_strided_slice %318 {offsets = [1, 0, 0], sizes = [1, 2, 256], strides = [1, 1, 1]} : vector<2x2x256xf32> to vector<1x2x256xf32>
    %326 = vector.shape_cast %325 : vector<1x2x256xf32> to vector<2x256xf32>
    %327 = vector.broadcast %320 : f32 to vector<2x256xf32>
    %328 = arith.mulf %327, %326 : vector<2x256xf32>
    %329 = arith.addf %324, %328 : vector<2x256xf32>
    %330 = vector.extract_strided_slice %67 {offsets = [1, 0, 0], sizes = [1, 1, 256], strides = [1, 1, 1]} : vector<7x1x256xf32> to vector<1x1x256xf32>
    %331 = vector.shape_cast %330 : vector<1x1x256xf32> to vector<1x256xf32>
    %332 = vector.broadcast %331 : vector<1x256xf32> to vector<2x256xf32>
    %333 = arith.mulf %329, %332 : vector<2x256xf32>
    %334 = arith.addf %317, %333 : vector<2x256xf32>
    %c0_79 = arith.constant 0 : index
    %c0_80 = arith.constant 0 : index
    %c111 = arith.constant 111 : index
    %335 = vector.load %arg10[%c0_79, %c0_80, %c111] : memref<2x2x512xf32, #tpu.memory_space<vmem>>, vector<2x2x256xf32>
    %c16 = arith.constant 16 : index
    %336 = memref.load %arg6[%c16] : memref<98xf32, #tpu.memory_space<smem>>
    %c65 = arith.constant 65 : index
    %337 = memref.load %arg6[%c65] : memref<98xf32, #tpu.memory_space<smem>>
    %338 = vector.extract_strided_slice %335 {offsets = [0, 0, 0], sizes = [1, 2, 256], strides = [1, 1, 1]} : vector<2x2x256xf32> to vector<1x2x256xf32>
    %339 = vector.shape_cast %338 : vector<1x2x256xf32> to vector<2x256xf32>
    %340 = vector.broadcast %336 : f32 to vector<2x256xf32>
    %341 = arith.mulf %340, %339 : vector<2x256xf32>
    %342 = vector.extract_strided_slice %335 {offsets = [1, 0, 0], sizes = [1, 2, 256], strides = [1, 1, 1]} : vector<2x2x256xf32> to vector<1x2x256xf32>
    %343 = vector.shape_cast %342 : vector<1x2x256xf32> to vector<2x256xf32>
    %344 = vector.broadcast %337 : f32 to vector<2x256xf32>
    %345 = arith.mulf %344, %343 : vector<2x256xf32>
    %346 = arith.addf %341, %345 : vector<2x256xf32>
    %347 = vector.extract_strided_slice %67 {offsets = [2, 0, 0], sizes = [1, 1, 256], strides = [1, 1, 1]} : vector<7x1x256xf32> to vector<1x1x256xf32>
    %348 = vector.shape_cast %347 : vector<1x1x256xf32> to vector<1x256xf32>
    %349 = vector.broadcast %348 : vector<1x256xf32> to vector<2x256xf32>
    %350 = arith.mulf %346, %349 : vector<2x256xf32>
    %351 = arith.addf %334, %350 : vector<2x256xf32>
    %c0_81 = arith.constant 0 : index
    %c0_82 = arith.constant 0 : index
    %c112 = arith.constant 112 : index
    %352 = vector.load %arg10[%c0_81, %c0_82, %c112] : memref<2x2x512xf32, #tpu.memory_space<vmem>>, vector<2x2x256xf32>
    %c17 = arith.constant 17 : index
    %353 = memref.load %arg6[%c17] : memref<98xf32, #tpu.memory_space<smem>>
    %c66 = arith.constant 66 : index
    %354 = memref.load %arg6[%c66] : memref<98xf32, #tpu.memory_space<smem>>
    %355 = vector.extract_strided_slice %352 {offsets = [0, 0, 0], sizes = [1, 2, 256], strides = [1, 1, 1]} : vector<2x2x256xf32> to vector<1x2x256xf32>
    %356 = vector.shape_cast %355 : vector<1x2x256xf32> to vector<2x256xf32>
    %357 = vector.broadcast %353 : f32 to vector<2x256xf32>
    %358 = arith.mulf %357, %356 : vector<2x256xf32>
    %359 = vector.extract_strided_slice %352 {offsets = [1, 0, 0], sizes = [1, 2, 256], strides = [1, 1, 1]} : vector<2x2x256xf32> to vector<1x2x256xf32>
    %360 = vector.shape_cast %359 : vector<1x2x256xf32> to vector<2x256xf32>
    %361 = vector.broadcast %354 : f32 to vector<2x256xf32>
    %362 = arith.mulf %361, %360 : vector<2x256xf32>
    %363 = arith.addf %358, %362 : vector<2x256xf32>
    %364 = arith.addf %351, %363 : vector<2x256xf32>
    %c0_83 = arith.constant 0 : index
    %c0_84 = arith.constant 0 : index
    %c113 = arith.constant 113 : index
    %365 = vector.load %arg10[%c0_83, %c0_84, %c113] : memref<2x2x512xf32, #tpu.memory_space<vmem>>, vector<2x2x256xf32>
    %c18 = arith.constant 18 : index
    %366 = memref.load %arg6[%c18] : memref<98xf32, #tpu.memory_space<smem>>
    %c67 = arith.constant 67 : index
    %367 = memref.load %arg6[%c67] : memref<98xf32, #tpu.memory_space<smem>>
    %368 = vector.extract_strided_slice %365 {offsets = [0, 0, 0], sizes = [1, 2, 256], strides = [1, 1, 1]} : vector<2x2x256xf32> to vector<1x2x256xf32>
    %369 = vector.shape_cast %368 : vector<1x2x256xf32> to vector<2x256xf32>
    %370 = vector.broadcast %366 : f32 to vector<2x256xf32>
    %371 = arith.mulf %370, %369 : vector<2x256xf32>
    %372 = vector.extract_strided_slice %365 {offsets = [1, 0, 0], sizes = [1, 2, 256], strides = [1, 1, 1]} : vector<2x2x256xf32> to vector<1x2x256xf32>
    %373 = vector.shape_cast %372 : vector<1x2x256xf32> to vector<2x256xf32>
    %374 = vector.broadcast %367 : f32 to vector<2x256xf32>
    %375 = arith.mulf %374, %373 : vector<2x256xf32>
    %376 = arith.addf %371, %375 : vector<2x256xf32>
    %377 = vector.extract_strided_slice %67 {offsets = [4, 0, 0], sizes = [1, 1, 256], strides = [1, 1, 1]} : vector<7x1x256xf32> to vector<1x1x256xf32>
    %378 = vector.shape_cast %377 : vector<1x1x256xf32> to vector<1x256xf32>
    %379 = vector.broadcast %378 : vector<1x256xf32> to vector<2x256xf32>
    %380 = arith.mulf %376, %379 : vector<2x256xf32>
    %381 = arith.addf %364, %380 : vector<2x256xf32>
    %c0_85 = arith.constant 0 : index
    %c0_86 = arith.constant 0 : index
    %c114 = arith.constant 114 : index
    %382 = vector.load %arg10[%c0_85, %c0_86, %c114] : memref<2x2x512xf32, #tpu.memory_space<vmem>>, vector<2x2x256xf32>
    %c19 = arith.constant 19 : index
    %383 = memref.load %arg6[%c19] : memref<98xf32, #tpu.memory_space<smem>>
    %c68 = arith.constant 68 : index
    %384 = memref.load %arg6[%c68] : memref<98xf32, #tpu.memory_space<smem>>
    %385 = vector.extract_strided_slice %382 {offsets = [0, 0, 0], sizes = [1, 2, 256], strides = [1, 1, 1]} : vector<2x2x256xf32> to vector<1x2x256xf32>
    %386 = vector.shape_cast %385 : vector<1x2x256xf32> to vector<2x256xf32>
    %387 = vector.broadcast %383 : f32 to vector<2x256xf32>
    %388 = arith.mulf %387, %386 : vector<2x256xf32>
    %389 = vector.extract_strided_slice %382 {offsets = [1, 0, 0], sizes = [1, 2, 256], strides = [1, 1, 1]} : vector<2x2x256xf32> to vector<1x2x256xf32>
    %390 = vector.shape_cast %389 : vector<1x2x256xf32> to vector<2x256xf32>
    %391 = vector.broadcast %384 : f32 to vector<2x256xf32>
    %392 = arith.mulf %391, %390 : vector<2x256xf32>
    %393 = arith.addf %388, %392 : vector<2x256xf32>
    %394 = vector.extract_strided_slice %67 {offsets = [5, 0, 0], sizes = [1, 1, 256], strides = [1, 1, 1]} : vector<7x1x256xf32> to vector<1x1x256xf32>
    %395 = vector.shape_cast %394 : vector<1x1x256xf32> to vector<1x256xf32>
    %396 = vector.broadcast %395 : vector<1x256xf32> to vector<2x256xf32>
    %397 = arith.mulf %393, %396 : vector<2x256xf32>
    %398 = arith.addf %381, %397 : vector<2x256xf32>
    %c0_87 = arith.constant 0 : index
    %c0_88 = arith.constant 0 : index
    %c115 = arith.constant 115 : index
    %399 = vector.load %arg10[%c0_87, %c0_88, %c115] : memref<2x2x512xf32, #tpu.memory_space<vmem>>, vector<2x2x256xf32>
    %c20 = arith.constant 20 : index
    %400 = memref.load %arg6[%c20] : memref<98xf32, #tpu.memory_space<smem>>
    %c69 = arith.constant 69 : index
    %401 = memref.load %arg6[%c69] : memref<98xf32, #tpu.memory_space<smem>>
    %402 = vector.extract_strided_slice %399 {offsets = [0, 0, 0], sizes = [1, 2, 256], strides = [1, 1, 1]} : vector<2x2x256xf32> to vector<1x2x256xf32>
    %403 = vector.shape_cast %402 : vector<1x2x256xf32> to vector<2x256xf32>
    %404 = vector.broadcast %400 : f32 to vector<2x256xf32>
    %405 = arith.mulf %404, %403 : vector<2x256xf32>
    %406 = vector.extract_strided_slice %399 {offsets = [1, 0, 0], sizes = [1, 2, 256], strides = [1, 1, 1]} : vector<2x2x256xf32> to vector<1x2x256xf32>
    %407 = vector.shape_cast %406 : vector<1x2x256xf32> to vector<2x256xf32>
    %408 = vector.broadcast %401 : f32 to vector<2x256xf32>
    %409 = arith.mulf %408, %407 : vector<2x256xf32>
    %410 = arith.addf %405, %409 : vector<2x256xf32>
    %411 = vector.extract_strided_slice %67 {offsets = [6, 0, 0], sizes = [1, 1, 256], strides = [1, 1, 1]} : vector<7x1x256xf32> to vector<1x1x256xf32>
    %412 = vector.shape_cast %411 : vector<1x1x256xf32> to vector<1x256xf32>
    %413 = vector.broadcast %412 : vector<1x256xf32> to vector<2x256xf32>
    %414 = arith.mulf %410, %413 : vector<2x256xf32>
    %415 = arith.addf %398, %414 : vector<2x256xf32>
    %c0_89 = arith.constant 0 : index
    %c0_90 = arith.constant 0 : index
    %c125 = arith.constant 125 : index
    %416 = vector.load %arg10[%c0_89, %c0_90, %c125] : memref<2x2x512xf32, #tpu.memory_space<vmem>>, vector<2x2x256xf32>
    %c21 = arith.constant 21 : index
    %417 = memref.load %arg6[%c21] : memref<98xf32, #tpu.memory_space<smem>>
    %c70 = arith.constant 70 : index
    %418 = memref.load %arg6[%c70] : memref<98xf32, #tpu.memory_space<smem>>
    %419 = vector.extract_strided_slice %416 {offsets = [0, 0, 0], sizes = [1, 2, 256], strides = [1, 1, 1]} : vector<2x2x256xf32> to vector<1x2x256xf32>
    %420 = vector.shape_cast %419 : vector<1x2x256xf32> to vector<2x256xf32>
    %421 = vector.broadcast %417 : f32 to vector<2x256xf32>
    %422 = arith.mulf %421, %420 : vector<2x256xf32>
    %423 = vector.extract_strided_slice %416 {offsets = [1, 0, 0], sizes = [1, 2, 256], strides = [1, 1, 1]} : vector<2x2x256xf32> to vector<1x2x256xf32>
    %424 = vector.shape_cast %423 : vector<1x2x256xf32> to vector<2x256xf32>
    %425 = vector.broadcast %418 : f32 to vector<2x256xf32>
    %426 = arith.mulf %425, %424 : vector<2x256xf32>
    %427 = arith.addf %422, %426 : vector<2x256xf32>
    %428 = vector.extract_strided_slice %67 {offsets = [0, 0, 0], sizes = [1, 1, 256], strides = [1, 1, 1]} : vector<7x1x256xf32> to vector<1x1x256xf32>
    %429 = vector.shape_cast %428 : vector<1x1x256xf32> to vector<1x256xf32>
    %430 = vector.broadcast %429 : vector<1x256xf32> to vector<2x256xf32>
    %431 = arith.mulf %427, %430 : vector<2x256xf32>
    %432 = arith.addf %415, %431 : vector<2x256xf32>
    %c0_91 = arith.constant 0 : index
    %c0_92 = arith.constant 0 : index
    %c126 = arith.constant 126 : index
    %433 = vector.load %arg10[%c0_91, %c0_92, %c126] : memref<2x2x512xf32, #tpu.memory_space<vmem>>, vector<2x2x256xf32>
    %c22 = arith.constant 22 : index
    %434 = memref.load %arg6[%c22] : memref<98xf32, #tpu.memory_space<smem>>
    %c71 = arith.constant 71 : index
    %435 = memref.load %arg6[%c71] : memref<98xf32, #tpu.memory_space<smem>>
    %436 = vector.extract_strided_slice %433 {offsets = [0, 0, 0], sizes = [1, 2, 256], strides = [1, 1, 1]} : vector<2x2x256xf32> to vector<1x2x256xf32>
    %437 = vector.shape_cast %436 : vector<1x2x256xf32> to vector<2x256xf32>
    %438 = vector.broadcast %434 : f32 to vector<2x256xf32>
    %439 = arith.mulf %438, %437 : vector<2x256xf32>
    %440 = vector.extract_strided_slice %433 {offsets = [1, 0, 0], sizes = [1, 2, 256], strides = [1, 1, 1]} : vector<2x2x256xf32> to vector<1x2x256xf32>
    %441 = vector.shape_cast %440 : vector<1x2x256xf32> to vector<2x256xf32>
    %442 = vector.broadcast %435 : f32 to vector<2x256xf32>
    %443 = arith.mulf %442, %441 : vector<2x256xf32>
    %444 = arith.addf %439, %443 : vector<2x256xf32>
    %445 = vector.extract_strided_slice %67 {offsets = [1, 0, 0], sizes = [1, 1, 256], strides = [1, 1, 1]} : vector<7x1x256xf32> to vector<1x1x256xf32>
    %446 = vector.shape_cast %445 : vector<1x1x256xf32> to vector<1x256xf32>
    %447 = vector.broadcast %446 : vector<1x256xf32> to vector<2x256xf32>
    %448 = arith.mulf %444, %447 : vector<2x256xf32>
    %449 = arith.addf %432, %448 : vector<2x256xf32>
    %c0_93 = arith.constant 0 : index
    %c0_94 = arith.constant 0 : index
    %c127 = arith.constant 127 : index
    %450 = vector.load %arg10[%c0_93, %c0_94, %c127] : memref<2x2x512xf32, #tpu.memory_space<vmem>>, vector<2x2x256xf32>
    %c23 = arith.constant 23 : index
    %451 = memref.load %arg6[%c23] : memref<98xf32, #tpu.memory_space<smem>>
    %c72 = arith.constant 72 : index
    %452 = memref.load %arg6[%c72] : memref<98xf32, #tpu.memory_space<smem>>
    %453 = vector.extract_strided_slice %450 {offsets = [0, 0, 0], sizes = [1, 2, 256], strides = [1, 1, 1]} : vector<2x2x256xf32> to vector<1x2x256xf32>
    %454 = vector.shape_cast %453 : vector<1x2x256xf32> to vector<2x256xf32>
    %455 = vector.broadcast %451 : f32 to vector<2x256xf32>
    %456 = arith.mulf %455, %454 : vector<2x256xf32>
    %457 = vector.extract_strided_slice %450 {offsets = [1, 0, 0], sizes = [1, 2, 256], strides = [1, 1, 1]} : vector<2x2x256xf32> to vector<1x2x256xf32>
    %458 = vector.shape_cast %457 : vector<1x2x256xf32> to vector<2x256xf32>
    %459 = vector.broadcast %452 : f32 to vector<2x256xf32>
    %460 = arith.mulf %459, %458 : vector<2x256xf32>
    %461 = arith.addf %456, %460 : vector<2x256xf32>
    %462 = vector.extract_strided_slice %67 {offsets = [2, 0, 0], sizes = [1, 1, 256], strides = [1, 1, 1]} : vector<7x1x256xf32> to vector<1x1x256xf32>
    %463 = vector.shape_cast %462 : vector<1x1x256xf32> to vector<1x256xf32>
    %464 = vector.broadcast %463 : vector<1x256xf32> to vector<2x256xf32>
    %465 = arith.mulf %461, %464 : vector<2x256xf32>
    %466 = arith.addf %449, %465 : vector<2x256xf32>
    %c0_95 = arith.constant 0 : index
    %c0_96 = arith.constant 0 : index
    %c128_97 = arith.constant 128 : index
    %467 = vector.load %arg10[%c0_95, %c0_96, %c128_97] : memref<2x2x512xf32, #tpu.memory_space<vmem>>, vector<2x2x256xf32>
    %c24 = arith.constant 24 : index
    %468 = memref.load %arg6[%c24] : memref<98xf32, #tpu.memory_space<smem>>
    %c73 = arith.constant 73 : index
    %469 = memref.load %arg6[%c73] : memref<98xf32, #tpu.memory_space<smem>>
    %470 = vector.extract_strided_slice %467 {offsets = [0, 0, 0], sizes = [1, 2, 256], strides = [1, 1, 1]} : vector<2x2x256xf32> to vector<1x2x256xf32>
    %471 = vector.shape_cast %470 : vector<1x2x256xf32> to vector<2x256xf32>
    %472 = vector.broadcast %468 : f32 to vector<2x256xf32>
    %473 = arith.mulf %472, %471 : vector<2x256xf32>
    %474 = vector.extract_strided_slice %467 {offsets = [1, 0, 0], sizes = [1, 2, 256], strides = [1, 1, 1]} : vector<2x2x256xf32> to vector<1x2x256xf32>
    %475 = vector.shape_cast %474 : vector<1x2x256xf32> to vector<2x256xf32>
    %476 = vector.broadcast %469 : f32 to vector<2x256xf32>
    %477 = arith.mulf %476, %475 : vector<2x256xf32>
    %478 = arith.addf %473, %477 : vector<2x256xf32>
    %479 = arith.addf %466, %478 : vector<2x256xf32>
    %c0_98 = arith.constant 0 : index
    %c0_99 = arith.constant 0 : index
    %c129 = arith.constant 129 : index
    %480 = vector.load %arg10[%c0_98, %c0_99, %c129] : memref<2x2x512xf32, #tpu.memory_space<vmem>>, vector<2x2x256xf32>
    %c25 = arith.constant 25 : index
    %481 = memref.load %arg6[%c25] : memref<98xf32, #tpu.memory_space<smem>>
    %c74 = arith.constant 74 : index
    %482 = memref.load %arg6[%c74] : memref<98xf32, #tpu.memory_space<smem>>
    %483 = vector.extract_strided_slice %480 {offsets = [0, 0, 0], sizes = [1, 2, 256], strides = [1, 1, 1]} : vector<2x2x256xf32> to vector<1x2x256xf32>
    %484 = vector.shape_cast %483 : vector<1x2x256xf32> to vector<2x256xf32>
    %485 = vector.broadcast %481 : f32 to vector<2x256xf32>
    %486 = arith.mulf %485, %484 : vector<2x256xf32>
    %487 = vector.extract_strided_slice %480 {offsets = [1, 0, 0], sizes = [1, 2, 256], strides = [1, 1, 1]} : vector<2x2x256xf32> to vector<1x2x256xf32>
    %488 = vector.shape_cast %487 : vector<1x2x256xf32> to vector<2x256xf32>
    %489 = vector.broadcast %482 : f32 to vector<2x256xf32>
    %490 = arith.mulf %489, %488 : vector<2x256xf32>
    %491 = arith.addf %486, %490 : vector<2x256xf32>
    %492 = vector.extract_strided_slice %67 {offsets = [4, 0, 0], sizes = [1, 1, 256], strides = [1, 1, 1]} : vector<7x1x256xf32> to vector<1x1x256xf32>
    %493 = vector.shape_cast %492 : vector<1x1x256xf32> to vector<1x256xf32>
    %494 = vector.broadcast %493 : vector<1x256xf32> to vector<2x256xf32>
    %495 = arith.mulf %491, %494 : vector<2x256xf32>
    %496 = arith.addf %479, %495 : vector<2x256xf32>
    %c0_100 = arith.constant 0 : index
    %c0_101 = arith.constant 0 : index
    %c130 = arith.constant 130 : index
    %497 = vector.load %arg10[%c0_100, %c0_101, %c130] : memref<2x2x512xf32, #tpu.memory_space<vmem>>, vector<2x2x256xf32>
    %c26 = arith.constant 26 : index
    %498 = memref.load %arg6[%c26] : memref<98xf32, #tpu.memory_space<smem>>
    %c75 = arith.constant 75 : index
    %499 = memref.load %arg6[%c75] : memref<98xf32, #tpu.memory_space<smem>>
    %500 = vector.extract_strided_slice %497 {offsets = [0, 0, 0], sizes = [1, 2, 256], strides = [1, 1, 1]} : vector<2x2x256xf32> to vector<1x2x256xf32>
    %501 = vector.shape_cast %500 : vector<1x2x256xf32> to vector<2x256xf32>
    %502 = vector.broadcast %498 : f32 to vector<2x256xf32>
    %503 = arith.mulf %502, %501 : vector<2x256xf32>
    %504 = vector.extract_strided_slice %497 {offsets = [1, 0, 0], sizes = [1, 2, 256], strides = [1, 1, 1]} : vector<2x2x256xf32> to vector<1x2x256xf32>
    %505 = vector.shape_cast %504 : vector<1x2x256xf32> to vector<2x256xf32>
    %506 = vector.broadcast %499 : f32 to vector<2x256xf32>
    %507 = arith.mulf %506, %505 : vector<2x256xf32>
    %508 = arith.addf %503, %507 : vector<2x256xf32>
    %509 = vector.extract_strided_slice %67 {offsets = [5, 0, 0], sizes = [1, 1, 256], strides = [1, 1, 1]} : vector<7x1x256xf32> to vector<1x1x256xf32>
    %510 = vector.shape_cast %509 : vector<1x1x256xf32> to vector<1x256xf32>
    %511 = vector.broadcast %510 : vector<1x256xf32> to vector<2x256xf32>
    %512 = arith.mulf %508, %511 : vector<2x256xf32>
    %513 = arith.addf %496, %512 : vector<2x256xf32>
    %c0_102 = arith.constant 0 : index
    %c0_103 = arith.constant 0 : index
    %c131 = arith.constant 131 : index
    %514 = vector.load %arg10[%c0_102, %c0_103, %c131] : memref<2x2x512xf32, #tpu.memory_space<vmem>>, vector<2x2x256xf32>
    %c27 = arith.constant 27 : index
    %515 = memref.load %arg6[%c27] : memref<98xf32, #tpu.memory_space<smem>>
    %c76 = arith.constant 76 : index
    %516 = memref.load %arg6[%c76] : memref<98xf32, #tpu.memory_space<smem>>
    %517 = vector.extract_strided_slice %514 {offsets = [0, 0, 0], sizes = [1, 2, 256], strides = [1, 1, 1]} : vector<2x2x256xf32> to vector<1x2x256xf32>
    %518 = vector.shape_cast %517 : vector<1x2x256xf32> to vector<2x256xf32>
    %519 = vector.broadcast %515 : f32 to vector<2x256xf32>
    %520 = arith.mulf %519, %518 : vector<2x256xf32>
    %521 = vector.extract_strided_slice %514 {offsets = [1, 0, 0], sizes = [1, 2, 256], strides = [1, 1, 1]} : vector<2x2x256xf32> to vector<1x2x256xf32>
    %522 = vector.shape_cast %521 : vector<1x2x256xf32> to vector<2x256xf32>
    %523 = vector.broadcast %516 : f32 to vector<2x256xf32>
    %524 = arith.mulf %523, %522 : vector<2x256xf32>
    %525 = arith.addf %520, %524 : vector<2x256xf32>
    %526 = vector.extract_strided_slice %67 {offsets = [6, 0, 0], sizes = [1, 1, 256], strides = [1, 1, 1]} : vector<7x1x256xf32> to vector<1x1x256xf32>
    %527 = vector.shape_cast %526 : vector<1x1x256xf32> to vector<1x256xf32>
    %528 = vector.broadcast %527 : vector<1x256xf32> to vector<2x256xf32>
    %529 = arith.mulf %525, %528 : vector<2x256xf32>
    %530 = arith.addf %513, %529 : vector<2x256xf32>
    %c0_104 = arith.constant 0 : index
    %c0_105 = arith.constant 0 : index
    %c141 = arith.constant 141 : index
    %531 = vector.load %arg10[%c0_104, %c0_105, %c141] : memref<2x2x512xf32, #tpu.memory_space<vmem>>, vector<2x2x256xf32>
    %c28 = arith.constant 28 : index
    %532 = memref.load %arg6[%c28] : memref<98xf32, #tpu.memory_space<smem>>
    %c77_106 = arith.constant 77 : index
    %533 = memref.load %arg6[%c77_106] : memref<98xf32, #tpu.memory_space<smem>>
    %534 = vector.extract_strided_slice %531 {offsets = [0, 0, 0], sizes = [1, 2, 256], strides = [1, 1, 1]} : vector<2x2x256xf32> to vector<1x2x256xf32>
    %535 = vector.shape_cast %534 : vector<1x2x256xf32> to vector<2x256xf32>
    %536 = vector.broadcast %532 : f32 to vector<2x256xf32>
    %537 = arith.mulf %536, %535 : vector<2x256xf32>
    %538 = vector.extract_strided_slice %531 {offsets = [1, 0, 0], sizes = [1, 2, 256], strides = [1, 1, 1]} : vector<2x2x256xf32> to vector<1x2x256xf32>
    %539 = vector.shape_cast %538 : vector<1x2x256xf32> to vector<2x256xf32>
    %540 = vector.broadcast %533 : f32 to vector<2x256xf32>
    %541 = arith.mulf %540, %539 : vector<2x256xf32>
    %542 = arith.addf %537, %541 : vector<2x256xf32>
    %543 = vector.extract_strided_slice %67 {offsets = [0, 0, 0], sizes = [1, 1, 256], strides = [1, 1, 1]} : vector<7x1x256xf32> to vector<1x1x256xf32>
    %544 = vector.shape_cast %543 : vector<1x1x256xf32> to vector<1x256xf32>
    %545 = vector.broadcast %544 : vector<1x256xf32> to vector<2x256xf32>
    %546 = arith.mulf %542, %545 : vector<2x256xf32>
    %547 = arith.addf %530, %546 : vector<2x256xf32>
    %c0_107 = arith.constant 0 : index
    %c0_108 = arith.constant 0 : index
    %c142 = arith.constant 142 : index
    %548 = vector.load %arg10[%c0_107, %c0_108, %c142] : memref<2x2x512xf32, #tpu.memory_space<vmem>>, vector<2x2x256xf32>
    %c29 = arith.constant 29 : index
    %549 = memref.load %arg6[%c29] : memref<98xf32, #tpu.memory_space<smem>>
    %c78_109 = arith.constant 78 : index
    %550 = memref.load %arg6[%c78_109] : memref<98xf32, #tpu.memory_space<smem>>
    %551 = vector.extract_strided_slice %548 {offsets = [0, 0, 0], sizes = [1, 2, 256], strides = [1, 1, 1]} : vector<2x2x256xf32> to vector<1x2x256xf32>
    %552 = vector.shape_cast %551 : vector<1x2x256xf32> to vector<2x256xf32>
    %553 = vector.broadcast %549 : f32 to vector<2x256xf32>
    %554 = arith.mulf %553, %552 : vector<2x256xf32>
    %555 = vector.extract_strided_slice %548 {offsets = [1, 0, 0], sizes = [1, 2, 256], strides = [1, 1, 1]} : vector<2x2x256xf32> to vector<1x2x256xf32>
    %556 = vector.shape_cast %555 : vector<1x2x256xf32> to vector<2x256xf32>
    %557 = vector.broadcast %550 : f32 to vector<2x256xf32>
    %558 = arith.mulf %557, %556 : vector<2x256xf32>
    %559 = arith.addf %554, %558 : vector<2x256xf32>
    %560 = vector.extract_strided_slice %67 {offsets = [1, 0, 0], sizes = [1, 1, 256], strides = [1, 1, 1]} : vector<7x1x256xf32> to vector<1x1x256xf32>
    %561 = vector.shape_cast %560 : vector<1x1x256xf32> to vector<1x256xf32>
    %562 = vector.broadcast %561 : vector<1x256xf32> to vector<2x256xf32>
    %563 = arith.mulf %559, %562 : vector<2x256xf32>
    %564 = arith.addf %547, %563 : vector<2x256xf32>
    %c0_110 = arith.constant 0 : index
    %c0_111 = arith.constant 0 : index
    %c143 = arith.constant 143 : index
    %565 = vector.load %arg10[%c0_110, %c0_111, %c143] : memref<2x2x512xf32, #tpu.memory_space<vmem>>, vector<2x2x256xf32>
    %c30 = arith.constant 30 : index
    %566 = memref.load %arg6[%c30] : memref<98xf32, #tpu.memory_space<smem>>
    %c79_112 = arith.constant 79 : index
    %567 = memref.load %arg6[%c79_112] : memref<98xf32, #tpu.memory_space<smem>>
    %568 = vector.extract_strided_slice %565 {offsets = [0, 0, 0], sizes = [1, 2, 256], strides = [1, 1, 1]} : vector<2x2x256xf32> to vector<1x2x256xf32>
    %569 = vector.shape_cast %568 : vector<1x2x256xf32> to vector<2x256xf32>
    %570 = vector.broadcast %566 : f32 to vector<2x256xf32>
    %571 = arith.mulf %570, %569 : vector<2x256xf32>
    %572 = vector.extract_strided_slice %565 {offsets = [1, 0, 0], sizes = [1, 2, 256], strides = [1, 1, 1]} : vector<2x2x256xf32> to vector<1x2x256xf32>
    %573 = vector.shape_cast %572 : vector<1x2x256xf32> to vector<2x256xf32>
    %574 = vector.broadcast %567 : f32 to vector<2x256xf32>
    %575 = arith.mulf %574, %573 : vector<2x256xf32>
    %576 = arith.addf %571, %575 : vector<2x256xf32>
    %577 = vector.extract_strided_slice %67 {offsets = [2, 0, 0], sizes = [1, 1, 256], strides = [1, 1, 1]} : vector<7x1x256xf32> to vector<1x1x256xf32>
    %578 = vector.shape_cast %577 : vector<1x1x256xf32> to vector<1x256xf32>
    %579 = vector.broadcast %578 : vector<1x256xf32> to vector<2x256xf32>
    %580 = arith.mulf %576, %579 : vector<2x256xf32>
    %581 = arith.addf %564, %580 : vector<2x256xf32>
    %c0_113 = arith.constant 0 : index
    %c0_114 = arith.constant 0 : index
    %c144 = arith.constant 144 : index
    %582 = vector.load %arg10[%c0_113, %c0_114, %c144] : memref<2x2x512xf32, #tpu.memory_space<vmem>>, vector<2x2x256xf32>
    %c31 = arith.constant 31 : index
    %583 = memref.load %arg6[%c31] : memref<98xf32, #tpu.memory_space<smem>>
    %c80_115 = arith.constant 80 : index
    %584 = memref.load %arg6[%c80_115] : memref<98xf32, #tpu.memory_space<smem>>
    %585 = vector.extract_strided_slice %582 {offsets = [0, 0, 0], sizes = [1, 2, 256], strides = [1, 1, 1]} : vector<2x2x256xf32> to vector<1x2x256xf32>
    %586 = vector.shape_cast %585 : vector<1x2x256xf32> to vector<2x256xf32>
    %587 = vector.broadcast %583 : f32 to vector<2x256xf32>
    %588 = arith.mulf %587, %586 : vector<2x256xf32>
    %589 = vector.extract_strided_slice %582 {offsets = [1, 0, 0], sizes = [1, 2, 256], strides = [1, 1, 1]} : vector<2x2x256xf32> to vector<1x2x256xf32>
    %590 = vector.shape_cast %589 : vector<1x2x256xf32> to vector<2x256xf32>
    %591 = vector.broadcast %584 : f32 to vector<2x256xf32>
    %592 = arith.mulf %591, %590 : vector<2x256xf32>
    %593 = arith.addf %588, %592 : vector<2x256xf32>
    %594 = arith.addf %581, %593 : vector<2x256xf32>
    %c0_116 = arith.constant 0 : index
    %c0_117 = arith.constant 0 : index
    %c145 = arith.constant 145 : index
    %595 = vector.load %arg10[%c0_116, %c0_117, %c145] : memref<2x2x512xf32, #tpu.memory_space<vmem>>, vector<2x2x256xf32>
    %c32 = arith.constant 32 : index
    %596 = memref.load %arg6[%c32] : memref<98xf32, #tpu.memory_space<smem>>
    %c81_118 = arith.constant 81 : index
    %597 = memref.load %arg6[%c81_118] : memref<98xf32, #tpu.memory_space<smem>>
    %598 = vector.extract_strided_slice %595 {offsets = [0, 0, 0], sizes = [1, 2, 256], strides = [1, 1, 1]} : vector<2x2x256xf32> to vector<1x2x256xf32>
    %599 = vector.shape_cast %598 : vector<1x2x256xf32> to vector<2x256xf32>
    %600 = vector.broadcast %596 : f32 to vector<2x256xf32>
    %601 = arith.mulf %600, %599 : vector<2x256xf32>
    %602 = vector.extract_strided_slice %595 {offsets = [1, 0, 0], sizes = [1, 2, 256], strides = [1, 1, 1]} : vector<2x2x256xf32> to vector<1x2x256xf32>
    %603 = vector.shape_cast %602 : vector<1x2x256xf32> to vector<2x256xf32>
    %604 = vector.broadcast %597 : f32 to vector<2x256xf32>
    %605 = arith.mulf %604, %603 : vector<2x256xf32>
    %606 = arith.addf %601, %605 : vector<2x256xf32>
    %607 = vector.extract_strided_slice %67 {offsets = [4, 0, 0], sizes = [1, 1, 256], strides = [1, 1, 1]} : vector<7x1x256xf32> to vector<1x1x256xf32>
    %608 = vector.shape_cast %607 : vector<1x1x256xf32> to vector<1x256xf32>
    %609 = vector.broadcast %608 : vector<1x256xf32> to vector<2x256xf32>
    %610 = arith.mulf %606, %609 : vector<2x256xf32>
    %611 = arith.addf %594, %610 : vector<2x256xf32>
    %c0_119 = arith.constant 0 : index
    %c0_120 = arith.constant 0 : index
    %c146 = arith.constant 146 : index
    %612 = vector.load %arg10[%c0_119, %c0_120, %c146] : memref<2x2x512xf32, #tpu.memory_space<vmem>>, vector<2x2x256xf32>
    %c33 = arith.constant 33 : index
    %613 = memref.load %arg6[%c33] : memref<98xf32, #tpu.memory_space<smem>>
    %c82_121 = arith.constant 82 : index
    %614 = memref.load %arg6[%c82_121] : memref<98xf32, #tpu.memory_space<smem>>
    %615 = vector.extract_strided_slice %612 {offsets = [0, 0, 0], sizes = [1, 2, 256], strides = [1, 1, 1]} : vector<2x2x256xf32> to vector<1x2x256xf32>
    %616 = vector.shape_cast %615 : vector<1x2x256xf32> to vector<2x256xf32>
    %617 = vector.broadcast %613 : f32 to vector<2x256xf32>
    %618 = arith.mulf %617, %616 : vector<2x256xf32>
    %619 = vector.extract_strided_slice %612 {offsets = [1, 0, 0], sizes = [1, 2, 256], strides = [1, 1, 1]} : vector<2x2x256xf32> to vector<1x2x256xf32>
    %620 = vector.shape_cast %619 : vector<1x2x256xf32> to vector<2x256xf32>
    %621 = vector.broadcast %614 : f32 to vector<2x256xf32>
    %622 = arith.mulf %621, %620 : vector<2x256xf32>
    %623 = arith.addf %618, %622 : vector<2x256xf32>
    %624 = vector.extract_strided_slice %67 {offsets = [5, 0, 0], sizes = [1, 1, 256], strides = [1, 1, 1]} : vector<7x1x256xf32> to vector<1x1x256xf32>
    %625 = vector.shape_cast %624 : vector<1x1x256xf32> to vector<1x256xf32>
    %626 = vector.broadcast %625 : vector<1x256xf32> to vector<2x256xf32>
    %627 = arith.mulf %623, %626 : vector<2x256xf32>
    %628 = arith.addf %611, %627 : vector<2x256xf32>
    %c0_122 = arith.constant 0 : index
    %c0_123 = arith.constant 0 : index
    %c147 = arith.constant 147 : index
    %629 = vector.load %arg10[%c0_122, %c0_123, %c147] : memref<2x2x512xf32, #tpu.memory_space<vmem>>, vector<2x2x256xf32>
    %c34 = arith.constant 34 : index
    %630 = memref.load %arg6[%c34] : memref<98xf32, #tpu.memory_space<smem>>
    %c83_124 = arith.constant 83 : index
    %631 = memref.load %arg6[%c83_124] : memref<98xf32, #tpu.memory_space<smem>>
    %632 = vector.extract_strided_slice %629 {offsets = [0, 0, 0], sizes = [1, 2, 256], strides = [1, 1, 1]} : vector<2x2x256xf32> to vector<1x2x256xf32>
    %633 = vector.shape_cast %632 : vector<1x2x256xf32> to vector<2x256xf32>
    %634 = vector.broadcast %630 : f32 to vector<2x256xf32>
    %635 = arith.mulf %634, %633 : vector<2x256xf32>
    %636 = vector.extract_strided_slice %629 {offsets = [1, 0, 0], sizes = [1, 2, 256], strides = [1, 1, 1]} : vector<2x2x256xf32> to vector<1x2x256xf32>
    %637 = vector.shape_cast %636 : vector<1x2x256xf32> to vector<2x256xf32>
    %638 = vector.broadcast %631 : f32 to vector<2x256xf32>
    %639 = arith.mulf %638, %637 : vector<2x256xf32>
    %640 = arith.addf %635, %639 : vector<2x256xf32>
    %641 = vector.extract_strided_slice %67 {offsets = [6, 0, 0], sizes = [1, 1, 256], strides = [1, 1, 1]} : vector<7x1x256xf32> to vector<1x1x256xf32>
    %642 = vector.shape_cast %641 : vector<1x1x256xf32> to vector<1x256xf32>
    %643 = vector.broadcast %642 : vector<1x256xf32> to vector<2x256xf32>
    %644 = arith.mulf %640, %643 : vector<2x256xf32>
    %645 = arith.addf %628, %644 : vector<2x256xf32>
    %c0_125 = arith.constant 0 : index
    %c0_126 = arith.constant 0 : index
    %c157 = arith.constant 157 : index
    %646 = vector.load %arg10[%c0_125, %c0_126, %c157] : memref<2x2x512xf32, #tpu.memory_space<vmem>>, vector<2x2x256xf32>
    %c35 = arith.constant 35 : index
    %647 = memref.load %arg6[%c35] : memref<98xf32, #tpu.memory_space<smem>>
    %c84 = arith.constant 84 : index
    %648 = memref.load %arg6[%c84] : memref<98xf32, #tpu.memory_space<smem>>
    %649 = vector.extract_strided_slice %646 {offsets = [0, 0, 0], sizes = [1, 2, 256], strides = [1, 1, 1]} : vector<2x2x256xf32> to vector<1x2x256xf32>
    %650 = vector.shape_cast %649 : vector<1x2x256xf32> to vector<2x256xf32>
    %651 = vector.broadcast %647 : f32 to vector<2x256xf32>
    %652 = arith.mulf %651, %650 : vector<2x256xf32>
    %653 = vector.extract_strided_slice %646 {offsets = [1, 0, 0], sizes = [1, 2, 256], strides = [1, 1, 1]} : vector<2x2x256xf32> to vector<1x2x256xf32>
    %654 = vector.shape_cast %653 : vector<1x2x256xf32> to vector<2x256xf32>
    %655 = vector.broadcast %648 : f32 to vector<2x256xf32>
    %656 = arith.mulf %655, %654 : vector<2x256xf32>
    %657 = arith.addf %652, %656 : vector<2x256xf32>
    %658 = vector.extract_strided_slice %67 {offsets = [0, 0, 0], sizes = [1, 1, 256], strides = [1, 1, 1]} : vector<7x1x256xf32> to vector<1x1x256xf32>
    %659 = vector.shape_cast %658 : vector<1x1x256xf32> to vector<1x256xf32>
    %660 = vector.broadcast %659 : vector<1x256xf32> to vector<2x256xf32>
    %661 = arith.mulf %657, %660 : vector<2x256xf32>
    %662 = arith.addf %645, %661 : vector<2x256xf32>
    %c0_127 = arith.constant 0 : index
    %c0_128 = arith.constant 0 : index
    %c158 = arith.constant 158 : index
    %663 = vector.load %arg10[%c0_127, %c0_128, %c158] : memref<2x2x512xf32, #tpu.memory_space<vmem>>, vector<2x2x256xf32>
    %c36 = arith.constant 36 : index
    %664 = memref.load %arg6[%c36] : memref<98xf32, #tpu.memory_space<smem>>
    %c85 = arith.constant 85 : index
    %665 = memref.load %arg6[%c85] : memref<98xf32, #tpu.memory_space<smem>>
    %666 = vector.extract_strided_slice %663 {offsets = [0, 0, 0], sizes = [1, 2, 256], strides = [1, 1, 1]} : vector<2x2x256xf32> to vector<1x2x256xf32>
    %667 = vector.shape_cast %666 : vector<1x2x256xf32> to vector<2x256xf32>
    %668 = vector.broadcast %664 : f32 to vector<2x256xf32>
    %669 = arith.mulf %668, %667 : vector<2x256xf32>
    %670 = vector.extract_strided_slice %663 {offsets = [1, 0, 0], sizes = [1, 2, 256], strides = [1, 1, 1]} : vector<2x2x256xf32> to vector<1x2x256xf32>
    %671 = vector.shape_cast %670 : vector<1x2x256xf32> to vector<2x256xf32>
    %672 = vector.broadcast %665 : f32 to vector<2x256xf32>
    %673 = arith.mulf %672, %671 : vector<2x256xf32>
    %674 = arith.addf %669, %673 : vector<2x256xf32>
    %675 = vector.extract_strided_slice %67 {offsets = [1, 0, 0], sizes = [1, 1, 256], strides = [1, 1, 1]} : vector<7x1x256xf32> to vector<1x1x256xf32>
    %676 = vector.shape_cast %675 : vector<1x1x256xf32> to vector<1x256xf32>
    %677 = vector.broadcast %676 : vector<1x256xf32> to vector<2x256xf32>
    %678 = arith.mulf %674, %677 : vector<2x256xf32>
    %679 = arith.addf %662, %678 : vector<2x256xf32>
    %c0_129 = arith.constant 0 : index
    %c0_130 = arith.constant 0 : index
    %c159 = arith.constant 159 : index
    %680 = vector.load %arg10[%c0_129, %c0_130, %c159] : memref<2x2x512xf32, #tpu.memory_space<vmem>>, vector<2x2x256xf32>
    %c37 = arith.constant 37 : index
    %681 = memref.load %arg6[%c37] : memref<98xf32, #tpu.memory_space<smem>>
    %c86 = arith.constant 86 : index
    %682 = memref.load %arg6[%c86] : memref<98xf32, #tpu.memory_space<smem>>
    %683 = vector.extract_strided_slice %680 {offsets = [0, 0, 0], sizes = [1, 2, 256], strides = [1, 1, 1]} : vector<2x2x256xf32> to vector<1x2x256xf32>
    %684 = vector.shape_cast %683 : vector<1x2x256xf32> to vector<2x256xf32>
    %685 = vector.broadcast %681 : f32 to vector<2x256xf32>
    %686 = arith.mulf %685, %684 : vector<2x256xf32>
    %687 = vector.extract_strided_slice %680 {offsets = [1, 0, 0], sizes = [1, 2, 256], strides = [1, 1, 1]} : vector<2x2x256xf32> to vector<1x2x256xf32>
    %688 = vector.shape_cast %687 : vector<1x2x256xf32> to vector<2x256xf32>
    %689 = vector.broadcast %682 : f32 to vector<2x256xf32>
    %690 = arith.mulf %689, %688 : vector<2x256xf32>
    %691 = arith.addf %686, %690 : vector<2x256xf32>
    %692 = vector.extract_strided_slice %67 {offsets = [2, 0, 0], sizes = [1, 1, 256], strides = [1, 1, 1]} : vector<7x1x256xf32> to vector<1x1x256xf32>
    %693 = vector.shape_cast %692 : vector<1x1x256xf32> to vector<1x256xf32>
    %694 = vector.broadcast %693 : vector<1x256xf32> to vector<2x256xf32>
    %695 = arith.mulf %691, %694 : vector<2x256xf32>
    %696 = arith.addf %679, %695 : vector<2x256xf32>
    %c0_131 = arith.constant 0 : index
    %c0_132 = arith.constant 0 : index
    %c160 = arith.constant 160 : index
    %697 = vector.load %arg10[%c0_131, %c0_132, %c160] : memref<2x2x512xf32, #tpu.memory_space<vmem>>, vector<2x2x256xf32>
    %c38 = arith.constant 38 : index
    %698 = memref.load %arg6[%c38] : memref<98xf32, #tpu.memory_space<smem>>
    %c87 = arith.constant 87 : index
    %699 = memref.load %arg6[%c87] : memref<98xf32, #tpu.memory_space<smem>>
    %700 = vector.extract_strided_slice %697 {offsets = [0, 0, 0], sizes = [1, 2, 256], strides = [1, 1, 1]} : vector<2x2x256xf32> to vector<1x2x256xf32>
    %701 = vector.shape_cast %700 : vector<1x2x256xf32> to vector<2x256xf32>
    %702 = vector.broadcast %698 : f32 to vector<2x256xf32>
    %703 = arith.mulf %702, %701 : vector<2x256xf32>
    %704 = vector.extract_strided_slice %697 {offsets = [1, 0, 0], sizes = [1, 2, 256], strides = [1, 1, 1]} : vector<2x2x256xf32> to vector<1x2x256xf32>
    %705 = vector.shape_cast %704 : vector<1x2x256xf32> to vector<2x256xf32>
    %706 = vector.broadcast %699 : f32 to vector<2x256xf32>
    %707 = arith.mulf %706, %705 : vector<2x256xf32>
    %708 = arith.addf %703, %707 : vector<2x256xf32>
    %709 = arith.addf %696, %708 : vector<2x256xf32>
    %c0_133 = arith.constant 0 : index
    %c0_134 = arith.constant 0 : index
    %c161 = arith.constant 161 : index
    %710 = vector.load %arg10[%c0_133, %c0_134, %c161] : memref<2x2x512xf32, #tpu.memory_space<vmem>>, vector<2x2x256xf32>
    %c39 = arith.constant 39 : index
    %711 = memref.load %arg6[%c39] : memref<98xf32, #tpu.memory_space<smem>>
    %c88 = arith.constant 88 : index
    %712 = memref.load %arg6[%c88] : memref<98xf32, #tpu.memory_space<smem>>
    %713 = vector.extract_strided_slice %710 {offsets = [0, 0, 0], sizes = [1, 2, 256], strides = [1, 1, 1]} : vector<2x2x256xf32> to vector<1x2x256xf32>
    %714 = vector.shape_cast %713 : vector<1x2x256xf32> to vector<2x256xf32>
    %715 = vector.broadcast %711 : f32 to vector<2x256xf32>
    %716 = arith.mulf %715, %714 : vector<2x256xf32>
    %717 = vector.extract_strided_slice %710 {offsets = [1, 0, 0], sizes = [1, 2, 256], strides = [1, 1, 1]} : vector<2x2x256xf32> to vector<1x2x256xf32>
    %718 = vector.shape_cast %717 : vector<1x2x256xf32> to vector<2x256xf32>
    %719 = vector.broadcast %712 : f32 to vector<2x256xf32>
    %720 = arith.mulf %719, %718 : vector<2x256xf32>
    %721 = arith.addf %716, %720 : vector<2x256xf32>
    %722 = vector.extract_strided_slice %67 {offsets = [4, 0, 0], sizes = [1, 1, 256], strides = [1, 1, 1]} : vector<7x1x256xf32> to vector<1x1x256xf32>
    %723 = vector.shape_cast %722 : vector<1x1x256xf32> to vector<1x256xf32>
    %724 = vector.broadcast %723 : vector<1x256xf32> to vector<2x256xf32>
    %725 = arith.mulf %721, %724 : vector<2x256xf32>
    %726 = arith.addf %709, %725 : vector<2x256xf32>
    %c0_135 = arith.constant 0 : index
    %c0_136 = arith.constant 0 : index
    %c162 = arith.constant 162 : index
    %727 = vector.load %arg10[%c0_135, %c0_136, %c162] : memref<2x2x512xf32, #tpu.memory_space<vmem>>, vector<2x2x256xf32>
    %c40 = arith.constant 40 : index
    %728 = memref.load %arg6[%c40] : memref<98xf32, #tpu.memory_space<smem>>
    %c89 = arith.constant 89 : index
    %729 = memref.load %arg6[%c89] : memref<98xf32, #tpu.memory_space<smem>>
    %730 = vector.extract_strided_slice %727 {offsets = [0, 0, 0], sizes = [1, 2, 256], strides = [1, 1, 1]} : vector<2x2x256xf32> to vector<1x2x256xf32>
    %731 = vector.shape_cast %730 : vector<1x2x256xf32> to vector<2x256xf32>
    %732 = vector.broadcast %728 : f32 to vector<2x256xf32>
    %733 = arith.mulf %732, %731 : vector<2x256xf32>
    %734 = vector.extract_strided_slice %727 {offsets = [1, 0, 0], sizes = [1, 2, 256], strides = [1, 1, 1]} : vector<2x2x256xf32> to vector<1x2x256xf32>
    %735 = vector.shape_cast %734 : vector<1x2x256xf32> to vector<2x256xf32>
    %736 = vector.broadcast %729 : f32 to vector<2x256xf32>
    %737 = arith.mulf %736, %735 : vector<2x256xf32>
    %738 = arith.addf %733, %737 : vector<2x256xf32>
    %739 = vector.extract_strided_slice %67 {offsets = [5, 0, 0], sizes = [1, 1, 256], strides = [1, 1, 1]} : vector<7x1x256xf32> to vector<1x1x256xf32>
    %740 = vector.shape_cast %739 : vector<1x1x256xf32> to vector<1x256xf32>
    %741 = vector.broadcast %740 : vector<1x256xf32> to vector<2x256xf32>
    %742 = arith.mulf %738, %741 : vector<2x256xf32>
    %743 = arith.addf %726, %742 : vector<2x256xf32>
    %c0_137 = arith.constant 0 : index
    %c0_138 = arith.constant 0 : index
    %c163 = arith.constant 163 : index
    %744 = vector.load %arg10[%c0_137, %c0_138, %c163] : memref<2x2x512xf32, #tpu.memory_space<vmem>>, vector<2x2x256xf32>
    %c41 = arith.constant 41 : index
    %745 = memref.load %arg6[%c41] : memref<98xf32, #tpu.memory_space<smem>>
    %c90 = arith.constant 90 : index
    %746 = memref.load %arg6[%c90] : memref<98xf32, #tpu.memory_space<smem>>
    %747 = vector.extract_strided_slice %744 {offsets = [0, 0, 0], sizes = [1, 2, 256], strides = [1, 1, 1]} : vector<2x2x256xf32> to vector<1x2x256xf32>
    %748 = vector.shape_cast %747 : vector<1x2x256xf32> to vector<2x256xf32>
    %749 = vector.broadcast %745 : f32 to vector<2x256xf32>
    %750 = arith.mulf %749, %748 : vector<2x256xf32>
    %751 = vector.extract_strided_slice %744 {offsets = [1, 0, 0], sizes = [1, 2, 256], strides = [1, 1, 1]} : vector<2x2x256xf32> to vector<1x2x256xf32>
    %752 = vector.shape_cast %751 : vector<1x2x256xf32> to vector<2x256xf32>
    %753 = vector.broadcast %746 : f32 to vector<2x256xf32>
    %754 = arith.mulf %753, %752 : vector<2x256xf32>
    %755 = arith.addf %750, %754 : vector<2x256xf32>
    %756 = vector.extract_strided_slice %67 {offsets = [6, 0, 0], sizes = [1, 1, 256], strides = [1, 1, 1]} : vector<7x1x256xf32> to vector<1x1x256xf32>
    %757 = vector.shape_cast %756 : vector<1x1x256xf32> to vector<1x256xf32>
    %758 = vector.broadcast %757 : vector<1x256xf32> to vector<2x256xf32>
    %759 = arith.mulf %755, %758 : vector<2x256xf32>
    %760 = arith.addf %743, %759 : vector<2x256xf32>
    %c0_139 = arith.constant 0 : index
    %c0_140 = arith.constant 0 : index
    %c173 = arith.constant 173 : index
    %761 = vector.load %arg10[%c0_139, %c0_140, %c173] : memref<2x2x512xf32, #tpu.memory_space<vmem>>, vector<2x2x256xf32>
    %c42 = arith.constant 42 : index
    %762 = memref.load %arg6[%c42] : memref<98xf32, #tpu.memory_space<smem>>
    %c91 = arith.constant 91 : index
    %763 = memref.load %arg6[%c91] : memref<98xf32, #tpu.memory_space<smem>>
    %764 = vector.extract_strided_slice %761 {offsets = [0, 0, 0], sizes = [1, 2, 256], strides = [1, 1, 1]} : vector<2x2x256xf32> to vector<1x2x256xf32>
    %765 = vector.shape_cast %764 : vector<1x2x256xf32> to vector<2x256xf32>
    %766 = vector.broadcast %762 : f32 to vector<2x256xf32>
    %767 = arith.mulf %766, %765 : vector<2x256xf32>
    %768 = vector.extract_strided_slice %761 {offsets = [1, 0, 0], sizes = [1, 2, 256], strides = [1, 1, 1]} : vector<2x2x256xf32> to vector<1x2x256xf32>
    %769 = vector.shape_cast %768 : vector<1x2x256xf32> to vector<2x256xf32>
    %770 = vector.broadcast %763 : f32 to vector<2x256xf32>
    %771 = arith.mulf %770, %769 : vector<2x256xf32>
    %772 = arith.addf %767, %771 : vector<2x256xf32>
    %773 = vector.extract_strided_slice %67 {offsets = [0, 0, 0], sizes = [1, 1, 256], strides = [1, 1, 1]} : vector<7x1x256xf32> to vector<1x1x256xf32>
    %774 = vector.shape_cast %773 : vector<1x1x256xf32> to vector<1x256xf32>
    %775 = vector.broadcast %774 : vector<1x256xf32> to vector<2x256xf32>
    %776 = arith.mulf %772, %775 : vector<2x256xf32>
    %777 = arith.addf %760, %776 : vector<2x256xf32>
    %c0_141 = arith.constant 0 : index
    %c0_142 = arith.constant 0 : index
    %c174 = arith.constant 174 : index
    %778 = vector.load %arg10[%c0_141, %c0_142, %c174] : memref<2x2x512xf32, #tpu.memory_space<vmem>>, vector<2x2x256xf32>
    %c43 = arith.constant 43 : index
    %779 = memref.load %arg6[%c43] : memref<98xf32, #tpu.memory_space<smem>>
    %c92 = arith.constant 92 : index
    %780 = memref.load %arg6[%c92] : memref<98xf32, #tpu.memory_space<smem>>
    %781 = vector.extract_strided_slice %778 {offsets = [0, 0, 0], sizes = [1, 2, 256], strides = [1, 1, 1]} : vector<2x2x256xf32> to vector<1x2x256xf32>
    %782 = vector.shape_cast %781 : vector<1x2x256xf32> to vector<2x256xf32>
    %783 = vector.broadcast %779 : f32 to vector<2x256xf32>
    %784 = arith.mulf %783, %782 : vector<2x256xf32>
    %785 = vector.extract_strided_slice %778 {offsets = [1, 0, 0], sizes = [1, 2, 256], strides = [1, 1, 1]} : vector<2x2x256xf32> to vector<1x2x256xf32>
    %786 = vector.shape_cast %785 : vector<1x2x256xf32> to vector<2x256xf32>
    %787 = vector.broadcast %780 : f32 to vector<2x256xf32>
    %788 = arith.mulf %787, %786 : vector<2x256xf32>
    %789 = arith.addf %784, %788 : vector<2x256xf32>
    %790 = vector.extract_strided_slice %67 {offsets = [1, 0, 0], sizes = [1, 1, 256], strides = [1, 1, 1]} : vector<7x1x256xf32> to vector<1x1x256xf32>
    %791 = vector.shape_cast %790 : vector<1x1x256xf32> to vector<1x256xf32>
    %792 = vector.broadcast %791 : vector<1x256xf32> to vector<2x256xf32>
    %793 = arith.mulf %789, %792 : vector<2x256xf32>
    %794 = arith.addf %777, %793 : vector<2x256xf32>
    %c0_143 = arith.constant 0 : index
    %c0_144 = arith.constant 0 : index
    %c175 = arith.constant 175 : index
    %795 = vector.load %arg10[%c0_143, %c0_144, %c175] : memref<2x2x512xf32, #tpu.memory_space<vmem>>, vector<2x2x256xf32>
    %c44 = arith.constant 44 : index
    %796 = memref.load %arg6[%c44] : memref<98xf32, #tpu.memory_space<smem>>
    %c93_145 = arith.constant 93 : index
    %797 = memref.load %arg6[%c93_145] : memref<98xf32, #tpu.memory_space<smem>>
    %798 = vector.extract_strided_slice %795 {offsets = [0, 0, 0], sizes = [1, 2, 256], strides = [1, 1, 1]} : vector<2x2x256xf32> to vector<1x2x256xf32>
    %799 = vector.shape_cast %798 : vector<1x2x256xf32> to vector<2x256xf32>
    %800 = vector.broadcast %796 : f32 to vector<2x256xf32>
    %801 = arith.mulf %800, %799 : vector<2x256xf32>
    %802 = vector.extract_strided_slice %795 {offsets = [1, 0, 0], sizes = [1, 2, 256], strides = [1, 1, 1]} : vector<2x2x256xf32> to vector<1x2x256xf32>
    %803 = vector.shape_cast %802 : vector<1x2x256xf32> to vector<2x256xf32>
    %804 = vector.broadcast %797 : f32 to vector<2x256xf32>
    %805 = arith.mulf %804, %803 : vector<2x256xf32>
    %806 = arith.addf %801, %805 : vector<2x256xf32>
    %807 = vector.extract_strided_slice %67 {offsets = [2, 0, 0], sizes = [1, 1, 256], strides = [1, 1, 1]} : vector<7x1x256xf32> to vector<1x1x256xf32>
    %808 = vector.shape_cast %807 : vector<1x1x256xf32> to vector<1x256xf32>
    %809 = vector.broadcast %808 : vector<1x256xf32> to vector<2x256xf32>
    %810 = arith.mulf %806, %809 : vector<2x256xf32>
    %811 = arith.addf %794, %810 : vector<2x256xf32>
    %c0_146 = arith.constant 0 : index
    %c0_147 = arith.constant 0 : index
    %c176 = arith.constant 176 : index
    %812 = vector.load %arg10[%c0_146, %c0_147, %c176] : memref<2x2x512xf32, #tpu.memory_space<vmem>>, vector<2x2x256xf32>
    %c45 = arith.constant 45 : index
    %813 = memref.load %arg6[%c45] : memref<98xf32, #tpu.memory_space<smem>>
    %c94_148 = arith.constant 94 : index
    %814 = memref.load %arg6[%c94_148] : memref<98xf32, #tpu.memory_space<smem>>
    %815 = vector.extract_strided_slice %812 {offsets = [0, 0, 0], sizes = [1, 2, 256], strides = [1, 1, 1]} : vector<2x2x256xf32> to vector<1x2x256xf32>
    %816 = vector.shape_cast %815 : vector<1x2x256xf32> to vector<2x256xf32>
    %817 = vector.broadcast %813 : f32 to vector<2x256xf32>
    %818 = arith.mulf %817, %816 : vector<2x256xf32>
    %819 = vector.extract_strided_slice %812 {offsets = [1, 0, 0], sizes = [1, 2, 256], strides = [1, 1, 1]} : vector<2x2x256xf32> to vector<1x2x256xf32>
    %820 = vector.shape_cast %819 : vector<1x2x256xf32> to vector<2x256xf32>
    %821 = vector.broadcast %814 : f32 to vector<2x256xf32>
    %822 = arith.mulf %821, %820 : vector<2x256xf32>
    %823 = arith.addf %818, %822 : vector<2x256xf32>
    %824 = arith.addf %811, %823 : vector<2x256xf32>
    %c0_149 = arith.constant 0 : index
    %c0_150 = arith.constant 0 : index
    %c177 = arith.constant 177 : index
    %825 = vector.load %arg10[%c0_149, %c0_150, %c177] : memref<2x2x512xf32, #tpu.memory_space<vmem>>, vector<2x2x256xf32>
    %c46 = arith.constant 46 : index
    %826 = memref.load %arg6[%c46] : memref<98xf32, #tpu.memory_space<smem>>
    %c95_151 = arith.constant 95 : index
    %827 = memref.load %arg6[%c95_151] : memref<98xf32, #tpu.memory_space<smem>>
    %828 = vector.extract_strided_slice %825 {offsets = [0, 0, 0], sizes = [1, 2, 256], strides = [1, 1, 1]} : vector<2x2x256xf32> to vector<1x2x256xf32>
    %829 = vector.shape_cast %828 : vector<1x2x256xf32> to vector<2x256xf32>
    %830 = vector.broadcast %826 : f32 to vector<2x256xf32>
    %831 = arith.mulf %830, %829 : vector<2x256xf32>
    %832 = vector.extract_strided_slice %825 {offsets = [1, 0, 0], sizes = [1, 2, 256], strides = [1, 1, 1]} : vector<2x2x256xf32> to vector<1x2x256xf32>
    %833 = vector.shape_cast %832 : vector<1x2x256xf32> to vector<2x256xf32>
    %834 = vector.broadcast %827 : f32 to vector<2x256xf32>
    %835 = arith.mulf %834, %833 : vector<2x256xf32>
    %836 = arith.addf %831, %835 : vector<2x256xf32>
    %837 = vector.extract_strided_slice %67 {offsets = [4, 0, 0], sizes = [1, 1, 256], strides = [1, 1, 1]} : vector<7x1x256xf32> to vector<1x1x256xf32>
    %838 = vector.shape_cast %837 : vector<1x1x256xf32> to vector<1x256xf32>
    %839 = vector.broadcast %838 : vector<1x256xf32> to vector<2x256xf32>
    %840 = arith.mulf %836, %839 : vector<2x256xf32>
    %841 = arith.addf %824, %840 : vector<2x256xf32>
    %c0_152 = arith.constant 0 : index
    %c0_153 = arith.constant 0 : index
    %c178 = arith.constant 178 : index
    %842 = vector.load %arg10[%c0_152, %c0_153, %c178] : memref<2x2x512xf32, #tpu.memory_space<vmem>>, vector<2x2x256xf32>
    %c47 = arith.constant 47 : index
    %843 = memref.load %arg6[%c47] : memref<98xf32, #tpu.memory_space<smem>>
    %c96_154 = arith.constant 96 : index
    %844 = memref.load %arg6[%c96_154] : memref<98xf32, #tpu.memory_space<smem>>
    %845 = vector.extract_strided_slice %842 {offsets = [0, 0, 0], sizes = [1, 2, 256], strides = [1, 1, 1]} : vector<2x2x256xf32> to vector<1x2x256xf32>
    %846 = vector.shape_cast %845 : vector<1x2x256xf32> to vector<2x256xf32>
    %847 = vector.broadcast %843 : f32 to vector<2x256xf32>
    %848 = arith.mulf %847, %846 : vector<2x256xf32>
    %849 = vector.extract_strided_slice %842 {offsets = [1, 0, 0], sizes = [1, 2, 256], strides = [1, 1, 1]} : vector<2x2x256xf32> to vector<1x2x256xf32>
    %850 = vector.shape_cast %849 : vector<1x2x256xf32> to vector<2x256xf32>
    %851 = vector.broadcast %844 : f32 to vector<2x256xf32>
    %852 = arith.mulf %851, %850 : vector<2x256xf32>
    %853 = arith.addf %848, %852 : vector<2x256xf32>
    %854 = vector.extract_strided_slice %67 {offsets = [5, 0, 0], sizes = [1, 1, 256], strides = [1, 1, 1]} : vector<7x1x256xf32> to vector<1x1x256xf32>
    %855 = vector.shape_cast %854 : vector<1x1x256xf32> to vector<1x256xf32>
    %856 = vector.broadcast %855 : vector<1x256xf32> to vector<2x256xf32>
    %857 = arith.mulf %853, %856 : vector<2x256xf32>
    %858 = arith.addf %841, %857 : vector<2x256xf32>
    %c0_155 = arith.constant 0 : index
    %c0_156 = arith.constant 0 : index
    %c179 = arith.constant 179 : index
    %859 = vector.load %arg10[%c0_155, %c0_156, %c179] : memref<2x2x512xf32, #tpu.memory_space<vmem>>, vector<2x2x256xf32>
    %c48 = arith.constant 48 : index
    %860 = memref.load %arg6[%c48] : memref<98xf32, #tpu.memory_space<smem>>
    %c97_157 = arith.constant 97 : index
    %861 = memref.load %arg6[%c97_157] : memref<98xf32, #tpu.memory_space<smem>>
    %862 = vector.extract_strided_slice %859 {offsets = [0, 0, 0], sizes = [1, 2, 256], strides = [1, 1, 1]} : vector<2x2x256xf32> to vector<1x2x256xf32>
    %863 = vector.shape_cast %862 : vector<1x2x256xf32> to vector<2x256xf32>
    %864 = vector.broadcast %860 : f32 to vector<2x256xf32>
    %865 = arith.mulf %864, %863 : vector<2x256xf32>
    %866 = vector.extract_strided_slice %859 {offsets = [1, 0, 0], sizes = [1, 2, 256], strides = [1, 1, 1]} : vector<2x2x256xf32> to vector<1x2x256xf32>
    %867 = vector.shape_cast %866 : vector<1x2x256xf32> to vector<2x256xf32>
    %868 = vector.broadcast %861 : f32 to vector<2x256xf32>
    %869 = arith.mulf %868, %867 : vector<2x256xf32>
    %870 = arith.addf %865, %869 : vector<2x256xf32>
    %871 = vector.extract_strided_slice %67 {offsets = [6, 0, 0], sizes = [1, 1, 256], strides = [1, 1, 1]} : vector<7x1x256xf32> to vector<1x1x256xf32>
    %872 = vector.shape_cast %871 : vector<1x1x256xf32> to vector<1x256xf32>
    %873 = vector.broadcast %872 : vector<1x256xf32> to vector<2x256xf32>
    %874 = arith.mulf %870, %873 : vector<2x256xf32>
    %875 = arith.addf %858, %874 : vector<2x256xf32>
    %876 = vector.broadcast %68 : f32 to vector<2x256xf32>
    %877 = arith.mulf %875, %876 : vector<2x256xf32>
    %878 = vector.broadcast %69 : f32 to vector<2x256xf32>
    %879 = arith.addf %877, %878 : vector<2x256xf32>
    %880 = arith.negf %879 : vector<2x256xf32>
    %881 = math.exp %880 : vector<2x256xf32>
    %cst_158 = arith.constant 1.000000e+00 : f32
    %882 = vector.broadcast %cst_158 : f32 to vector<2x256xf32>
    %883 = arith.addf %882, %881 : vector<2x256xf32>
    %884 = arith.divf %882, %883 : vector<2x256xf32>
    %c0_159 = arith.constant 0 : index
    %c0_160 = arith.constant 0 : index
    %c0_161 = arith.constant 0 : index
    %885 = vector.load %arg1[%c0_159, %c0_160, %c0_161] : memref<2x32x256xf32, #tpu.memory_space<vmem>>, vector<1x32x256xf32>
    %886 = vector.shape_cast %885 : vector<1x32x256xf32> to vector<32x256xf32>
    %887 = vector.extract_strided_slice %38 {offsets = [0, 0], sizes = [32, 1], strides = [1, 1]} : vector<32x2xf32> to vector<32x1xf32>
    %888 = vector.broadcast %887 : vector<32x1xf32> to vector<32x256xf32>
    %889 = arith.mulf %886, %888 : vector<32x256xf32>
    %890 = vector.extract_strided_slice %884 {offsets = [0, 0], sizes = [1, 256], strides = [1, 1]} : vector<2x256xf32> to vector<1x256xf32>
    %891 = vector.broadcast %890 : vector<1x256xf32> to vector<32x256xf32>
    %892 = arith.mulf %889, %891 : vector<32x256xf32>
    %c0_162 = arith.constant 0 : index
    %c0_163 = arith.constant 0 : index
    %c0_164 = arith.constant 0 : index
    %893 = vector.load %arg9[%c0_162, %c0_163, %c0_164] : memref<2x32x256xf32, #tpu.memory_space<vmem>>, vector<1x32x256xf32>
    %894 = vector.shape_cast %893 : vector<1x32x256xf32> to vector<32x256xf32>
    %895 = vector.shape_cast %892 : vector<32x256xf32> to vector<1x32x256xf32>
    tpu.vector_store %arg9[%c0_162, %c0_163, %c0_164], %895 {strides = array<i32>} : memref<2x32x256xf32, #tpu.memory_space<vmem>>, vector<1x32x256xf32>,
    %c1_165 = arith.constant 1 : index
    %c0_166 = arith.constant 0 : index
    %c0_167 = arith.constant 0 : index
    %896 = vector.load %arg1[%c1_165, %c0_166, %c0_167] : memref<2x32x256xf32, #tpu.memory_space<vmem>>, vector<1x32x256xf32>
    %897 = vector.shape_cast %896 : vector<1x32x256xf32> to vector<32x256xf32>
    %898 = vector.extract_strided_slice %38 {offsets = [0, 1], sizes = [32, 1], strides = [1, 1]} : vector<32x2xf32> to vector<32x1xf32>
    %899 = vector.broadcast %898 : vector<32x1xf32> to vector<32x256xf32>
    %900 = arith.mulf %897, %899 : vector<32x256xf32>
    %901 = vector.extract_strided_slice %884 {offsets = [1, 0], sizes = [1, 256], strides = [1, 1]} : vector<2x256xf32> to vector<1x256xf32>
    %902 = vector.broadcast %901 : vector<1x256xf32> to vector<32x256xf32>
    %903 = arith.mulf %900, %902 : vector<32x256xf32>
    %c1_168 = arith.constant 1 : index
    %c0_169 = arith.constant 0 : index
    %c0_170 = arith.constant 0 : index
    %904 = vector.load %arg9[%c1_168, %c0_169, %c0_170] : memref<2x32x256xf32, #tpu.memory_space<vmem>>, vector<1x32x256xf32>
    %905 = vector.shape_cast %904 : vector<1x32x256xf32> to vector<32x256xf32>
    %906 = vector.shape_cast %903 : vector<32x256xf32> to vector<1x32x256xf32>
    tpu.vector_store %arg9[%c1_168, %c0_169, %c0_170], %906 {strides = array<i32>} : memref<2x32x256xf32, #tpu.memory_space<vmem>>, vector<1x32x256xf32>,
    return
  }
  func.func @transform_0(%arg0: i32) -> (i32, i32, i32) {
    %c0_i32 = arith.constant 0 : i32
    %c0_i32_0 = arith.constant 0 : i32
    %c0_i32_1 = arith.constant 0 : i32
    return %arg0, %c0_i32, %c0_i32_0 : i32, i32, i32
  }
  func.func @transform_1(%arg0: i32) -> (i32, i32) {
    %c0_i32 = arith.constant 0 : i32
    %c0_i32_0 = arith.constant 0 : i32
    %c0_i32_1 = arith.constant 0 : i32
    return %c0_i32, %c0_i32_0 : i32, i32
  }
  func.func @transform_2(%arg0: i32) -> (i32, i32) {
    %c0_i32 = arith.constant 0 : i32
    %c0_i32_0 = arith.constant 0 : i32
    %c0_i32_1 = arith.constant 0 : i32
    return %c0_i32, %c0_i32_0 : i32, i32
  }
  func.func @transform_3(%arg0: i32) -> (i32, i32) {
    %c0_i32 = arith.constant 0 : i32
    %c0_i32_0 = arith.constant 0 : i32
    %c0_i32_1 = arith.constant 0 : i32
    return %c0_i32, %c0_i32_0 : i32, i32
  }
  func.func @transform_4(%arg0: i32) -> (i32, i32) {
    %c0_i32 = arith.constant 0 : i32
    %c0_i32_0 = arith.constant 0 : i32
    %c0_i32_1 = arith.constant 0 : i32
    return %c0_i32, %c0_i32_0 : i32, i32
  }
  func.func @transform_5(%arg0: i32) -> i32 {
    %c0_i32 = arith.constant 0 : i32
    %c0_i32_0 = arith.constant 0 : i32
    return %c0_i32 : i32
  }
  func.func @transform_6(%arg0: i32) -> i32 {
    %c0_i32 = arith.constant 0 : i32
    %c0_i32_0 = arith.constant 0 : i32
    return %c0_i32 : i32
  }
  func.func @transform_7(%arg0: i32) -> (i32, i32, i32) {
    %c0_i32 = arith.constant 0 : i32
    %c0_i32_0 = arith.constant 0 : i32
    %c0_i32_1 = arith.constant 0 : i32
    %c0_i32_2 = arith.constant 0 : i32
    return %c0_i32, %c0_i32_0, %c0_i32_1 : i32, i32, i32
  }
  func.func @transform_8(%arg0: i32) -> (i32, i32, i32) {
    %c0_i32 = arith.constant 0 : i32
    %c0_i32_0 = arith.constant 0 : i32
    %c0_i32_1 = arith.constant 0 : i32
    return %arg0, %c0_i32, %c0_i32_0 : i32, i32, i32
  }
}

</mosaic_0001>

<bundles_post_ra>
// kernel: tpu_custom_call.1
= control target key start
LH: loop header
LB: loop body
LE: loop exit
PB: predicated region body
PF: predicated region fallthrough
CT: control target
= control target key end

     0   :  { %13 = vsyncpa [#allocation4], 0  ;;  %s3272_s0 = inlined_call_operand.hbm [shape: f32[2,32,256], index: 0, kind: input, shape index: {}]   ;;  %s3273_s1 = inlined_call_operand.vmem [shape: f32[4,32], index: 1, kind: input, shape index: {}]   ;;  %s3274_s2 = inlined_call_operand.vmem [shape: f32[4,1], index: 2, kind: input, shape index: {}]   ;;  %s3275_s3 = inlined_call_operand.vmem [shape: f32[32,4], index: 3, kind: input, shape index: {}]   ;;  %s3276_s4 = inlined_call_operand.vmem [shape: f32[32,1], index: 4, kind: input, shape index: {}]   ;;  %s3277_s5 = inlined_call_operand.vmem [shape: f32[98], index: 5, kind: input, shape index: {}]   ;;  %s3278_s6 = inlined_call_operand.vmem [shape: f32[2], index: 6, kind: input, shape index: {}]   ;;  %s3279_s7 = inlined_call_operand.vmem [shape: f32[7,1,256], index: 7, kind: input, shape index: {}]   ;;  %s3280_s8 = inlined_call_operand.hbm [shape: f32[2,32,256], index: 8, kind: output, shape index: {}]  }
   0x1   :  { %14 = vsyncpa [#allocation6], 0 }
   0x2   :  { %15 = vsyncpa [#allocation9], 0 }
   0x3   :  { %16 = vsyncpa [#allocation5], 0  ;;  %s2267_s27 = smov [#allocation3]   ;;  %s43_s9 = sshll.u32 %s3277_s5, 4  ;;  %s44_s9 = int_to_ptr.vmem [resolvable:$true] %s43_s9 }
   0x4   :  { %s22_s28 = sshll.u32 %s2267_s27, 4  ;;  %s23_s28 = int_to_ptr.vmem [resolvable:$true] %s22_s28 }
   0x5   :  { %s2203_s10 = scalar_lea.vmem %s23_s28, 2048  ;;  %p2208_p1 = scmp.lt.s32.totalorder %s23_s28, %s23_s28 }
   0x6   :  { %p2204_p0 = scmp.ne.s32.totalorder %s23_s28, %s2203_s10  ;;  %p2209_p2 = scmp.lt.s32.totalorder %s2203_s10, %s2203_s10 }
   0x8   :  { %p2210_p3 = por %p2209_p2, %p2208_p1 }
   0xa   :  { %p2211_p4 = pnand %p2210_p3, %p2204_p0 }
   0xc   :  { %2214 = shalt.err (!%p2211_p4)
}
   0xd   :  { %s3281_s11 = smov 256   ;;  %s3282_s12 = smov 16  }
   0xe   :  { %28 = dma.hbm_to_vmem [thread:$0]  %s3272_s0, 2048, %s23_s28, [#allocation4], %s3281_s11, %s3281_s11, %s3282_s12  }
   0xf   :  { %s2215_s15 = scalar_lea.vmem %s44_s9, 16  ;;  %p2220_p6 = scmp.lt.s32.totalorder %s44_s9, %s44_s9 }
  0x10   :  { %p2216_p5 = scmp.ne.s32.totalorder %s44_s9, %s2215_s15  ;;  %p2221_p7 = scmp.lt.s32.totalorder %s2215_s15, %s2215_s15 }
  0x12   :  { %p2222_p8 = por %p2221_p7, %p2220_p6 }
  0x14   :  { %p2223_p9 = pnand %p2222_p8, %p2216_p5 }
  0x16   :  { %2226 = shalt.err (!%p2223_p9)
}
  0x17   :  { %s2270_s5 = smov [#allocation7]   ;;  %s53_s18 = sshll.u32 %s3278_s6, 4  ;;  %s54_s18 = int_to_ptr.vmem [resolvable:$true] %s53_s18 }
  0x18   :  { %46 = dma.vmem_to_smem %s44_s9, 16, %s2270_s5, [#allocation6]  }
  0x19   :  { %s2227_s19 = scalar_lea.vmem %s54_s18, 16  ;;  %p2232_p11 = scmp.lt.s32.totalorder %s54_s18, %s54_s18 }
  0x1a   :  { %p2228_p10 = scmp.ne.s32.totalorder %s54_s18, %s2227_s19  ;;  %p2233_p12 = scmp.lt.s32.totalorder %s2227_s19, %s2227_s19 }
  0x1c   :  { %p2234_p13 = por %p2233_p12, %p2232_p11 }
  0x1e   :  { %p2235_p0 = pnand %p2234_p13, %p2228_p10 }
  0x20   :  { %2238 = shalt.err (!%p2235_p0)
}
  0x21   :  { %s2271_s0 = smov [#allocation8]  }
  0x22   :  { %56 = dma.vmem_to_smem %s54_s18, 16, %s2271_s0, [#allocation9]  }
  0x23   :  { %2259 = dma.done.wait [#allocation4], 2048  }
  0x24   :  { %2260 = vsyncadd [#allocation4], 4294965248 }
  0x25   :  { %2261 = dma.done.wait [#allocation6], 16  }
  0x26   :  { %2262 = vsyncadd [#allocation6], 4294967280 }
  0x27   :  { %2263 = dma.done.wait [#allocation9], 16  }
  0x28   :  { %2264 = vsyncadd [#allocation9], 4294967280 }
  0x29   :  { %68 = sfence }
  0x2a   :  { %v2407_v0 = vld [vmem:[#allocation3 + $0x30] sm:$0xff]  ;;  %v2409_v1 = vld [vmem:[#allocation3 + $0x38] sm:$0xff]  ;;  %v2411_v2 = vld [vmem:[#allocation3 + $0x20] sm:$0xff]  ;;  %v2272_v30 = vmov 0.0   ;;  %vm2273_vm0 = vmmov 0   ;;  %v2274_v33 = vmov 0  }
  0x2b   :  { %v88_v3 = vadd.f32 %v2409_v1, %v2407_v0  ;;  %v2415_v4 = vld [vmem:[#allocation3 + $0x28] sm:$0xff]  ;;  %v2417_v5 = vld [vmem:[#allocation3 + $0x70] sm:$0xff]  ;;  %v2419_v6 = vld [vmem:[#allocation3 + $0x78] sm:$0xff]  ;;  %v104_v14 = vmax.f32 %v2407_v0, %v2409_v1  ;;  %69 = vst [vmem:[#allocation2] sm:$0xff] %v2272_v30  ;;  %2064 = vmatprep.subr.mxu0 %v2272_v30  ;;  %2072 = vmatprep.mubr.msk.f32.mxu0 %vm2273_vm0, %v2272_v30  ;;  %vm144_vm1 = vcmask 7168   ;;  %vm149_vm2 = vcmask 15360  }
  0x2c   :  { %v85_v7 = vadd.f32 %v2415_v4, %v2411_v2  ;;  %v2423_v8 = vld [vmem:[#allocation3 + $0x60] sm:$0xff]  ;;  %v2425_v9 = vld [vmem:[#allocation3 + $0x68] sm:$0xff]  ;;  %v125_v10 = vadd.f32 %v2419_v6, %v2417_v5  ;;  %v2431_v12 = vld [vmem:[#allocation3 + $0x10] sm:$0xff]  ;;  %v141_v19 = vmax.f32 %v2417_v5, %v2419_v6  ;;  %v101_v22 = vmax.f32 %v2411_v2, %v2415_v4  ;;  %70 = vst [vmem:[#allocation2 + $0x8] sm:$0xff] %v2272_v30  ;;  %s3295_s5 = smov 126   ;;  %s3287_s24 = smov 78  }
  0x2d   :  { %89 = vadd.xlane.f32.xlu0 %v88_v3  ;;  %v122_v11 = vadd.f32 %v2425_v9, %v2423_v8  ;;  %v2433_v13 = vld [vmem:[#allocation3 + $0x18] sm:$0xff]  ;;  %v2439_v16 = vld [vmem:[#allocation3 + $0x50] sm:$0xff]  ;;  %v2447_v20 = vld [vmem:[#allocation3] sm:$0xff]  ;;  %v138_v27 = vmax.f32 %v2423_v8, %v2425_v9  ;;  %2167 = vset.pattern.permute.xlu1 %v2274_v33  ;;  %vm154_vm3 = vcmask 23552   ;;  %vm3297_vm4 = vcmask 261120   ;;  %s3289_s25 = smov 79  }
  0x2e   :  { %86 = vadd.xlane.f32.xlu1 %v85_v7  ;;  %v82_v15 = vadd.f32 %v2433_v13, %v2431_v12  ;;  %v2441_v17 = vld [vmem:[#allocation3 + $0x58] sm:$0xff]  ;;  %v2449_v21 = vld [vmem:[#allocation3 + $0x8] sm:$0xff]  ;;  %v2455_v24 = vld [vmem:[#allocation3 + $0x40] sm:$0xff]  ;;  %v98_v28 = vmax.f32 %v2431_v12, %v2433_v13  ;;  %2166 = vset.pattern.permute.xlu0 %v2274_v33  ;;  %vm269_vm5 = vcmask 31744   ;;  %vm282_vm6 = vcmask 1043456   ;;  %s2281_s26 = smov 82  }
  0x2f   :  { %v119_v18 = vadd.f32 %v2441_v17, %v2439_v16  ;;  %v79_v23 = vadd.f32 %v2449_v21, %v2447_v20  ;;  %v2457_v25 = vld [vmem:[#allocation3 + $0x48] sm:$0xff]  ;;  %v135_v29 = vmax.f32 %v2439_v16, %v2441_v17  ;;  %v95_v31 = vmax.f32 %v2447_v20, %v2449_v21  ;;  %v160_v34 = vld [vmem:[%s3274_s2] sm:$0xf]  ;;  %s3290_s27 = smov 93   ;;  %s3291_s28 = smov 94  }
  0x30   :  { %v116_v26 = vadd.f32 %v2457_v25, %v2455_v24  ;;  %v132_v32 = vmax.f32 %v2455_v24, %v2457_v25  ;;  %s3292_s29 = smov 95   ;;  %s2286_s30 = smov 97   ;;  %vm543_vm7 = vcmask 1040384   ;;  %vm3298_vm8 = vcmask 637952  }
  0x31   :  { %126 = vadd.xlane.f32.xlu0 %v125_v10  ;;  %s2287_s9 = smov 98   ;;  %s2288_s10 = smov 99   ;;  %vm3299_vm9 = vcmask 646144   ;;  %vm740_vm10 = vcmask 662528   ;;  %vm781_vm11 = vcmask 670720   ;;  %vm846_vm12 = vcmask 760832  }
  0x32   :  { %123 = vadd.xlane.f32.xlu1 %v122_v11  ;;  %s2289_s13 = smov 109   ;;  %s3293_s14 = smov 110   ;;  %vm870_vm13 = vcmask 769024   ;;  %vm822_vm14 = vcmask 678912   ;;  %vm894_vm15 = vcmask 777216   ;;  %vm933_vm0 = vcmask 793600  }
  0x33   :  { %s2292_s15 = smov 113   ;;  %s2294_s16 = smov 115  }
  0x34   :  { %s2295_s17 = smov 125   ;;  %s3296_s18 = smov 127  }
  0x35   :  { %105 = vmax.xlane.f32.xlu0 %v104_v14  ;;  %s2297_s19 = smov 1   ;;  %s2298_s0 = smov 2  }
  0x36   :  { %83 = vadd.xlane.f32.xlu1 %v82_v15  ;;  %s2299_s6 = smov 3   ;;  %s2300_s20 = smov 13  }
  0x37   :  { %s2301_s2 = smov 14   ;;  %s2302_s21 = smov 15  }
  0x38   :  { %s3288_s22 = smov 77   ;;  %s2304_s23 = smov 17  }
  0x39   :  { %120 = vadd.xlane.f32.xlu0 %v119_v18  ;;  %v159_v18 = vld [vmem:[%s3273_s1] sm:$0xf]  ;;  %s2282_s1 = smov 83   ;;  %s2704_s11 = sld [smem:[#allocation7 + $0x8]] }
  0x3a   :  { %142 = vmax.xlane.f32.xlu1 %v141_v19  ;;  %s2706_s12 = sld [smem:[#allocation7 + $0x39]] }
  0x3d   :  { %102 = vmax.xlane.f32.xlu0 %v101_v22  ;;  %v241_v22 = vld [vmem:[%s3275_s3] sm:$0xff] }
  0x3e   :  { %80 = vadd.xlane.f32.xlu1 %v79_v23  ;;  %2077 = vmatprep.mubr.msk.f32.mxu1 %vm269_vm5, %v241_v22  ;;  %v245_v23 = vld [vmem:[%s3276_s4] sm:$0xff] }
  0x41   :  { %117 = vadd.xlane.f32.xlu0 %v116_v26  ;;  %v246_v26 = vld [vmem:[%s3276_s4 + $0x8] sm:$0xff] }
  0x42   :  { %139 = vmax.xlane.f32.xlu1 %v138_v27  ;;  %v247_v27 = vld [vmem:[%s3276_s4 + $0x10] sm:$0xff] }
  0x45   :  { %99 = vmax.xlane.f32.xlu0 %v98_v28  ;;  %v248_v28 = vld [vmem:[%s3276_s4 + $0x18] sm:$0xff]  ;;  %s3294_s4 = smov 111  }
  0x46   :  { %136 = vmax.xlane.f32.xlu1 %v135_v29 }
  0x49   :  { %96 = vmax.xlane.f32.xlu0 %v95_v31 }
  0x4a   :  { %133 = vmax.xlane.f32.xlu1 %v132_v32 }
  0x5b   :  { %251 = vperm.xlu1 %2167, %v245_v23  }
  0x5f   :  { %163 = vperm.xlu0 %2166, %v160_v34   ;;  %256 = vperm.xlu1 %2167, %v246_v26  }
  0x63   :  { %261 = vperm.xlu1 %2167, %v247_v27   ;;  %v2276_v27 = vmov 1983009808  }
  0x67   :  { %266 = vperm.xlu1 %2167, %v248_v28   ;;  %v600_v28 = vunpack.c.l.s4 %v2276_v27 }
  0xb6   :  { %v90_v35 = vpop.xlane.xlu0 %89 }
  0xb7   :  { %v87_v36 = vpop.xlane.xlu1 %86  ;;  %v94_v40 = vmul.f32 0.00390625, %v90_v35  ;;  %v242_v35 = vld [vmem:[%s3275_s3 + $0x8] sm:$0xff] }
  0xb8   :  { %v93_v51 = vmul.f32 0.00390625, %v87_v36  ;;  %v243_v36 = vld [vmem:[%s3275_s3 + $0x10] sm:$0xff] }
  0xba   :  { %v127_v37 = vpop.xlane.xlu0 %126 }
  0xbb   :  { %v124_v38 = vpop.xlane.xlu1 %123  ;;  %v131_v39 = vmul.f32 0.00390625, %v127_v37  ;;  %v244_v37 = vld [vmem:[%s3275_s3 + $0x18] sm:$0xff]  ;;  %s2293_s3 = smov 114  }
  0xbc   :  { %v130_v48 = vmul.f32 0.00390625, %v124_v38 }
  0xbd   :  { %v148_v43 = vsel %vm144_vm1, %v94_v40, %v131_v39 }
  0xbe   :  { %v106_v41 = vpop.xlane.xlu0 %105  ;;  %v147_v53 = vsel %vm144_vm1, %v93_v51, %v130_v48 }
  0xbf   :  { %v84_v42 = vpop.xlane.xlu1 %83  ;;  %v153_v45 = vsel %vm149_vm2, %v148_v43, %v106_v41 }
  0xc0   :  { %v92_v57 = vmul.f32 0.00390625, %v84_v42 }
  0xc2   :  { %v121_v44 = vpop.xlane.xlu0 %120 }
  0xc3   :  { %v143_v46 = vpop.xlane.xlu1 %142  ;;  %v129_v52 = vmul.f32 0.00390625, %v121_v44 }
  0xc4   :  { %v158_v47 = vsel %vm154_vm3, %v153_v45, %v143_v46 }
  0xc5   :  { %2065 = vmatpush3.msra.mxu0 %v158_v47  ;;  %v146_v61 = vsel %vm144_vm1, %v92_v57, %v129_v52 }
  0xc6   :  { %v103_v49 = vpop.xlane.xlu0 %102  ;;  %2066 = vmatprep.subr.mxu0 %v2272_v30 }
  0xc7   :  { %v81_v50 = vpop.xlane.xlu1 %80  ;;  %v152_v55 = vsel %vm149_vm2, %v147_v53, %v103_v49 }
  0xc8   :  { %v91_v3 = vmul.f32 0.00390625, %v81_v50 }
  0xca   :  { %v118_v54 = vpop.xlane.xlu0 %117 }
  0xcb   :  { %v140_v56 = vpop.xlane.xlu1 %139  ;;  %v128_v59 = vmul.f32 0.00390625, %v118_v54 }
  0xcc   :  { %v157_v58 = vsel %vm154_vm3, %v152_v55, %v140_v56 }
  0xcd   :  { %2067 = vmatpush3.msra.mxu0 %v157_v58  ;;  %v145_v11 = vsel %vm144_vm1, %v91_v3, %v128_v59 }
  0xce   :  { %v100_v60 = vpop.xlane.xlu0 %99  ;;  %2068 = vmatprep.subr.mxu0 %v2272_v30 }
  0xcf   :  { %v151_v62 = vsel %vm149_vm2, %v146_v61, %v100_v60  ;;  %v137_v63 = vpop.xlane.xlu1 %136 }
  0xd0   :  { %v156_v7 = vsel %vm154_vm3, %v151_v62, %v137_v63 }
  0xd1   :  { %2069 = vmatpush3.msra.mxu0 %v156_v7 }
  0xd2   :  { %v97_v10 = vpop.xlane.xlu0 %96  ;;  %2070 = vmatprep.subr.mxu0 %v2272_v30 }
  0xd3   :  { %v150_v14 = vsel %vm149_vm2, %v145_v11, %v97_v10  ;;  %v134_v15 = vpop.xlane.xlu1 %133 }
  0xd4   :  { %v155_v19 = vsel %vm154_vm3, %v150_v14, %v134_v15  ;;  %v590_v14 = vlaneseq }
  0xd5   :  { %2071 = vmatpush3.msra.mxu0 %v155_v19 }
  0xd6   :  { %2073 = vmatmul.mubr.msk.f32.vlgmr.msra.gmra.mxu0 %vm3297_vm4, %v159_v18  ;;  %v2524_v19 = vshrl.u32 %v590_v14, 7  ;;  %vm651_vm4 = vcmask 1039360  }
  0xd7   :  { %v252_v38 = vpop.permute.xlu1 %251 }
  0xd8   :  { %v2527_v23 = vsub.s32 0, %v2524_v19  ;;  %v2530_v26 = vsub.s32 1, %v2524_v19 }
  0xda   :  { %v164_v29 = vpop.permute.xlu0 %163 }
  0xdb   :  { %v257_v39 = vpop.permute.xlu1 %256 }
  0xdf   :  { %v262_v45 = vpop.permute.xlu1 %261 }
  0xe3   :  { %v267_v48 = vpop.permute.xlu1 %266 }
 0x196   :  { %v236_v30 = vpop.f32.mrf.mxu0 }
 0x197   :  { %v237_v31 = vadd.f32 %v236_v30, %v164_v29  ;;  %v573_v30 = vld [vmem:[%s3279_s7 + $0x2] sm:$0x3] }
 0x198   :  { %v2074_v32 = vpop.f32.mrf.mxu0 }
 0x199   :  { %v240_v34 = vmax.f32 %v237_v31, 0.0  ;;  %v2277_v31 = vmov 1   ;;  %v601_v32 = vunpack.c.0.s8 %v600_v28 }
 0x19b   :  { %2075 = vmatprep.subr.msk.mxu1 %vm282_vm6, %v240_v34 }
 0x19c   :  { %2076 = vmatpush3.msk.msra.mxu1 %vm282_vm6, %v240_v34  ;;  %v627_v34 = vrot.slane %v573_v30, %v2527_v23  ;;  %vm981_vm6 = vcmask 809984  }
 0x19d   :  { %2078 = vmatmul.mubr.msk.f32.vlgmr.msra.gmra.mxu1 %vm269_vm5, %v242_v35  ;;  %v631_v35 = vrot.slane %v573_v30, %v2530_v26 }
 0x19e   :  { %2080 = vmatprep.mubr.msk.f32.mxu1 %vm269_vm5, %v243_v36  ;;  %v574_v36 = vld [vmem:[%s3279_s7 + $0x4] sm:$0x3] }
 0x1a1   :  { %2081 = vmatmul.mubr.msk.f32.gmra.mxu1 %vm269_vm5, %v244_v37  ;;  %v575_v37 = vld [vmem:[%s3279_s7 + $0x8] sm:$0x3]  ;;  %vm957_vm5 = vcmask 801792  }
 0x25d   :  { %v2079_v40 = vpop.f32.mrf.mxu1 }
 0x25e   :  { %v358_v41 = vadd.f32 %v2079_v40, %v257_v39  ;;  %v668_v39 = vrot.slane %v574_v36, %v2527_v23  ;;  %v672_v40 = vrot.slane %v574_v36, %v2530_v26 }
 0x25f   :  { %v352_v42 = vpop.f32.mrf.mxu1 }
 0x260   :  { %377 = vrot.lane.b32.xlu1 %v358_v41, %s3295_s5  ;;  %v353_v44 = vadd.f32 %v352_v42, %v252_v38  ;;  %v632_v42 = vcombine.low %v627_v34, %v631_v35 }
 0x261   :  { %v2082_v43 = vpop.f32.mrf.mxu1 }
 0x262   :  { %v368_v49 = vadd.f32 %v2082_v43, %v267_v48  ;;  %v724_v43 = vrot.slane %v575_v37, %v2527_v23 }
 0x263   :  { %v362_v46 = vpop.f32.mrf.mxu1 }
 0x264   :  { %375 = vrot.lane.b32.xlu1 %v353_v44, %s3295_s5  ;;  %v363_v47 = vadd.f32 %v362_v46, %v262_v45  ;;  %v576_v45 = vld [vmem:[%s3279_s7 + $0xa] sm:$0x3] }
 0x265   :  { %v765_v48 = vrot.slane %v576_v45, %v2527_v23 }
 0x268   :  { %379 = vrot.lane.b32.xlu1 %v363_v47, %s3295_s5 }
 0x26c   :  { %381 = vrot.lane.b32.xlu1 %v368_v49, %s3295_s5 }
 0x2d2   :  { %v378_v50 = vpop.permute.xlu1 %377 }
 0x2d3   :  { %v388_v51 = vadd.f32 %v378_v50, %v358_v41  ;;  %v604_v41 = vsub.s32 %v601_v32, %v2524_v19 }
 0x2d5   :  { %v1950_v52 = vmul.f32 -1.442695, %v388_v51  ;;  %v2557_v50 = vrot.slane %v632_v42, %v604_v41 }
 0x2d6   :  { %v376_v53 = vpop.permute.xlu1 %375 }
 0x2d7   :  { %2171 = vpow2.f32 %v1950_v52  ;;  %v387_v54 = vadd.f32 %v376_v53, %v353_v44  ;;  %v728_v44 = vrot.slane %v575_v37, %v2530_v26 }
 0x2d9   :  { %v1949_v55 = vmul.f32 -1.442695, %v387_v54  ;;  %v729_v51 = vcombine.low %v724_v43, %v728_v44  ;;  %v572_v54 = vld [vmem:[%s3279_s7] sm:$0x3] }
 0x2da   :  { %v380_v56 = vpop.permute.xlu1 %379 }
 0x2db   :  { %2173 = vpow2.f32 %v1949_v55  ;;  %v389_v57 = vadd.f32 %v380_v56, %v363_v47  ;;  %v673_v47 = vcombine.low %v668_v39, %v672_v40 }
 0x2dd   :  { %v1951_v58 = vmul.f32 -1.442695, %v389_v57  ;;  %v2564_v55 = vrot.slane %v673_v47, %v604_v41  ;;  %v593_v57 = vrot.slane %v572_v54, %v2527_v23 }
 0x2de   :  { %v382_v59 = vpop.permute.xlu1 %381 }
 0x2df   :  { %2175 = vpow2.f32 %v1951_v58  ;;  %v390_v60 = vadd.f32 %v382_v59, %v368_v49  ;;  %v769_v49 = vrot.slane %v576_v45, %v2530_v26  ;;  %v597_v58 = vrot.slane %v572_v54, %v2530_v26 }
 0x2e0   :  { %v2570_v59 = vrot.slane %v729_v51, %v604_v41 }
 0x2e1   :  { %v1952_v61 = vmul.f32 -1.442695, %v390_v60  ;;  %v770_v56 = vcombine.low %v765_v48, %v769_v49 }
 0x2e3   :  { %2177 = vpow2.f32 %v1952_v61  ;;  %v2574_v61 = vrot.slane %v770_v56, %v604_v41 }
 0x2e4   :  { %v2172_v62 = vpop.eup %2171 }
 0x2e5   :  { %v404_v63 = vadd.f32 1.0, %v2172_v62  ;;  %v598_v62 = vcombine.low %v593_v57, %v597_v58 }
 0x2e7   :  { %2179 = vrcp.f32 %v404_v63 }
 0x2e8   :  { %v2174_v3 = vpop.eup %2173 }
 0x2e9   :  { %v403_v7 = vadd.f32 1.0, %v2174_v3  ;;  %v605_v3 = vrot.slane %v598_v62, %v604_v41 }
 0x2eb   :  { %2181 = vrcp.f32 %v403_v7 }
 0x2ec   :  { %v2176_v10 = vpop.eup %2175 }
 0x2ed   :  { %v405_v11 = vadd.f32 1.0, %v2176_v10 }
 0x2ef   :  { %2183 = vrcp.f32 %v405_v11 }
 0x2f0   :  { %v2178_v15 = vpop.eup %2177 }
 0x2f1   :  { %v406_v18 = vadd.f32 1.0, %v2178_v15 }
 0x2f3   :  { %2185 = vrcp.f32 %v406_v18 }
 0x2f4   :  { %v2180_v22 = vpop.eup %2179 }
 0x2f5   :  { %422 = vperm.xlu1 %2167, %v2180_v22  }
 0x2f8   :  { %v2182_v29 = vpop.eup %2181 }
 0x2f9   :  { %2168 = vset.pattern.permute.xlu1 %v2277_v31  ;;  %417 = vperm.xlu0 %2166, %v2182_v29  }
 0x2fa   :  { %486 = vperm.xlu1 %2168, %v2180_v22  }
 0x2fc   :  { %v2184_v38 = vpop.eup %2183 }
 0x2fd   :  { %2169 = vset.pattern.permute.xlu0 %v2277_v31 }
 0x2fe   :  { %2170 = vset.pattern.permute.xlu1 %v2274_v33  ;;  %482 = vperm.xlu0 %2169, %v2182_v29   ;;  %v577_v33 = vld [vmem:[%s3279_s7 + $0xc] sm:$0x3]  ;;  %s2280_s7 = smov 81  }
 0x2ff   :  { %427 = vperm.xlu1 %2170, %v2184_v38   ;;  %v806_v52 = vrot.slane %v577_v33, %v2527_v23  ;;  %v810_v53 = vrot.slane %v577_v33, %v2530_v26 }
 0x300   :  { %v2186_v46 = vpop.eup %2185 }
 0x301   :  { %v811_v60 = vcombine.low %v806_v52, %v810_v53 }
 0x302   :  { %490 = vperm.xlu0 %2169, %v2184_v38  }
 0x303   :  { %432 = vperm.xlu1 %2170, %v2186_v46   ;;  %v2577_v63 = vrot.slane %v811_v60, %v604_v41 }
 0x306   :  { %494 = vperm.xlu0 %2169, %v2186_v46  }
 0x307   :  { %640 = vrot.lane.b32.xlu1 %v2557_v50, %s3287_s24  ;;  %s2720_s24 = sld [smem:[#allocation7 + $0xa]] }
 0x30a   :  { %681 = vrot.lane.b32.xlu0 %v2564_v55, %s3289_s25  ;;  %s2724_s25 = sld [smem:[#allocation7 + $0x3b]] }
 0x30b   :  { %737 = vrot.lane.b32.xlu1 %v2570_v59, %s2280_s7  ;;  %s2305_s7 = smov 33  }
 0x30e   :  { %778 = vrot.lane.b32.xlu0 %v2574_v61, %s2281_s26  ;;  %s2306_s26 = smov 18  }
 0x30f   :  { %819 = vrot.lane.b32.xlu1 %v2577_v63, %s2282_s1  ;;  %s2307_s1 = smov 34  }
 0x312   :  { %843 = vrot.lane.b32.xlu0 %v605_v3, %s3290_s27  ;;  %s2726_s27 = sld [smem:[#allocation7 + $0x34]] }
 0x313   :  { %867 = vrot.lane.b32.xlu1 %v2557_v50, %s3291_s28  ;;  %s2730_s28 = sld [smem:[#allocation7 + $0xc]] }
 0x316   :  { %891 = vrot.lane.b32.xlu0 %v2564_v55, %s3292_s29  ;;  %s2734_s29 = sld [smem:[#allocation7 + $0x3d]] }
 0x317   :  { %930 = vrot.lane.b32.xlu1 %v2570_v59, %s2286_s30  ;;  %s2308_s30 = smov 19  }
 0x31a   :  { %954 = vrot.lane.b32.xlu0 %v2574_v61, %s2287_s9  ;;  %s2309_s9 = smov 35  }
 0x31b   :  { %978 = vrot.lane.b32.xlu1 %v2577_v63, %s2288_s10  ;;  %s3284_s10 = smov 29  }
 0x31e   :  { %1002 = vrot.lane.b32.xlu0 %v605_v3, %s2289_s13 }
 0x31f   :  { %1025 = vrot.lane.b32.xlu1 %v2557_v50, %s3293_s14  ;;  %s2736_s14 = sld [smem:[#allocation7 + $0xd]] }
 0x322   :  { %1047 = vrot.lane.b32.xlu0 %v2564_v55, %s3294_s4  ;;  %s2738_s4 = sld [smem:[#allocation7 + $0x3e]] }
 0x323   :  { %1083 = vrot.lane.b32.xlu1 %v2570_v59, %s2292_s15  ;;  %s3286_s15 = smov 45  }
 0x326   :  { %1107 = vrot.lane.b32.xlu0 %v2574_v61, %s2293_s3  ;;  %s3283_s3 = smov 30  }
 0x327   :  { %1131 = vrot.lane.b32.xlu1 %v2577_v63, %s2294_s16  ;;  %s3285_s16 = smov 31  }
 0x32a   :  { %1155 = vrot.lane.b32.xlu0 %v605_v3, %s2295_s17 }
 0x32b   :  { %1178 = vrot.lane.b32.xlu1 %v2557_v50, %s3295_s5  ;;  %s2742_s5 = sld [smem:[#allocation7 + $0xe]] }
 0x32e   :  { %1200 = vrot.lane.b32.xlu0 %v2564_v55, %s3296_s18  ;;  %s2746_s18 = sld [smem:[#allocation7 + $0x3f]] }
 0x32f   :  { %1238 = vrot.lane.b32.xlu1 %v2570_v59, %s2297_s19  ;;  %s2670_s19 = sld [smem:[#allocation7 + $0x1]] }
 0x332   :  { %1261 = vrot.lane.b32.xlu0 %v2574_v61, %s2298_s0  ;;  %s2672_s0 = sld [smem:[#allocation7 + $0x32]] }
 0x333   :  { %1284 = vrot.lane.b32.xlu1 %v2577_v63, %s2299_s6  ;;  %s2678_s6 = sld [smem:[#allocation7 + $0x2]] }
 0x336   :  { %1307 = vrot.lane.b32.xlu0 %v605_v3, %s2300_s20  ;;  %s2680_s20 = sld [smem:[#allocation7 + $0x33]] }
 0x337   :  { %1331 = vrot.lane.b32.xlu1 %v2557_v50, %s2301_s2  ;;  %s2682_s2 = sld [smem:[#allocation7 + $0x4]] }
 0x33a   :  { %1355 = vrot.lane.b32.xlu0 %v2564_v55, %s2302_s21  ;;  %s2686_s21 = sld [smem:[#allocation7 + $0x35]] }
 0x33b   :  { %606 = vrot.lane.b32.xlu1 %v605_v3, %s3288_s22  ;;  %s2722_s22 = sld [smem:[#allocation7 + $0x3]] }
 0x33e   :  { %1394 = vrot.lane.b32.xlu0 %v2570_v59, %s2304_s23  ;;  %s2688_s23 = sld [smem:[#allocation7 + $0x5]] }
 0x33f   :  { %1553 = vrot.lane.b32.xlu1 %v2570_v59, %s2305_s7  ;;  %s2690_s7 = sld [smem:[#allocation7 + $0x36]] }
 0x342   :  { %1418 = vrot.lane.b32.xlu0 %v2574_v61, %s2306_s26  ;;  %s2692_s26 = sld [smem:[#allocation7 + $0x6]] }
 0x343   :  { %1577 = vrot.lane.b32.xlu1 %v2574_v61, %s2307_s1  ;;  %s2694_s1 = sld [smem:[#allocation7 + $0x37]] }
 0x346   :  { %1442 = vrot.lane.b32.xlu0 %v2577_v63, %s2308_s30  ;;  %s2698_s30 = sld [smem:[#allocation7 + $0x7]] }
 0x347   :  { %1601 = vrot.lane.b32.xlu1 %v2577_v63, %s2309_s9  ;;  %s2702_s9 = sld [smem:[#allocation7 + $0x38]] }
 0x34a   :  { %1466 = vrot.lane.b32.xlu0 %v605_v3, %s3284_s10  ;;  %s2710_s10 = sld [smem:[#allocation7 + $0x3a]] }
 0x34b   :  { %1625 = vrot.lane.b32.xlu1 %v605_v3, %s3286_s15  ;;  %s2718_s15 = sld [smem:[#allocation7 + $0x3c]] }
 0x34e   :  { %1490 = vrot.lane.b32.xlu0 %v2557_v50, %s3283_s3  ;;  %s2708_s3 = sld [smem:[#allocation7 + $0x9]] }
 0x352   :  { %1514 = vrot.lane.b32.xlu0 %v2564_v55, %s3285_s16  ;;  %s2716_s16 = sld [smem:[#allocation7 + $0xb]] }
 0x370   :  { %v2620_v7 = vpop.permute.xlu1 %422 }
 0x371   :  { %v437_v29 = vmul.f32 %v2620_v7, %v2431_v12  ;;  %v438_v30 = vmul.f32 %v2620_v7, %v2433_v13 }
 0x374   :  { %v2622_v10 = vpop.permute.xlu0 %417 }
 0x375   :  { %v2624_v11 = vpop.permute.xlu1 %486  ;;  %v435_v14 = vmul.f32 %v2622_v10, %v2447_v20  ;;  %v436_v15 = vmul.f32 %v2622_v10, %v2449_v21 }
 0x377   :  { %v461_v31 = vadd.f32 %v437_v29, %v435_v14  ;;  %v470_v32 = vadd.f32 %v438_v30, %v436_v15 }
 0x379   :  { %v2630_v18 = vpop.permute.xlu0 %482 }
 0x37a   :  { %v497_v22 = vmul.f32 %v2630_v18, %v2455_v24  ;;  %v498_v27 = vmul.f32 %v2630_v18, %v2457_v25  ;;  %v2636_v28 = vpop.permute.xlu1 %427  ;;  %v499_v24 = vmul.f32 %v2624_v11, %v2439_v16  ;;  %v500_v25 = vmul.f32 %v2624_v11, %v2441_v17 }
 0x37b   :  { %v439_v20 = vmul.f32 %v2636_v28, %v2411_v2  ;;  %v440_v21 = vmul.f32 %v2636_v28, %v2415_v4 }
 0x37c   :  { %v523_v12 = vadd.f32 %v499_v24, %v497_v22  ;;  %v532_v35 = vadd.f32 %v500_v25, %v498_v27 }
 0x37d   :  { %v2650_v34 = vpop.permute.xlu0 %490  ;;  %v462_v4 = vadd.f32 %v461_v31, %v439_v20  ;;  %v471_v37 = vadd.f32 %v470_v32, %v440_v21  ;;  %v443_v38 = vmax.f32 %v435_v14, %v439_v20  ;;  %v452_v39 = vmax.f32 %v436_v15, %v440_v21 }
 0x37e   :  { %v501_v13 = vmul.f32 %v2650_v34, %v2423_v8  ;;  %v502_v2 = vmul.f32 %v2650_v34, %v2425_v9  ;;  %v2656_v36 = vpop.permute.xlu1 %432 }
 0x37f   :  { %v441_v16 = vmul.f32 %v2656_v36, %v2407_v0  ;;  %v442_v17 = vmul.f32 %v2656_v36, %v2409_v1 }
 0x380   :  { %v505_v40 = vmax.f32 %v497_v22, %v501_v13  ;;  %v514_v41 = vmax.f32 %v498_v27, %v502_v2  ;;  %v524_v0 = vadd.f32 %v523_v12, %v501_v13  ;;  %v533_v46 = vadd.f32 %v532_v35, %v502_v2 }
 0x381   :  { %v444_v42 = vmax.f32 %v437_v29, %v441_v16  ;;  %v453_v43 = vmax.f32 %v438_v30, %v442_v17  ;;  %v463_v8 = vadd.f32 %v462_v4, %v441_v16  ;;  %v472_v44 = vadd.f32 %v471_v37, %v442_v17  ;;  %v2662_v45 = vpop.permute.xlu0 %494 }
 0x382   :  { %v503_v9 = vmul.f32 %v2662_v45, %v2417_v5  ;;  %v504_v33 = vmul.f32 %v2662_v45, %v2419_v6 }
 0x383   :  { %v445_v47 = vmax.f32 %v443_v38, %v444_v42  ;;  %v454_v1 = vmax.f32 %v452_v39, %v453_v43  ;;  %v464_v48 = vrot.slane %v463_v8, 4  ;;  %v473_v49 = vrot.slane %v472_v44, 4 }
 0x384   :  { %v506_v51 = vmax.f32 %v499_v24, %v503_v9  ;;  %v515_v52 = vmax.f32 %v500_v25, %v504_v33  ;;  %v525_v53 = vadd.f32 %v524_v0, %v503_v9  ;;  %v534_v54 = vadd.f32 %v533_v46, %v504_v33 }
 0x385   :  { %v446_v56 = vrot.slane %v445_v47, 4  ;;  %v455_v57 = vrot.slane %v454_v1, 4  ;;  %v465_v58 = vadd.f32 %v464_v48, %v463_v8  ;;  %v474_v60 = vadd.f32 %v473_v49, %v472_v44 }
 0x386   :  { %v507_v62 = vmax.f32 %v505_v40, %v506_v51  ;;  %v516_v3 = vmax.f32 %v514_v41, %v515_v52  ;;  %v526_v5 = vrot.slane %v525_v53, 4  ;;  %v535_v14 = vrot.slane %v534_v54, 4  ;;  %v2668_v51 = vpop.permute.xlu0 %681 }
 0x387   :  { %v447_v15 = vmax.f32 %v445_v47, %v446_v56  ;;  %v456_v6 = vmax.f32 %v454_v1, %v455_v57  ;;  %v466_v22 = vrot.slane %v465_v58, 2  ;;  %v475_v27 = vrot.slane %v474_v60, 2 }
 0x388   :  { %v508_v29 = vrot.slane %v507_v62, 4  ;;  %v517_v30 = vrot.slane %v516_v3, 4  ;;  %v527_v20 = vadd.f32 %v526_v5, %v525_v53  ;;  %v536_v21 = vadd.f32 %v535_v14, %v534_v54 }
 0x389   :  { %v448_v24 = vrot.slane %v447_v15, 2  ;;  %v457_v25 = vrot.slane %v456_v6, 2  ;;  %v467_v31 = vadd.f32 %v466_v22, %v465_v58  ;;  %v476_v32 = vadd.f32 %v475_v27, %v474_v60 }
 0x38a   :  { %v509_v12 = vmax.f32 %v507_v62, %v508_v29  ;;  %v518_v35 = vmax.f32 %v516_v3, %v517_v30  ;;  %v528_v13 = vrot.slane %v527_v20, 2  ;;  %v537_v2 = vrot.slane %v536_v21, 2  ;;  %v2684_v27 = vpop.permute.xlu0 %778  ;;  %v2696_v29 = vpop.permute.xlu1 %640 }
 0x38b   :  { %v449_v4 = vmax.f32 %v447_v15, %v448_v24  ;;  %v458_v37 = vmax.f32 %v456_v6, %v457_v25  ;;  %v468_v16 = vrot.slane %v467_v31, 1  ;;  %v477_v17 = vrot.slane %v476_v32, 1 }
 0x38c   :  { %v510_v38 = vrot.slane %v509_v12, 2  ;;  %v519_v39 = vrot.slane %v518_v35, 2  ;;  %v529_v40 = vadd.f32 %v528_v13, %v527_v20  ;;  %v538_v41 = vadd.f32 %v537_v2, %v536_v21 }
 0x38d   :  { %v450_v42 = vrot.slane %v449_v4, 1  ;;  %v459_v43 = vrot.slane %v458_v37, 1  ;;  %v469_v8 = vadd.f32 %v468_v16, %v467_v31  ;;  %v478_v44 = vadd.f32 %v477_v17, %v476_v32 }
 0x38e   :  { %v511_v9 = vmax.f32 %v509_v12, %v510_v38  ;;  %v520_v33 = vmax.f32 %v518_v35, %v519_v39  ;;  %v530_v0 = vrot.slane %v529_v40, 1  ;;  %v539_v46 = vrot.slane %v538_v41, 1  ;;  %v2700_v30 = vpop.permute.xlu0 %843  ;;  %v2712_v20 = vpop.permute.xlu1 %737 }
 0x38f   :  { %v451_v52 = vmax.f32 %v449_v4, %v450_v42  ;;  %v460_v53 = vmax.f32 %v458_v37, %v459_v43  ;;  %v479_v54 = vmul.f32 0.03125, %v469_v8  ;;  %v480_v56 = vmul.f32 0.03125, %v478_v44 }
 0x390   :  { %v512_v47 = vrot.slane %v511_v9, 1  ;;  %v521_v1 = vrot.slane %v520_v33, 1  ;;  %v531_v48 = vadd.f32 %v530_v0, %v529_v40  ;;  %v540_v49 = vadd.f32 %v539_v46, %v538_v41 }
 0x391   :  { %v618_v31 = vstv %s2670_s19  ;;  %v620_v32 = vstv %s2672_s0  ;;  %v700_v2 = vstv %s2722_s22  ;;  %s2755_s19 = sld [smem:[#allocation7 + $0xf]]  ;;  %v910_v17 = vstv %s2720_s24 }
 0x392   :  { %v513_v57 = vmax.f32 %v511_v9, %v512_v47  ;;  %v522_v58 = vmax.f32 %v520_v33, %v521_v1  ;;  %v541_v60 = vmul.f32 0.03125, %v531_v48  ;;  %v542_v62 = vmul.f32 0.03125, %v540_v49  ;;  %v2714_v21 = vpop.permute.xlu0 %891  ;;  %v2728_v24 = vpop.permute.xlu1 %819  ;;  %s2760_s22 = sld [smem:[#allocation7 + $0x40]] }
 0x393   :  { %v912_v42 = vstv %s2724_s25  ;;  %v702_v43 = vstv %s2726_s27  ;;  %v659_v8 = vstv %s2678_s6  ;;  %v661_v44 = vstv %s2680_s20  ;;  %s2767_s24 = sld [smem:[#allocation7 + $0x10]] }
 0x394   :  { %v544_v3 = vsel %vm543_vm7, %v451_v52, %v513_v57  ;;  %v545_v5 = vsel %vm543_vm7, %v460_v53, %v522_v58  ;;  %v546_v14 = vsel %vm543_vm7, %v479_v54, %v541_v60  ;;  %v547_v15 = vsel %vm543_vm7, %v480_v56, %v542_v62  ;;  %s2773_s0 = sld [smem:[#allocation7 + $0x41]] }
 0x395   :  { %v552_v6 = vcombine.low %v544_v3, %v545_v5  ;;  %v560_v22 = vcombine.low %v546_v14, %v547_v15  ;;  %v715_v0 = vstv %s2682_s2  ;;  %v717_v47 = vstv %s2686_s21  ;;  %s2778_s25 = sld [smem:[#allocation7 + $0x11]] }
 0x396   :  { %v2732_v25 = vpop.permute.xlu0 %954  ;;  %v2749_v4 = vpop.permute.xlu1 %867  ;;  %v838_v1 = vstv %s2698_s30  ;;  %v840_v48 = vstv %s2702_s9  ;;  %v756_v54 = vstv %s2688_s23  ;;  %v758_v56 = vstv %s2690_s7  ;;  %s2782_s27 = sld [smem:[#allocation7 + $0x42]]  ;;  %s2315_s7 = smov 112  }
 0x397   :  { %1953 = vst.sshfl [vmem:[#allocation2 + $0x2] sm:$0x33 pattern:$0x76325410] %v552_v6  ;;  %v642_v62 = vrot.slane %v2696_v29, 6  ;;  %s2788_s6 = sld [smem:[#allocation7 + $0x12]] }
 0x398   :  { %1954 = vst.sshfl [vmem:[#allocation2 + $0xa] sm:$0x33 pattern:$0x76325410] %v560_v22  ;;  %s2796_s20 = sld [smem:[#allocation7 + $0x43]]  ;;  %s3302_s30 = smov 111  }
 0x399   :  { %s2828_s2 = sld [smem:[#allocation7 + $0x15]]  ;;  %s2316_s9 = smov 124   ;;  %vm919_vm7 = vcmask 891904  }
 0x39a   :  { %v2753_v16 = vpop.permute.xlu0 %1002  ;;  %v2784_v6 = vpop.permute.xlu1 %930  ;;  %s2835_s21 = sld [smem:[#allocation7 + $0x46]] }
 0x39b   :  { %s2840_s23 = sld [smem:[#allocation7 + $0x16]] }
 0x39e   :  { %v614_v12 = vld [vmem:[#allocation2] sm:$0x3f]  ;;  %v2786_v22 = vpop.permute.xlu0 %1047 }
 0x39f   :  { %v615_v35 = vld [vmem:[#allocation2 + $0x8] sm:$0x3f]  ;;  %v2744_v13 = vld [vmem:[#allocation2] sm:$0x3f]  ;;  %v619_v38 = vmul.f32 %v618_v31, %v614_v12  ;;  %v845_v12 = vrot.slane %v2700_v30, 6 }
 0x3a0   :  { %v2751_v37 = vld [vmem:[#allocation2] sm:$0x3f]  ;;  %v621_v39 = vmul.f32 %v620_v32, %v615_v35  ;;  %v697_v40 = vld [vmem:[#allocation2 + $0x8] sm:$0x3f]  ;;  %v701_v46 = vmul.f32 %v700_v2, %v2744_v13  ;;  %v862_v35 = vstv %s2704_s11  ;;  %v864_v2 = vstv %s2706_s12  ;;  %s2803_s11 = sld [smem:[#allocation7 + $0x13]] }
 0x3a1   :  { %v2758_v41 = vld [vmem:[#allocation2 + $0x8] sm:$0x3f]  ;;  %v655_v9 = vld [vmem:[#allocation2] sm:$0x3f]  ;;  %v911_v53 = vmul.f32 %v910_v17, %v2751_v37  ;;  %v703_v58 = vmul.f32 %v702_v43, %v697_v40  ;;  %v797_v43 = vstv %s2692_s26  ;;  %s2805_s12 = sld [smem:[#allocation7 + $0x44]]  ;;  %s3301_s26 = smov 126  }
 0x3a2   :  { %v656_v33 = vld [vmem:[#allocation2 + $0x8] sm:$0x3f]  ;;  %v834_v49 = vld [vmem:[#allocation2] sm:$0x3f]  ;;  %v913_v57 = vmul.f32 %v912_v42, %v2758_v41  ;;  %v622_v60 = vadd.f32 %v621_v39, %v619_v38  ;;  %v660_v3 = vmul.f32 %v659_v8, %v655_v9  ;;  %v683_v39 = vrot.slane %v2668_v51, 6 }
 0x3a3   :  { %v835_v52 = vld [vmem:[#allocation2 + $0x8] sm:$0x3f]  ;;  %v662_v5 = vmul.f32 %v661_v44, %v656_v33  ;;  %v839_v14 = vmul.f32 %v838_v1, %v834_v49  ;;  %v704_v32 = vadd.f32 %v703_v58, %v701_v46  ;;  %v858_v17 = vld [vmem:[#allocation2] sm:$0x3f]  ;;  %v739_v42 = vrot.slane %v2712_v20, 6 }
 0x3a4   :  { %v841_v15 = vmul.f32 %v840_v48, %v835_v52  ;;  %v914_v31 = vadd.f32 %v913_v57, %v911_v53  ;;  %v859_v38 = vld [vmem:[#allocation2 + $0x8] sm:$0x3f]  ;;  %v644_v8 = vsel %vm3298_vm8, %v642_v62, %v2696_v29  ;;  %v716_v9 = vmul.f32 %v715_v0, %v2744_v13  ;;  %v752_v1 = vld [vmem:[#allocation2] sm:$0x3f] }
 0x3a5   :  { %706 = vrot.lane.b32.xlu1 %v704_v32, %s2295_s17  ;;  %v663_v44 = vadd.f32 %v662_v5, %v660_v3  ;;  %v718_v33 = vmul.f32 %v717_v47, %v697_v40  ;;  %v646_v46 = vmul.f32 %v644_v8, %v622_v60  ;;  %v753_v48 = vld [vmem:[#allocation2 + $0x8] sm:$0x3f]  ;;  %v863_v52 = vmul.f32 %v862_v35, %v858_v17  ;;  %v882_v13 = vld [vmem:[#allocation2] sm:$0x3f]  ;;  %v2818_v5 = vpop.permute.xlu1 %978  ;;  %s2314_s17 = smov 49  }
 0x3a6   :  { %916 = vrot.lane.b32.xlu0 %v914_v31, %s2289_s13  ;;  %v842_v49 = vadd.f32 %v841_v15, %v839_v14  ;;  %v865_v53 = vmul.f32 %v864_v2, %v859_v38  ;;  %v847_v57 = vsel %vm846_vm12, %v845_v12, %v2700_v30  ;;  %v869_v29 = vrot.slane %v2749_v4, 6  ;;  %v883_v40 = vld [vmem:[#allocation2 + $0x8] sm:$0x3f]  ;;  %v2820_v14 = vpop.permute.xlu0 %1107  ;;  %s2822_s13 = sld [smem:[#allocation7 + $0x14]]  ;;  %v793_v31 = vld [vmem:[#allocation2] sm:$0x3f] }
 0x3a7   :  { %v886_v58 = vstv %s2708_s3  ;;  %v888_v62 = vstv %s2710_s10  ;;  %v685_v0 = vsel %vm3299_vm9, %v683_v39, %v2668_v51  ;;  %v741_v47 = vsel %vm740_vm10, %v739_v42, %v2712_v20  ;;  %s3300_s10 = smov 127   ;;  %s2826_s3 = sld [smem:[#allocation7 + $0x45]]  ;;  %v794_v32 = vld [vmem:[#allocation2 + $0x8] sm:$0x3f] }
 0x3a8   :  { %v780_v60 = vrot.slane %v2684_v27, 6  ;;  %v799_v3 = vstv %s2694_s1  ;;  %v687_v51 = vmul.f32 %v685_v0, %v663_v44  ;;  %v719_v30 = vadd.f32 %v718_v33, %v716_v9  ;;  %s2858_s1 = sld [smem:[#allocation7 + $0x48]] }
 0x3a9   :  { %648 = vrot.lane.b32.xlu1 %v646_v46, %s3300_s10  ;;  %v757_v15 = vmul.f32 %v756_v54, %v752_v1  ;;  %v759_v20 = vmul.f32 %v758_v56, %v753_v48  ;;  %v849_v12 = vmul.f32 %v847_v57, %v842_v49  ;;  %v866_v35 = vadd.f32 %v865_v53, %v863_v52  ;;  %v2847_v48 = vpop.permute.xlu1 %1025  ;;  %s3303_s10 = smov 110  }
 0x3aa   :  { %1705 = vrot.lane.b32.xlu0 %v2570_v59, %s2314_s17  ;;  %v887_v2 = vmul.f32 %v886_v58, %v882_v13  ;;  %v889_v17 = vmul.f32 %v888_v62, %v883_v40  ;;  %v871_v59 = vsel %vm870_vm13, %v869_v29, %v2749_v4  ;;  %v893_v38 = vrot.slane %v2714_v21, 6  ;;  %v2849_v49 = vpop.permute.xlu0 %1155  ;;  %v945_v29 = vld [vmem:[#allocation2] sm:$0x3f]  ;;  %v946_v58 = vld [vmem:[#allocation2 + $0x8] sm:$0x3f]  ;;  %s2863_s17 = sld [smem:[#allocation7 + $0x19]] }
 0x3ab   :  { %v925_v39 = vstv %s2716_s16  ;;  %v927_v42 = vstv %s2718_s15  ;;  %v782_v54 = vsel %vm781_vm11, %v780_v60, %v2684_v27  ;;  %v821_v56 = vrot.slane %v2728_v24, 6  ;;  %s2843_s15 = sld [smem:[#allocation7 + $0x47]] }
 0x3ac   :  { %v743_v4 = vmul.f32 %v741_v47, %v719_v30  ;;  %v760_v8 = vadd.f32 %v759_v20, %v757_v15  ;;  %v798_v44 = vmul.f32 %v797_v43, %v793_v31  ;;  %v800_v9 = vmul.f32 %v799_v3, %v794_v32  ;;  %s2851_s16 = sld [smem:[#allocation7 + $0x17]]  ;;  %v969_v30 = vld [vmem:[#allocation2] sm:$0x3f]  ;;  %v970_v15 = vld [vmem:[#allocation2 + $0x8] sm:$0x3f] }
 0x3ad   :  { %689 = vrot.lane.b32.xlu1 %v687_v51, %s3301_s26  ;;  %v873_v33 = vmul.f32 %v871_v59, %v866_v35  ;;  %v890_v27 = vadd.f32 %v889_v17, %v887_v2  ;;  %v926_v46 = vmul.f32 %v925_v39, %v2751_v37  ;;  %v928_v1 = vmul.f32 %v927_v42, %v2758_v41  ;;  %v993_v39 = vld [vmem:[#allocation2] sm:$0x3f]  ;;  %v994_v42 = vld [vmem:[#allocation2 + $0x8] sm:$0x3f]  ;;  %s2318_s26 = smov 108  }
 0x3ae   :  { %851 = vrot.lane.b32.xlu0 %v849_v12, %s2315_s7  ;;  %v895_v52 = vsel %vm894_vm15, %v893_v38, %v2714_v21  ;;  %v932_v43 = vrot.slane %v2784_v6, 6  ;;  %v949_v53 = vstv %s2730_s28  ;;  %v951_v57 = vstv %s2734_s29  ;;  %s2865_s28 = sld [smem:[#allocation7 + $0x4a]]  ;;  %v2873_v20 = vpop.permute.xlu0 %1200  ;;  %s2317_s7 = smov 123  }
 0x3af   :  { %v784_v37 = vmul.f32 %v782_v54, %v760_v8  ;;  %v801_v41 = vadd.f32 %v800_v9, %v798_v44  ;;  %v823_v21 = vsel %vm822_vm14, %v821_v56, %v2728_v24  ;;  %v897_v62 = vmul.f32 %v895_v52, %v890_v27  ;;  %v2871_v24 = vpop.permute.xlu1 %1083  ;;  %s2875_s29 = sld [smem:[#allocation7 + $0x1a]]  ;;  %v1017_v52 = vld [vmem:[#allocation2 + $0x8] sm:$0x3f] }
 0x3b0   :  { %v929_v13 = vadd.f32 %v928_v1, %v926_v46  ;;  %v950_v40 = vmul.f32 %v949_v53, %v945_v29  ;;  %v952_v0 = vmul.f32 %v951_v57, %v946_v58  ;;  %v934_v47 = vsel %vm933_vm0, %v932_v43, %v2784_v6  ;;  %v1016_v1 = vld [vmem:[#allocation2] sm:$0x3f] }
 0x3b1   :  { %745 = vrot.lane.b32.xlu1 %v743_v4, %s2316_s9  ;;  %v956_v60 = vrot.slane %v2732_v25, 6  ;;  %v973_v3 = vstv %s2736_s14  ;;  %v975_v51 = vstv %s2738_s4  ;;  %v825_v6 = vmul.f32 %v823_v21, %v801_v41  ;;  %s2878_s14 = sld [smem:[#allocation7 + $0x4b]]  ;;  %s2320_s9 = smov 107   ;;  %v1039_v41 = vld [vmem:[#allocation2 + $0x8] sm:$0x3f] }
 0x3b2   :  { %875 = vrot.lane.b32.xlu0 %v873_v33, %s3302_s30  ;;  %v936_v31 = vmul.f32 %v934_v47, %v929_v13  ;;  %v953_v32 = vadd.f32 %v952_v0, %v950_v40  ;;  %v974_v12 = vmul.f32 %v973_v3, %v969_v30  ;;  %v976_v35 = vmul.f32 %v975_v51, %v970_v15  ;;  %s2884_s4 = sld [smem:[#allocation7 + $0x1b]]  ;;  %s2319_s30 = smov 122   ;;  %v2888_v44 = vpop.permute.xlu0 %1261  ;;  %v1060_v0 = vld [vmem:[#allocation2] sm:$0x3f]  ;;  %v2909_v47 = vld [vmem:[#allocation2 + $0x8] sm:$0x3f] }
 0x3b3   :  { %v958_v2 = vsel %vm957_vm5, %v956_v60, %v2732_v25  ;;  %v980_v17 = vrot.slane %v2818_v5, 6  ;;  %v997_v59 = vstv %s2742_s5  ;;  %v999_v38 = vstv %s2746_s18  ;;  %v2886_v25 = vpop.permute.xlu1 %1131  ;;  %s2890_s5 = sld [smem:[#allocation7 + $0x4c]] }
 0x3b4   :  { %v960_v54 = vmul.f32 %v958_v2, %v953_v32  ;;  %v977_v56 = vadd.f32 %v976_v35, %v974_v12  ;;  %v998_v4 = vmul.f32 %v997_v59, %v993_v39  ;;  %v1000_v8 = vmul.f32 %v999_v38, %v994_v42  ;;  %s2896_s18 = sld [smem:[#allocation7 + $0x1c]]  ;;  %v1122_v35 = vld [vmem:[#allocation2] sm:$0x3f]  ;;  %v1123_v2 = vld [vmem:[#allocation2 + $0x8] sm:$0x3f] }
 0x3b5   :  { %786 = vrot.lane.b32.xlu1 %v784_v37, %s2317_s7  ;;  %v982_v9 = vsel %vm981_vm6, %v980_v17, %v2818_v5  ;;  %v1004_v33 = vrot.slane %v2753_v16, 6  ;;  %v1020_v27 = vstv %s2755_s19  ;;  %v1022_v46 = vstv %s2760_s22  ;;  %v1038_v37 = vld [vmem:[#allocation2] sm:$0x3f]  ;;  %s2902_s19 = sld [smem:[#allocation7 + $0x4d]] }
 0x3b6   :  { %899 = vrot.lane.b32.xlu0 %v897_v62, %s3303_s10  ;;  %s2321_s10 = smov 46   ;;  %v1042_v43 = vstv %s2767_s24  ;;  %v1044_v53 = vstv %s2773_s0  ;;  %v984_v5 = vmul.f32 %v982_v9, %v977_v56  ;;  %v1001_v57 = vadd.f32 %v1000_v8, %v998_v4  ;;  %v2913_v60 = vpop.permute.xlu0 %1307  ;;  %s2915_s22 = sld [smem:[#allocation7 + $0x1d]] }
 0x3b7   :  { %v1021_v29 = vmul.f32 %v1020_v27, %v1016_v1  ;;  %v1023_v58 = vmul.f32 %v1022_v46, %v1017_v52  ;;  %v1005_v21 = vsel %vm919_vm7, %v1004_v33, %v2753_v16  ;;  %v1027_v62 = vrot.slane %v2847_v48, 6  ;;  %s2322_s24 = smov 106   ;;  %s2323_s0 = smov 47   ;;  %v1098_v27 = vld [vmem:[#allocation2] sm:$0x3f] }
 0x3b8   :  { %v1078_v13 = vstv %s2788_s6  ;;  %v1080_v40 = vstv %s2796_s20  ;;  %vm902_vm10 = vcmask 900096   ;;  %v1043_v16 = vmul.f32 %v1042_v43, %v1038_v37  ;;  %s2920_s6 = sld [smem:[#allocation7 + $0x4e]]  ;;  %v1099_v46 = vld [vmem:[#allocation2 + $0x8] sm:$0x3f] }
 0x3b9   :  { %827 = vrot.lane.b32.xlu1 %v825_v6, %s2319_s30  ;;  %v1045_v3 = vmul.f32 %v1044_v53, %v1039_v41  ;;  %v1007_v51 = vmul.f32 %v1005_v21, %v1001_v57  ;;  %v1024_v30 = vadd.f32 %v1023_v58, %v1021_v29  ;;  %v1079_v15 = vmul.f32 %v1078_v13, %v1060_v0  ;;  %s2926_s20 = sld [smem:[#allocation7 + $0x1e]]  ;;  %s2325_s30 = smov 96   ;;  %v1169_v53 = vld [vmem:[#allocation2] sm:$0x3f] }
 0x3ba   :  { %938 = vrot.lane.b32.xlu0 %v936_v31, %s2318_s26  ;;  %v1081_v6 = vmul.f32 %v1080_v40, %v2909_v47  ;;  %v1028_v31 = vsel %vm902_vm10, %v1027_v62, %v2847_v48  ;;  %v1049_v32 = vrot.slane %v2786_v22, 6  ;;  %v1085_v12 = vrot.slane %v2871_v24, 6  ;;  %s2928_s7 = sld [smem:[#allocation7 + $0x4f]]  ;;  %s2324_s26 = smov 50  }
 0x3bb   :  { %vm878_vm11 = vcmask 908288   ;;  %vm1086_vm14 = vcmask 924672   ;;  %vm1110_vm0 = vcmask 932864   ;;  %v1128_v48 = vstv %s2826_s3  ;;  %s2326_s3 = smov 51  }
 0x3bc   :  { %vm1134_vm5 = vcmask 941056   ;;  %v1030_v17 = vmul.f32 %v1028_v31, %v1024_v30  ;;  %v1046_v59 = vadd.f32 %v1045_v3, %v1043_v16  ;;  %v1064_v38 = vstv %s2778_s25  ;;  %s2950_s25 = sld [smem:[#allocation7 + $0x1f]]  ;;  %v1147_v30 = vld [vmem:[#allocation2 + $0x8] sm:$0x3f] }
 0x3bd   :  { %1647 = vrot.lane.b32.xlu1 %v2557_v50, %s2321_s10  ;;  %v2911_v50 = vpop.permute.xlu1 %1178  ;;  %v1082_v39 = vadd.f32 %v1081_v6, %v1079_v15  ;;  %v1066_v56 = vstv %s2782_s27  ;;  %v1087_v4 = vsel %vm1086_vm14, %v1085_v12, %v2871_v24  ;;  %v1133_v8 = vrot.slane %v2886_v25, 6  ;;  %s3304_s27 = smov 95  }
 0x3be   :  { %962 = vrot.lane.b32.xlu0 %v960_v54, %s2320_s9  ;;  %v2936_v54 = vpop.permute.xlu0 %1355  ;;  %s2938_s9 = sld [smem:[#allocation7 + $0x18]]  ;;  %v1102_v9 = vstv %s2803_s11  ;;  %v1104_v33 = vstv %s2805_s12  ;;  %v1129_v52 = vmul.f32 %v1128_v48, %v1123_v2  ;;  %vm709_vm6 = vcmask 1022976  }
 0x3bf   :  { %vm692_vm14 = vcmask 1031168   ;;  %v1173_v24 = vstv %s2840_s23  ;;  %v1175_v43 = vstv %s2843_s15  ;;  %v1067_v29 = vmul.f32 %v1066_v56, %v2909_v47  ;;  %s2959_s11 = sld [smem:[#allocation7 + $0x50]]  ;;  %s2327_s15 = smov 92   ;;  %v1191_v56 = vld [vmem:[#allocation2] sm:$0x3f] }
 0x3c0   :  { %v1089_v58 = vmul.f32 %v1087_v4, %v1082_v39  ;;  %v1109_v37 = vrot.slane %v2820_v14, 6  ;;  %v1103_v41 = vmul.f32 %v1102_v9, %v1098_v27  ;;  %v1135_v21 = vsel %vm1134_vm5, %v1133_v8, %v2886_v25  ;;  %s2964_s12 = sld [smem:[#allocation7 + $0x20]]  ;;  %v1192_v4 = vld [vmem:[#allocation2 + $0x8] sm:$0x3f] }
 0x3c1   :  { %1669 = vrot.lane.b32.xlu1 %v2564_v55, %s2323_s0  ;;  %v1126_v55 = vstv %s2822_s13  ;;  %v2934_v42 = vpop.permute.xlu1 %1238  ;;  %s2946_s13 = sld [smem:[#allocation7 + $0x49]]  ;;  %v1180_v62 = vrot.slane %v2911_v50, 6  ;;  %v1174_v40 = vmul.f32 %v1173_v24, %v1169_v53  ;;  %v1150_v25 = vstv %s2828_s2 }
 0x3c2   :  { %986 = vrot.lane.b32.xlu0 %v984_v5, %s2322_s24  ;;  %v1127_v1 = vmul.f32 %v1126_v55, %v1122_v35  ;;  %v1170_v5 = vld [vmem:[#allocation2 + $0x8] sm:$0x3f]  ;;  %s2968_s23 = sld [smem:[#allocation7 + $0x51]]  ;;  %v2970_v16 = vpop.permute.xlu0 %1394  ;;  %s3305_s24 = smov 94   ;;  %v1152_v3 = vstv %s2835_s21  ;;  %v1195_v15 = vstv %s2851_s16  ;;  %v1197_v6 = vstv %s2858_s1 }
 0x3c3   :  { %v1111_v31 = vsel %vm1110_vm0, %v1109_v37, %v2820_v14  ;;  %v1157_v35 = vrot.slane %v2849_v49, 6  ;;  %v1181_v2 = vsel %vm692_vm14, %v1180_v62, %v2911_v50  ;;  %v1153_v14 = vmul.f32 %v1152_v3, %v1147_v30  ;;  %s2987_s2 = sld [smem:[#allocation7 + $0x57]]  ;;  %s2328_s21 = smov 90   ;;  %v1229_v37 = vld [vmem:[#allocation2 + $0x2] sm:$0x3f] }
 0x3c4   :  { %v1130_v13 = vadd.f32 %v1129_v52, %v1127_v1  ;;  %v1217_v55 = vstv %s2938_s9  ;;  %v1233_v8 = vstv %s2863_s17  ;;  %vm1310_vm0 = vcmask 105472   ;;  %s3306_s16 = smov 93   ;;  %v1253_v1 = vld [vmem:[#allocation2 + $0xa] sm:$0x3f]  ;;  %s2996_s1 = sld [smem:[#allocation7 + $0x27]] }
 0x3c5   :  { %1009 = vrot.lane.b32.xlu1 %v1007_v51, %s2325_s30  ;;  %v2966_v47 = vpop.permute.xlu1 %1284  ;;  %v1146_v51 = vld [vmem:[#allocation2] sm:$0x3f]  ;;  %v1235_v9 = vstv %s2865_s28  ;;  %v1258_v27 = vstv %s2878_s14  ;;  %s3003_s17 = sld [smem:[#allocation7 + $0x58]]  ;;  %vm1358_vm5 = vcmask 121856   ;;  %s2329_s14 = smov 91   ;;  %v1304_v3 = vstv %s2902_s19 }
 0x3c6   :  { %1729 = vrot.lane.b32.xlu0 %v2574_v61, %s2324_s26  ;;  %v1050_v61 = vsel %vm878_vm11, %v1049_v32, %v2786_v22  ;;  %v1065_v22 = vmul.f32 %v1064_v38, %v1060_v0  ;;  %v1176_v0 = vmul.f32 %v1175_v43, %v1170_v5  ;;  %v1137_v32 = vmul.f32 %v1135_v21, %v1130_v13  ;;  %s2979_s26 = sld [smem:[#allocation7 + $0x26]]  ;;  %v2998_v43 = vpop.permute.xlu0 %1418  ;;  %v1230_v21 = vld [vmem:[#allocation2 + $0xa] sm:$0x3f]  ;;  %s2330_s19 = smov 80  }
 0x3c7   :  { %v1052_v57 = vmul.f32 %v1050_v61, %v1046_v59  ;;  %v1214_v59 = vld [vmem:[#allocation2 + $0xa] sm:$0xf]  ;;  %v1219_v38 = vstv %s2946_s13  ;;  %v1151_v39 = vmul.f32 %v1150_v25, %v1146_v51  ;;  %v1259_v13 = vmul.f32 %v1258_v27, %v1253_v1  ;;  %s3006_s28 = sld [smem:[#allocation7 + $0x21]]  ;;  %v1298_v51 = vld [vmem:[#allocation2 + $0x2] sm:$0x3f]  ;;  %s2331_s9 = smov 75  }
 0x3c8   :  { %v1068_v12 = vadd.f32 %v1067_v29, %v1065_v22  ;;  %v1177_v61 = vadd.f32 %v1176_v0, %v1174_v40  ;;  %v1202_v22 = vrot.slane %v2873_v20, 6  ;;  %v1220_v5 = vmul.f32 %v1219_v38, %v1214_v59  ;;  %v1299_v30 = vld [vmem:[#allocation2 + $0xa] sm:$0x3f]  ;;  %s3032_s30 = sld [smem:[#allocation7 + $0x52]]  ;;  %s3309_s13 = smov 78  }
 0x3c9   :  { %1032 = vrot.lane.b32.xlu1 %v1030_v17, %s3304_s27  ;;  %v1213_v17 = vld [vmem:[#allocation2 + $0x2] sm:$0xf]  ;;  %v2994_v24 = vpop.permute.xlu1 %1331  ;;  %v1196_v29 = vmul.f32 %v1195_v15, %v1191_v56  ;;  %v1279_v40 = vstv %s2884_s4  ;;  %v1281_v0 = vstv %s2890_s5  ;;  %v1302_v25 = vstv %s2896_s18  ;;  %s3015_s4 = sld [smem:[#allocation7 + $0x22]]  ;;  %s3308_s18 = smov 77  }
 0x3ca   :  { %1753 = vrot.lane.b32.xlu0 %v2577_v63, %s2326_s3  ;;  %v1105_v63 = vmul.f32 %v1104_v33, %v1099_v46  ;;  %v1256_v33 = vstv %s2875_s29  ;;  %v1252_v46 = vld [vmem:[#allocation2 + $0x2] sm:$0x3f]  ;;  %v1183_v52 = vmul.f32 %v1181_v2, %v1177_v61  ;;  %v1218_v53 = vmul.f32 %v1217_v55, %v1213_v17  ;;  %s3307_s29 = smov 79   ;;  %v1276_v2 = vld [vmem:[#allocation2 + $0xa] sm:$0x3f]  ;;  %s3022_s5 = sld [smem:[#allocation7 + $0x53]] }
 0x3cb   :  { %v1257_v62 = vmul.f32 %v1256_v33, %v1252_v46  ;;  %v1236_v55 = vmul.f32 %v1235_v9, %v1230_v21  ;;  %v1309_v17 = vrot.slane %v2913_v60, 6  ;;  %vm1334_vm8 = vcmask 113664   ;;  %v1370_v21 = vld [vmem:[#allocation2 + $0x2] sm:$0x3f]  ;;  %s3060_s27 = sld [smem:[#allocation7 + $0x54]] }
 0x3cc   :  { %v1106_v48 = vadd.f32 %v1105_v63, %v1103_v41  ;;  %v1263_v41 = vrot.slane %v2888_v44, 6  ;;  %v1154_v63 = vadd.f32 %v1153_v14, %v1151_v39  ;;  %v1303_v38 = vmul.f32 %v1302_v25, %v1298_v51  ;;  %v3024_v14 = vpop.permute.xlu0 %1442 }
 0x3cd   :  { %1054 = vrot.lane.b32.xlu1 %v1052_v57, %s3305_s24  ;;  %v1158_v57 = vsel %vm709_vm6, %v1157_v35, %v2849_v49  ;;  %v1240_v49 = vrot.slane %v2934_v42, 6  ;;  %v1275_v35 = vld [vmem:[#allocation2 + $0x2] sm:$0x3f]  ;;  %v1260_v59 = vadd.f32 %v1259_v13, %v1257_v62  ;;  %v1305_v39 = vmul.f32 %v1304_v3, %v1299_v30  ;;  %v1371_v62 = vld [vmem:[#allocation2 + $0xa] sm:$0x3f]  ;;  %s2334_s24 = smov 62  }
 0x3ce   :  { %1091 = vrot.lane.b32.xlu0 %v1089_v58, %s2327_s15  ;;  %v1113_v50 = vmul.f32 %v1111_v31, %v1106_v48  ;;  %v1198_v58 = vmul.f32 %v1197_v6, %v1192_v4  ;;  %v1160_v15 = vmul.f32 %v1158_v57, %v1154_v63  ;;  %v1203_v6 = vsel %vm651_vm4, %v1202_v22, %v2873_v20  ;;  %v3020_v20 = vpop.permute.xlu1 %606  ;;  %v1322_v57 = vld [vmem:[#allocation2 + $0x2] sm:$0x3f]  ;;  %s3068_s15 = sld [smem:[#allocation7 + $0x59]] }
 0x3cf   :  { %v1234_v31 = vmul.f32 %v1233_v8, %v1229_v37  ;;  %v1264_v48 = vsel %vm149_vm2, %v1263_v41, %v2888_v44  ;;  %vm1397_vm9 = vcmask 138240   ;;  %v1241_v61 = vsel %vm144_vm1, %v1240_v49, %v2934_v42  ;;  %v1346_v8 = vld [vmem:[#allocation2 + $0x2] sm:$0x3f] }
 0x3d0   :  { %v1350_v56 = vstv %s2926_s20  ;;  %v1352_v4 = vstv %s2928_s7  ;;  %v1266_v9 = vmul.f32 %v1264_v48, %v1260_v59  ;;  %v1280_v33 = vmul.f32 %v1279_v40, %v1275_v35  ;;  %s3038_s20 = sld [smem:[#allocation7 + $0x24]]  ;;  %v3053_v3 = vpop.permute.xlu0 %1466  ;;  %v1433_v48 = vld [vmem:[#allocation2 + $0x2] sm:$0x3f]  ;;  %v1434_v35 = vld [vmem:[#allocation2 + $0xa] sm:$0x3f] }
 0x3d1   :  { %1070 = vrot.lane.b32.xlu1 %v1068_v12, %s3306_s16  ;;  %v1199_v12 = vadd.f32 %v1198_v58, %v1196_v29  ;;  %v1282_v27 = vmul.f32 %v1281_v0, %v1276_v2  ;;  %v1286_v46 = vrot.slane %v2966_v47, 6  ;;  %v1237_v1 = vadd.f32 %v1236_v55, %v1234_v31  ;;  %v1323_v29 = vld [vmem:[#allocation2 + $0xa] sm:$0x3f]  ;;  %s3041_s7 = sld [smem:[#allocation7 + $0x55]] }
 0x3d2   :  { %1139 = vrot.lane.b32.xlu0 %v1137_v32, %s2328_s21  ;;  %v1221_v32 = vadd.f32 %v1220_v5, %v1218_v53  ;;  %v1326_v22 = vstv %s2915_s22  ;;  %v1357_v42 = vrot.slane %v2936_v54, 6  ;;  %v1306_v53 = vadd.f32 %v1305_v39, %v1303_v38  ;;  %v3049_v25 = vpop.permute.xlu1 %1553  ;;  %s3051_s22 = sld [smem:[#allocation7 + $0x28]]  ;;  %s2335_s21 = smov 74  }
 0x3d3   :  { %v1205_v44 = vmul.f32 %v1203_v6, %v1199_v12  ;;  %v1328_v5 = vstv %s2920_s6  ;;  %v1351_v58 = vmul.f32 %v1350_v56, %v1346_v8  ;;  %v1243_v41 = vmul.f32 %v1241_v61, %v1237_v1  ;;  %s3058_s6 = sld [smem:[#allocation7 + $0x23]]  ;;  %v1409_v56 = vld [vmem:[#allocation2 + $0x2] sm:$0x3f] }
 0x3d4   :  { %v1391_v63 = vstv %s2968_s23  ;;  %v1283_v13 = vadd.f32 %v1282_v27, %v1280_v33  ;;  %v1287_v40 = vsel %vm154_vm3, %v1286_v46, %v2966_v47  ;;  %v1333_v0 = vrot.slane %v2994_v24, 6  ;;  %s2333_s23 = smov 76   ;;  %v1491_v46 = vpop.permute.xlu0 %1490  ;;  %s3086_s16 = sld [smem:[#allocation7 + $0x2a]] }
 0x3d5   :  { %1115 = vrot.lane.b32.xlu1 %v1113_v50, %s2329_s14  ;;  %v1347_v50 = vld [vmem:[#allocation2 + $0xa] sm:$0x3f]  ;;  %v1327_v51 = vmul.f32 %v1326_v22, %v1322_v57  ;;  %v1329_v30 = vmul.f32 %v1328_v5, %v1323_v29  ;;  %v1396_v6 = vrot.slane %v2970_v16, 6  ;;  %vm1421_vm1 = vcmask 146432   ;;  %v1481_v22 = vld [vmem:[#allocation2 + $0x2] sm:$0x3f] }
 0x3d6   :  { %1185 = vrot.lane.b32.xlu0 %v1183_v52, %s3307_s29  ;;  %v1311_v52 = vsel %vm1310_vm0, %v1309_v17, %v2913_v60  ;;  %v1353_v37 = vmul.f32 %v1352_v4, %v1347_v50  ;;  %v1389_v60 = vstv %s2964_s12  ;;  %vm1445_vm2 = vcmask 154624   ;;  %s2332_s12 = smov 64   ;;  %s2336_s29 = smov 60  }
 0x3d7   :  { %v1313_v49 = vmul.f32 %v1311_v52, %v1306_v53  ;;  %v1390_v31 = vmul.f32 %v1389_v60, %v1370_v21  ;;  %v1374_v12 = vstv %s2950_s25  ;;  %v1437_v55 = vstv %s3015_s4  ;;  %s3074_s25 = sld [smem:[#allocation7 + $0x25]]  ;;  %s2337_s14 = smov 63  }
 0x3d8   :  { %v1354_v47 = vadd.f32 %v1353_v37, %v1351_v58  ;;  %v1289_v2 = vmul.f32 %v1287_v40, %v1283_v13  ;;  %v1335_v17 = vsel %vm1334_vm8, %v1333_v0, %v2994_v24  ;;  %v1376_v38 = vstv %s2959_s11  ;;  %v3077_v24 = vpop.permute.xlu1 %1577  ;;  %s3079_s11 = sld [smem:[#allocation7 + $0x56]]  ;;  %v1457_v0 = vld [vmem:[#allocation2 + $0x2] sm:$0x3f] }
 0x3d9   :  { %1162 = vrot.lane.b32.xlu1 %v1160_v15, %s2330_s19  ;;  %v1359_v15 = vsel %vm1358_vm5, %v1357_v42, %v2936_v54  ;;  %v1439_v54 = vstv %s3022_s5  ;;  %v1330_v39 = vadd.f32 %v1329_v30, %v1327_v51  ;;  %v1413_v61 = vstv %s3006_s28  ;;  %v1482_v42 = vld [vmem:[#allocation2 + $0xa] sm:$0x3f]  ;;  %s3088_s28 = sld [smem:[#allocation7 + $0x5b]]  ;;  %s2341_s5 = smov 48  }
 0x3da   :  { %1223 = vrot.lane.b32.xlu0 %v1221_v32, %s3308_s18  ;;  %v1392_v32 = vmul.f32 %v1391_v63, %v1371_v62  ;;  %v1361_v59 = vmul.f32 %v1359_v15, %v1354_v47  ;;  %v1444_v4 = vrot.slane %v3024_v14, 6  ;;  %v1415_v50 = vstv %s3032_s30  ;;  %v1458_v51 = vld [vmem:[#allocation2 + $0xa] sm:$0x3f]  ;;  %v1529_v15 = vld [vmem:[#allocation2 + $0x2] sm:$0x3f]  ;;  %s3096_s4 = sld [smem:[#allocation7 + $0x29]] }
 0x3db   :  { %v1438_v33 = vmul.f32 %v1437_v55, %v1433_v48  ;;  %v1440_v27 = vmul.f32 %v1439_v54, %v1434_v35  ;;  %vm1469_vm3 = vcmask 236544   ;;  %v1485_v1 = vstv %s3038_s20  ;;  %v1568_v48 = vld [vmem:[#allocation2 + $0x2] sm:$0x3f]  ;;  %s2342_s18 = smov 43   ;;  %s2343_s19 = smov 32  }
 0x3dc   :  { %v1393_v8 = vadd.f32 %v1392_v32, %v1390_v31  ;;  %v1487_v52 = vstv %s3041_s7  ;;  %v1375_v53 = vmul.f32 %v1374_v12, %v1370_v21  ;;  %v1377_v5 = vmul.f32 %v1376_v38, %v1371_v62  ;;  %v3098_v31 = vpop.permute.xlu1 %1601  ;;  %v1530_v12 = vld [vmem:[#allocation2 + $0xa] sm:$0x3f]  ;;  %s2344_s30 = smov 44   ;;  %s2345_s20 = smov 42  }
 0x3dd   :  { %1207 = vrot.lane.b32.xlu1 %v1205_v44, %s3309_s13  ;;  %v1398_v44 = vsel %vm1397_vm9, %v1396_v6, %v2970_v16  ;;  %v1337_v16 = vmul.f32 %v1335_v17, %v1330_v39  ;;  %v1414_v29 = vmul.f32 %v1413_v61, %v1409_v56  ;;  %v1420_v37 = vrot.slane %v2998_v43, 6  ;;  %v1515_v61 = vpop.permute.xlu0 %1514  ;;  %s582_s7 = sld [smem:[#allocation7]] }
 0x3de   :  { %1268 = vrot.lane.b32.xlu0 %v1266_v9, %s2331_s9  ;;  %v1410_v9 = vld [vmem:[#allocation2 + $0xa] sm:$0x3f]  ;;  %v1400_v57 = vmul.f32 %v1398_v44, %v1393_v8  ;;  %v1492_v60 = vrot.slane %v1491_v46, 6  ;;  %vm1580_vm8 = vcmask 277504   ;;  %v1441_v63 = vadd.f32 %v1440_v27, %v1438_v33  ;;  %s1956_s9 = sld [smem:[#allocation7 + $0x31]] }
 0x3df   :  { %v1416_v58 = vmul.f32 %v1415_v50, %v1410_v9  ;;  %vm1493_vm9 = vcmask 244736   ;;  %v1486_v21 = vmul.f32 %v1485_v1, %v1481_v22  ;;  %v1488_v62 = vmul.f32 %v1487_v52, %v1482_v42  ;;  %v1505_v50 = vld [vmem:[#allocation2 + $0x2] sm:$0x3f]  ;;  %v1506_v9 = vld [vmem:[#allocation2 + $0xa] sm:$0x3f]  ;;  %s3134_s13 = sld [smem:[#allocation7 + $0x5e]] }
 0x3e0   :  { %v1533_v13 = vstv %s2979_s26  ;;  %v1535_v40 = vstv %s2987_s2  ;;  %v1548_v30 = vstv %s2996_s1  ;;  %v1572_v6 = vstv %s3051_s22  ;;  %s3105_s26 = sld [smem:[#allocation7 + $0x5a]]  ;;  %s2338_s2 = smov 58  }
 0x3e1   :  { %1245 = vrot.lane.b32.xlu1 %v1243_v41, %s2333_s23  ;;  %v1446_v41 = vsel %vm1445_vm2, %v1444_v4, %v3024_v14  ;;  %v1461_v14 = vstv %s3058_s6  ;;  %v1378_v32 = vadd.f32 %v1377_v5, %v1375_v53  ;;  %v1417_v55 = vadd.f32 %v1416_v58, %v1414_v29  ;;  %s2339_s1 = smov 61   ;;  %v1626_v5 = vpop.permute.xlu1 %1625  ;;  %s3136_s22 = sld [smem:[#allocation7 + $0x2e]] }
 0x3e2   :  { %1315 = vrot.lane.b32.xlu0 %v1313_v49, %s2332_s12  ;;  %v1463_v49 = vstv %s3060_s27  ;;  %v1448_v47 = vmul.f32 %v1446_v41, %v1441_v63  ;;  %v1422_v54 = vsel %vm1421_vm1, %v1420_v37, %v2998_v43  ;;  %v1468_v35 = vrot.slane %v3053_v3, 6  ;;  %v1617_v63 = vld [vmem:[#allocation2 + $0xa] sm:$0x3f]  ;;  %s3142_s6 = sld [smem:[#allocation7 + $0x5f]] }
 0x3e3   :  { %v1574_v17 = vstv %s3068_s15  ;;  %v1462_v38 = vmul.f32 %v1461_v14, %v1457_v0  ;;  %v1464_v39 = vmul.f32 %v1463_v49, %v1458_v51  ;;  %v1489_v44 = vadd.f32 %v1488_v62, %v1486_v21  ;;  %s3144_s27 = sld [smem:[#allocation7 + $0x2b]] }
 0x3e4   :  { %v1550_v43 = vstv %s3003_s17  ;;  %v1534_v56 = vmul.f32 %v1533_v13, %v1529_v15  ;;  %v1509_v4 = vstv %s3074_s25  ;;  %v1511_v8 = vstv %s3079_s11  ;;  %s2340_s17 = smov 59   ;;  %s3147_s12 = sld [smem:[#allocation7 + $0x5c]] }
 0x3e5   :  { %1291 = vrot.lane.b32.xlu1 %v1289_v2, %s2335_s21  ;;  %v1494_v2 = vsel %vm1493_vm9, %v1492_v60, %v1491_v46  ;;  %v1536_v33 = vmul.f32 %v1535_v40, %v1530_v12  ;;  %v1424_v27 = vmul.f32 %v1422_v54, %v1417_v55  ;;  %v1573_v46 = vmul.f32 %v1572_v6, %v1568_v48  ;;  %v1616_v60 = vld [vmem:[#allocation2 + $0x2] sm:$0x3f]  ;;  %s3151_s23 = sld [smem:[#allocation7 + $0x2c]] }
 0x3e6   :  { %1363 = vrot.lane.b32.xlu0 %v1361_v59, %s2334_s24  ;;  %v1569_v59 = vld [vmem:[#allocation2 + $0xa] sm:$0x3f]  ;;  %v1579_v52 = vrot.slane %v3077_v24, 6  ;;  %v1470_v22 = vsel %vm1469_vm3, %v1468_v35, %v3053_v3  ;;  %v1516_v42 = vrot.slane %v1515_v61, 6  ;;  %v1465_v53 = vadd.f32 %v1464_v39, %v1462_v38  ;;  %s3153_s15 = sld [smem:[#allocation7 + $0x5d]] }
 0x3e7   :  { %v1575_v1 = vmul.f32 %v1574_v17, %v1569_v59  ;;  %vm1517_vm0 = vcmask 252928   ;;  %v1512_v29 = vmul.f32 %v1511_v8, %v1506_v9  ;;  %vm1556_vm5 = vcmask 269312   ;;  %v580_v8 = vld [vmem:[#allocation2] sm:$0x3f]  ;;  %s3155_s25 = sld [smem:[#allocation7 + $0x2f]] }
 0x3e8   :  { %v1549_v58 = vmul.f32 %v1548_v30, %v1529_v15  ;;  %v1620_v37 = vstv %s3086_s16  ;;  %v1622_v41 = vstv %s3088_s28  ;;  %v1551_v21 = vmul.f32 %v1550_v43, %v1530_v12  ;;  %v1593_v12 = vld [vmem:[#allocation2 + $0xa] sm:$0x3f]  ;;  %s3158_s11 = sld [smem:[#allocation7 + $0x60]]  ;;  %s3311_s16 = smov 31  }
 0x3e9   :  { %1339 = vrot.lane.b32.xlu1 %v1337_v16, %s2337_s14  ;;  %v1496_v16 = vmul.f32 %v1494_v2, %v1489_v44  ;;  %v1555_v3 = vrot.slane %v3049_v25, 6  ;;  %v1472_v62 = vmul.f32 %v1470_v22, %v1465_v53  ;;  %v1537_v13 = vadd.f32 %v1536_v33, %v1534_v56  ;;  %s3162_s24 = sld [smem:[#allocation7 + $0x30]]  ;;  %s3312_s28 = smov 29  }
 0x3ea   :  { %1402 = vrot.lane.b32.xlu0 %v1400_v57, %s2336_s29  ;;  %v1510_v57 = vmul.f32 %v1509_v4, %v1505_v50  ;;  %v1576_v40 = vadd.f32 %v1575_v1, %v1573_v46  ;;  %v1581_v14 = vsel %vm1580_vm8, %v1579_v52, %v3077_v24  ;;  %v1627_v49 = vrot.slane %v1626_v5, 6  ;;  %v581_v50 = vld [vmem:[#allocation2 + $0x8] sm:$0x3f]  ;;  %s3165_s21 = sld [smem:[#allocation7 + $0x61]]  ;;  %s3313_s29 = smov 30  }
 0x3eb   :  { %v1518_v0 = vsel %vm1517_vm0, %v1516_v42, %v1515_v61  ;;  %vm1542_vm1 = vcmask 367616   ;;  %v1621_v51 = vmul.f32 %v1620_v37, %v1616_v60  ;;  %v1623_v30 = vmul.f32 %v1622_v41, %v1617_v63  ;;  %s2346_s14 = smov 27  }
 0x3ec   :  { %v1513_v15 = vadd.f32 %v1512_v29, %v1510_v57  ;;  %v1596_v6 = vstv %s3096_s4  ;;  %v1583_v55 = vmul.f32 %v1581_v14, %v1576_v40  ;;  %v1552_v48 = vadd.f32 %v1551_v21, %v1549_v58  ;;  %s2347_s4 = smov 28  }
 0x3ed   :  { %1380 = vrot.lane.b32.xlu1 %v1378_v32, %s2339_s1  ;;  %v1592_v32 = vld [vmem:[#allocation2 + $0x2] sm:$0x3f]  ;;  %v1557_v24 = vsel %vm1556_vm5, %v1555_v3, %v3049_v25  ;;  %v1603_v35 = vrot.slane %v3098_v31, 6  ;;  %v1628_v2 = vsel %vm1542_vm1, %v1627_v49, %v1626_v5  ;;  %vm1604_vm2 = vcmask 285696   ;;  %s1955_s1 = sld [smem:[#allocation8 + $0x1]] }
 0x3ee   :  { %1450 = vrot.lane.b32.xlu0 %v1448_v47, %s2338_s2  ;;  %v1598_v47 = vstv %s3105_s26  ;;  %v1520_v54 = vmul.f32 %v1518_v0, %v1513_v15  ;;  %v1597_v17 = vmul.f32 %v1596_v6, %v1592_v32  ;;  %v1624_v38 = vadd.f32 %v1623_v30, %v1621_v51  ;;  %s2348_s26 = smov 26   ;;  %s578_s2 = sld [smem:[#allocation8]] }
 0x3ef   :  { %v1599_v59 = vmul.f32 %v1598_v47, %v1593_v12  ;;  %v1559_v39 = vmul.f32 %v1557_v24, %v1552_v48  ;;  %v1605_v61 = vsel %vm1604_vm2, %v1603_v35, %v3098_v31  ;;  %v584_v56 = vstv %s582_s7  ;;  %v1638_v12 = vld [vmem:[#allocation2 + $0x2] sm:$0x3f] }
 0x3f0   :  { %v1630_v44 = vmul.f32 %v1628_v2, %v1624_v38  ;;  %v586_v4 = vstv %s1956_s9  ;;  %vm609_vm8 = vcmask 629760   ;;  %v585_v31 = vmul.f32 %v584_v56, %v580_v8  ;;  %v1682_v35 = vld [vmem:[#allocation2 + $0x2] sm:$0x3f]  ;;  %v1683_v2 = vld [vmem:[#allocation2 + $0xa] sm:$0x3f] }
 0x3f1   :  { %1426 = vrot.lane.b32.xlu1 %v1424_v27, %s2340_s17  ;;  %v1600_v43 = vadd.f32 %v1599_v59, %v1597_v17  ;;  %v608_v27 = vrot.slane %v3020_v20, 6  ;;  %v587_v46 = vmul.f32 %v586_v4, %v581_v50  ;;  %v1688_v30 = vstv %s3134_s13 }
 0x3f2   :  { %1498 = vrot.lane.b32.xlu0 %v1496_v16, %s2323_s0  ;;  %s3310_s0 = smov 45   ;;  %v1700_v15 = vstv %s3136_s22  ;;  %v1702_v6 = vstv %s3142_s6  ;;  %v1642_v47 = vstv %s3144_s27  ;;  %vm1708_vm5 = vcmask 400384  }
 0x3f3   :  { %v1607_v25 = vmul.f32 %v1605_v61, %v1600_v43  ;;  %v610_v52 = vsel %vm609_vm8, %v608_v27, %v3020_v20  ;;  %v588_v42 = vadd.f32 %v587_v46, %v585_v31  ;;  %v1664_v48 = vstv %s3151_s23 }
 0x3f4   :  { %v1666_v24 = vstv %s3153_s15  ;;  %v1750_v56 = vstv %s3165_s21  ;;  %vm854_vm2 = vcmask 916480   ;;  %v1643_v8 = vmul.f32 %v1642_v47, %v1638_v12 }
 0x3f5   :  { %1474 = vrot.lane.b32.xlu1 %v1472_v62, %s2341_s5  ;;  %v612_v5 = vmul.f32 %v610_v52, %v588_v42  ;;  %v1689_v27 = vmul.f32 %v1688_v30, %v1683_v2  ;;  %v1661_v52 = vld [vmem:[#allocation2 + $0xa] sm:$0x3f]  ;;  %v1703_v42 = vmul.f32 %v1702_v6, %v1683_v2 }
 0x3f6   :  { %1539 = vrot.lane.b32.xlu0 %v1537_v13, %s3310_s0 }
 0x3f9   :  { %1522 = vrot.lane.b32.xlu1 %v1520_v54, %s2321_s10  ;;  %s3132_s10 = sld [smem:[#allocation7 + $0x2d]]  ;;  %v1644_v54 = vstv %s3147_s12 }
 0x3fa   :  { %1585 = vrot.lane.b32.xlu0 %v1583_v55, %s2342_s18  ;;  %v1639_v55 = vld [vmem:[#allocation2 + $0xa] sm:$0x3f] }
 0x3fb   :  { %v1645_v50 = vmul.f32 %v1644_v54, %v1639_v55 }
 0x3fd   :  { %1561 = vrot.lane.b32.xlu1 %v1559_v39, %s2344_s30  ;;  %v1724_v39 = vstv %s3155_s25 }
 0x3fe   :  { %1632 = vrot.lane.b32.xlu0 %v1630_v44, %s2343_s19  ;;  %v1726_v44 = vstv %s3158_s11 }
 0x3ff   :  { %v1686_v49 = vstv %s3132_s10 }
 0x401   :  { %1609 = vrot.lane.b32.xlu1 %v1607_v25, %s2345_s20  ;;  %v1748_v25 = vstv %s3162_s24 }
 0x417   :  { %v707_v33 = vpop.permute.xlu1 %706 }
 0x418   :  { %v3129_v9 = vpop.permute.xlu0 %916  ;;  %v708_v58 = vrot.slane %v707_v33, 2 }
 0x41a   :  { %v710_v3 = vsel %vm709_vm6, %v707_v33, %v708_v58  ;;  %vm830_vm6 = vcmask 998400   ;;  %v1687_v33 = vmul.f32 %v1686_v49, %v1682_v35  ;;  %v1720_v58 = vld [vmem:[#allocation2 + $0x2] sm:$0x3f] }
 0x41b   :  { %v649_v1 = vpop.permute.xlu1 %648  ;;  %v1725_v6 = vmul.f32 %v1724_v39, %v1720_v58  ;;  %v1745_v39 = vld [vmem:[#allocation2 + $0xa] sm:$0x3f] }
 0x41c   :  { %v3138_v16 = vpop.permute.xlu0 %1705  ;;  %v650_v22 = vrot.slane %v649_v1, 2 }
 0x41e   :  { %v652_v53 = vsel %vm651_vm4, %v649_v1, %v650_v22  ;;  %vm748_vm4 = vcmask 1014784   ;;  %v1660_v1 = vld [vmem:[#allocation2 + $0x2] sm:$0x3f]  ;;  %v1701_v22 = vmul.f32 %v1700_v15, %v1682_v35 }
 0x41f   :  { %v690_v29 = vpop.permute.xlu1 %689  ;;  %v654_v20 = vadd.f32 %v652_v53, %v612_v5 }
 0x420   :  { %v3149_v57 = vpop.permute.xlu0 %851  ;;  %v691_v37 = vrot.slane %v690_v29, 2 }
 0x421   :  { %v853_v61 = vrot.slane %v3149_v57, 2 }
 0x422   :  { %v693_v41 = vsel %vm692_vm14, %v690_v29, %v691_v37  ;;  %vm789_vm14 = vcmask 1006592  }
 0x423   :  { %v695_v60 = vadd.f32 %v693_v41, %v654_v20  ;;  %v746_v21 = vpop.permute.xlu1 %745  ;;  %v855_v37 = vsel %vm854_vm2, %v3149_v57, %v853_v61  ;;  %vm965_vm2 = vcmask 875520  }
 0x424   :  { %v3160_v63 = vpop.permute.xlu0 %875  ;;  %v747_v62 = vrot.slane %v746_v21, 2 }
 0x425   :  { %v712_v13 = vadd.f32 %v710_v3, %v695_v60  ;;  %v877_v31 = vrot.slane %v3160_v63, 2  ;;  %v1721_v60 = vld [vmem:[#allocation2 + $0xa] sm:$0x3f]  ;;  %v1646_v3 = vadd.f32 %v1645_v50, %v1643_v8  ;;  %v1690_v8 = vadd.f32 %v1689_v27, %v1687_v33 }
 0x426   :  { %v749_v0 = vsel %vm748_vm4, %v746_v21, %v747_v62  ;;  %vm1525_vm4 = vcmask 375808   ;;  %v1665_v62 = vmul.f32 %v1664_v48, %v1660_v1  ;;  %v1727_v47 = vmul.f32 %v1726_v44, %v1721_v60 }
 0x427   :  { %v787_v14 = vpop.permute.xlu1 %786  ;;  %v751_v17 = vadd.f32 %v749_v0, %v712_v13  ;;  %v1667_v13 = vmul.f32 %v1666_v24, %v1661_v52  ;;  %v879_v49 = vsel %vm878_vm11, %v3160_v63, %v877_v31  ;;  %v1704_v48 = vadd.f32 %v1703_v42, %v1701_v22 }
 0x428   :  { %v3167_v40 = vpop.permute.xlu0 %899  ;;  %v788_v51 = vrot.slane %v787_v14, 2  ;;  %vm1732_vm11 = vcmask 408576   ;;  %v1728_v61 = vadd.f32 %v1727_v47, %v1725_v6  ;;  %v1751_v22 = vmul.f32 %v1750_v56, %v1745_v39 }
 0x429   :  { %v901_v20 = vrot.slane %v3167_v40, 2  ;;  %v1668_v24 = vadd.f32 %v1667_v13, %v1665_v62 }
 0x42a   :  { %v790_v32 = vsel %vm789_vm14, %v787_v14, %v788_v51  ;;  %vm941_vm14 = vcmask 883712   ;;  %v918_v14 = vrot.slane %v3129_v9, 2 }
 0x42b   :  { %v828_v38 = vpop.permute.xlu1 %827  ;;  %v792_v4 = vadd.f32 %v790_v32, %v751_v17  ;;  %v1707_v32 = vrot.slane %v3138_v16, 6  ;;  %v903_v12 = vsel %vm902_vm10, %v3167_v40, %v901_v20  ;;  %vm1012_vm10 = vcmask 785408  }
 0x42c   :  { %v3177_v59 = vpop.permute.xlu0 %938  ;;  %v829_v43 = vrot.slane %v828_v38, 2  ;;  %v920_v35 = vsel %vm919_vm7, %v3129_v9, %v918_v14  ;;  %vm989_vm7 = vcmask 867328  }
 0x42d   :  { %v940_v55 = vrot.slane %v3177_v59, 2  ;;  %v1709_v50 = vsel %vm1708_vm5, %v1707_v32, %v3138_v16  ;;  %vm1756_vm5 = vcmask 416768  }
 0x42e   :  { %v831_v46 = vsel %vm830_vm6, %v828_v38, %v829_v43  ;;  %vm1501_vm6 = vcmask 384000   ;;  %v1744_v38 = vld [vmem:[#allocation2 + $0x2] sm:$0x3f]  ;;  %v1711_v42 = vmul.f32 %v1709_v50, %v1704_v48 }
 0x42f   :  { %v833_v53 = vadd.f32 %v831_v46, %v792_v4  ;;  %v1648_v29 = vpop.permute.xlu1 %1647  ;;  %v942_v9 = vsel %vm941_vm14, %v3177_v59, %v940_v55  ;;  %v1749_v52 = vmul.f32 %v1748_v25, %v1744_v38  ;;  %vm1094_vm14 = vcmask 752640  }
 0x430   :  { %v963_v5 = vpop.permute.xlu0 %962  ;;  %v1649_v41 = vrot.slane %v1648_v29, 6 }
 0x431   :  { %v857_v21 = vadd.f32 %v855_v37, %v833_v53  ;;  %v964_v2 = vrot.slane %v963_v5, 2 }
 0x432   :  { %v1650_v0 = vsel %vm1525_vm4, %v1649_v41, %v1648_v29 }
 0x433   :  { %v881_v51 = vadd.f32 %v879_v49, %v857_v21  ;;  %v1652_v30 = vmul.f32 %v1650_v0, %v1646_v3  ;;  %v1670_v15 = vpop.permute.xlu1 %1669  ;;  %v966_v33 = vsel %vm965_vm2, %v963_v5, %v964_v2  ;;  %v1752_v21 = vadd.f32 %v1751_v22, %v1749_v52 }
 0x434   :  { %v987_v57 = vpop.permute.xlu0 %986  ;;  %v1671_v54 = vrot.slane %v1670_v15, 6  ;;  %vm1118_vm2 = vcmask 744448  }
 0x435   :  { %v905_v63 = vadd.f32 %v903_v12, %v881_v51  ;;  %1654 = vrot.lane.b32.xlu1 %v1652_v30, %s3311_s16  ;;  %v988_v31 = vrot.slane %v987_v57, 2 }
 0x436   :  { %v1672_v17 = vsel %vm1501_vm6, %v1671_v54, %v1670_v15 }
 0x437   :  { %v922_v40 = vadd.f32 %v920_v35, %v905_v63  ;;  %v1674_v44 = vmul.f32 %v1672_v17, %v1668_v24  ;;  %v1010_v4 = vpop.permute.xlu1 %1009  ;;  %v990_v37 = vsel %vm989_vm7, %v987_v57, %v988_v31  ;;  %vm1248_vm7 = vcmask 621568  }
 0x438   :  { %v1730_v43 = vpop.permute.xlu0 %1729  ;;  %v1011_v16 = vrot.slane %v1010_v4, 2 }
 0x439   :  { %v1731_v46 = vrot.slane %v1730_v43, 6  ;;  %v944_v1 = vadd.f32 %v942_v9, %v922_v40  ;;  %1692 = vrot.lane.b32.xlu1 %v1690_v8, %s3312_s28  ;;  %1676 = vrot.lane.b32.xlu0 %v1674_v44, %s3313_s29 }
 0x43a   :  { %v1013_v25 = vsel %vm1012_vm10, %v1010_v4, %v1011_v16  ;;  %vm1271_vm10 = vcmask 613376  }
 0x43b   :  { %v1733_v27 = vsel %vm1732_vm11, %v1731_v46, %v1730_v43  ;;  %v968_v59 = vadd.f32 %v966_v33, %v944_v1  ;;  %v1033_v58 = vpop.permute.xlu1 %1032  ;;  %vm3315_vm11 = vcmask 637952  }
 0x43c   :  { %v1735_v53 = vmul.f32 %v1733_v27, %v1728_v61  ;;  %v1754_v29 = vpop.permute.xlu0 %1753  ;;  %v1034_v41 = vrot.slane %v1033_v58, 2 }
 0x43d   :  { %v1755_v20 = vrot.slane %v1754_v29, 6  ;;  %v992_v60 = vadd.f32 %v990_v37, %v968_v59  ;;  %1713 = vrot.lane.b32.xlu0 %v1711_v42, %s2347_s4 }
 0x43e   :  { %1737 = vrot.lane.b32.xlu1 %v1735_v53, %s2346_s14  ;;  %v1035_v14 = vsel %vm894_vm15, %v1033_v58, %v1034_v41  ;;  %vm1142_vm15 = vcmask 736256  }
 0x43f   :  { %v1757_v56 = vsel %vm1756_vm5, %v1755_v20, %v1754_v29  ;;  %v1015_v5 = vadd.f32 %v1013_v25, %v992_v60  ;;  %v1055_v13 = vpop.permute.xlu1 %1054 }
 0x440   :  { %v1759_v3 = vmul.f32 %v1757_v56, %v1752_v21  ;;  %v1092_v62 = vpop.permute.xlu0 %1091  ;;  %v1056_v49 = vrot.slane %v1055_v13, 2 }
 0x441   :  { %v1037_v0 = vadd.f32 %v1035_v14, %v1015_v5  ;;  %v1093_v15 = vrot.slane %v1092_v62, 2 }
 0x442   :  { %1761 = vrot.lane.b32.xlu0 %v1759_v3, %s2348_s26  ;;  %v1057_v51 = vsel %vm870_vm13, %v1055_v13, %v1056_v49  ;;  %vm1165_vm13 = vcmask 654336  }
 0x443   :  { %v1071_v57 = vpop.permute.xlu1 %1070  ;;  %v1059_v47 = vadd.f32 %v1057_v51, %v1037_v0  ;;  %v1095_v48 = vsel %vm1094_vm14, %v1092_v62, %v1093_v15  ;;  %vm1294_vm14 = vcmask 605184  }
 0x444   :  { %v1140_v30 = vpop.permute.xlu0 %1139  ;;  %v1072_v6 = vrot.slane %v1071_v57, 2 }
 0x445   :  { %v1141_v63 = vrot.slane %v1140_v30, 2 }
 0x446   :  { %v1073_v32 = vsel %vm846_vm12, %v1071_v57, %v1072_v6  ;;  %vm3314_vm12 = vcmask 646144  }
 0x447   :  { %v1075_v12 = vadd.f32 %v1073_v32, %v1059_v47  ;;  %v1116_v54 = vpop.permute.xlu1 %1115  ;;  %v1143_v40 = vsel %vm1142_vm15, %v1140_v30, %v1141_v63  ;;  %vm1342_vm15 = vcmask 515072  }
 0x448   :  { %v1186_v55 = vpop.permute.xlu0 %1185  ;;  %v1117_v24 = vrot.slane %v1116_v54, 2 }
 0x449   :  { %v1097_v35 = vadd.f32 %v1095_v48, %v1075_v12  ;;  %v1187_v44 = vrot.slane %v1186_v55, 2 }
 0x44a   :  { %v1119_v2 = vsel %vm1118_vm2, %v1116_v54, %v1117_v24  ;;  %vm1318_vm2 = vcmask 523264  }
 0x44b   :  { %v1121_v17 = vadd.f32 %v1119_v2, %v1097_v35  ;;  %v1163_v39 = vpop.permute.xlu1 %1162  ;;  %v1188_v31 = vsel %vm3314_vm12, %v1186_v55, %v1187_v44  ;;  %vm1405_vm12 = vcmask 490496  }
 0x44c   :  { %v1224_v38 = vpop.permute.xlu0 %1223  ;;  %v1164_v61 = vrot.slane %v1163_v39, 2 }
 0x44d   :  { %v1145_v43 = vadd.f32 %v1143_v40, %v1121_v17  ;;  %v1225_v46 = vrot.slane %v1224_v38, 6 }
 0x44e   :  { %v1166_v4 = vsel %vm1165_vm13, %v1163_v39, %v1164_v61  ;;  %vm1383_vm13 = vcmask 498688  }
 0x44f   :  { %v1168_v8 = vadd.f32 %v1166_v4, %v1145_v43  ;;  %v1208_v9 = vpop.permute.xlu1 %1207  ;;  %v1226_v42 = vsel %vm609_vm8, %v1225_v46, %v1224_v38  ;;  %vm1366_vm8 = vcmask 506880  }
 0x450   :  { %v1269_v50 = vpop.permute.xlu0 %1268  ;;  %v1209_v1 = vrot.slane %v1208_v9, 2 }
 0x451   :  { %v1190_v52 = vadd.f32 %v1188_v31, %v1168_v8  ;;  %v1270_v59 = vrot.slane %v1269_v50, 6 }
 0x452   :  { %v1210_v22 = vsel %vm3315_vm11, %v1208_v9, %v1209_v1  ;;  %vm1429_vm11 = vcmask 482304  }
 0x453   :  { %v1212_v33 = vadd.f32 %v1210_v22, %v1190_v52  ;;  %v1246_v16 = vpop.permute.xlu1 %1245  ;;  %v1272_v60 = vsel %vm1271_vm10, %v1270_v59, %v1269_v50  ;;  %vm1477_vm10 = vcmask 392192  }
 0x454   :  { %v1316_v27 = vpop.permute.xlu0 %1315  ;;  %v1247_v53 = vrot.slane %v1246_v16, 6 }
 0x455   :  { %v1228_v29 = vadd.f32 %v1226_v42, %v1212_v33  ;;  %v1317_v21 = vrot.slane %v1316_v27, 6 }
 0x456   :  { %v1249_v58 = vsel %vm1248_vm7, %v1247_v53, %v1246_v16  ;;  %vm1453_vm7 = vcmask 474112  }
 0x457   :  { %v1251_v37 = vadd.f32 %v1249_v58, %v1228_v29  ;;  %v1292_v41 = vpop.permute.xlu1 %1291  ;;  %v1319_v14 = vsel %vm1318_vm2, %v1317_v21, %v1316_v27  ;;  %vm1588_vm2 = vcmask 351232  }
 0x458   :  { %v1364_v20 = vpop.permute.xlu0 %1363  ;;  %v1293_v25 = vrot.slane %v1292_v41, 6 }
 0x459   :  { %v1274_v56 = vadd.f32 %v1272_v60, %v1251_v37  ;;  %v1365_v49 = vrot.slane %v1364_v20, 6 }
 0x45a   :  { %v1295_v5 = vsel %vm1294_vm14, %v1293_v25, %v1292_v41  ;;  %vm1564_vm14 = vcmask 359424  }
 0x45b   :  { %v1297_v3 = vadd.f32 %v1295_v5, %v1274_v56  ;;  %v1340_v13 = vpop.permute.xlu1 %1339  ;;  %v1367_v47 = vsel %vm1366_vm8, %v1365_v49, %v1364_v20 }
 0x45c   :  { %v1403_v62 = vpop.permute.xlu0 %1402  ;;  %v1341_v0 = vrot.slane %v1340_v13, 6 }
 0x45d   :  { %v1321_v51 = vadd.f32 %v1319_v14, %v1297_v3  ;;  %v1404_v32 = vrot.slane %v1403_v62, 6 }
 0x45e   :  { %v1343_v30 = vsel %vm1342_vm15, %v1341_v0, %v1340_v13  ;;  %vm1764_vm15 = vcmask 211968  }
 0x45f   :  { %v1345_v57 = vadd.f32 %v1343_v30, %v1321_v51  ;;  %v1381_v6 = vpop.permute.xlu1 %1380  ;;  %v1406_v24 = vsel %vm1405_vm12, %v1404_v32, %v1403_v62 }
 0x460   :  { %v1451_v15 = vpop.permute.xlu0 %1450  ;;  %v1382_v12 = vrot.slane %v1381_v6, 6 }
 0x461   :  { %v1369_v55 = vadd.f32 %v1367_v47, %v1345_v57  ;;  %v1452_v35 = vrot.slane %v1451_v15, 6 }
 0x462   :  { %v1384_v54 = vsel %vm1383_vm13, %v1382_v12, %v1381_v6 }
 0x463   :  { %v1386_v48 = vadd.f32 %v1384_v54, %v1369_v55  ;;  %v1427_v63 = vpop.permute.xlu1 %1426  ;;  %v1454_v61 = vsel %vm1453_vm7, %v1452_v35, %v1451_v15 }
 0x464   :  { %v1428_v2 = vrot.slane %v1427_v63, 6  ;;  %v1499_v17 = vpop.permute.xlu0 %1498 }
 0x465   :  { %v1408_v38 = vadd.f32 %v1406_v24, %v1386_v48  ;;  %v1500_v43 = vrot.slane %v1499_v17, 6 }
 0x466   :  { %v1430_v39 = vsel %vm1429_vm11, %v1428_v2, %v1427_v63 }
 0x467   :  { %v1432_v40 = vadd.f32 %v1430_v39, %v1408_v38  ;;  %v1475_v44 = vpop.permute.xlu1 %1474  ;;  %v1502_v46 = vsel %vm1501_vm6, %v1500_v43, %v1499_v17  ;;  %vm1612_vm6 = vcmask 343040   ;;  %v1768_v43 = vstv %s578_s2 }
 0x468   :  { %v1476_v4 = vrot.slane %v1475_v44, 6  ;;  %v1540_v27 = vpop.permute.xlu0 %1539 }
 0x469   :  { %v1456_v8 = vadd.f32 %v1454_v61, %v1432_v40  ;;  %v1541_v42 = vrot.slane %v1540_v27, 6 }
 0x46a   :  { %v1478_v50 = vsel %vm1477_vm10, %v1476_v4, %v1475_v44 }
 0x46b   :  { %v1480_v9 = vadd.f32 %v1478_v50, %v1456_v8  ;;  %v1523_v31 = vpop.permute.xlu1 %1522  ;;  %v1543_v53 = vsel %vm1542_vm1, %v1541_v42, %v1540_v27  ;;  %vm1716_vm1 = vcmask 228352   ;;  %v1770_v50 = vstv %s1955_s1 }
 0x46c   :  { %v1524_v1 = vrot.slane %v1523_v31, 6  ;;  %v1586_v29 = vpop.permute.xlu0 %1585 }
 0x46d   :  { %v1504_v52 = vadd.f32 %v1502_v46, %v1480_v9  ;;  %v1587_v41 = vrot.slane %v1586_v29, 6 }
 0x46e   :  { %v1526_v22 = vsel %vm1525_vm4, %v1524_v1, %v1523_v31  ;;  %vm3316_vm4 = vcmask 261120  }
 0x46f   :  { %v1528_v33 = vadd.f32 %v1526_v22, %v1504_v52  ;;  %v1562_v16 = vpop.permute.xlu1 %1561  ;;  %v1589_v25 = vsel %vm1588_vm2, %v1587_v41, %v1586_v29  ;;  %v1801_v22 = vsub.s32 2, %v2524_v19 }
 0x470   :  { %v1563_v59 = vrot.slane %v1562_v16, 6  ;;  %v1633_v56 = vpop.permute.xlu0 %1632 }
 0x471   :  { %v1545_v58 = vadd.f32 %v1543_v53, %v1528_v33  ;;  %v1634_v62 = vrot.slane %v1633_v56, 6  ;;  %v1805_v33 = vsub.s32 4, %v2524_v19  ;;  %v1873_v53 = vsub.s32 3, %v2524_v19 }
 0x472   :  { %v1565_v37 = vsel %vm1564_vm14, %v1563_v59, %v1562_v16  ;;  %v1877_v59 = vsub.s32 5, %v2524_v19 }
 0x473   :  { %v1610_v20 = vpop.permute.xlu1 %1609  ;;  %v1567_v60 = vadd.f32 %v1565_v37, %v1545_v58  ;;  %v1635_v0 = vsel %vm3316_vm4, %v1634_v62, %v1633_v56  ;;  %v1782_v62 = vld [vmem:[#allocation3 + $0x20] sm:$0xff] }
 0x474   :  { %v1611_v21 = vrot.slane %v1610_v20, 6 }
 0x475   :  { %v1591_v5 = vadd.f32 %v1589_v25, %v1567_v60 }
 0x476   :  { %v1613_v3 = vsel %vm1612_vm6, %v1611_v21, %v1610_v20 }
 0x477   :  { %v1615_v13 = vadd.f32 %v1613_v3, %v1591_v5  ;;  %v1778_v5 = vld [vmem:[#allocation3] sm:$0xff]  ;;  %v1780_v3 = vld [vmem:[#allocation3 + $0x10] sm:$0xff] }
 0x479   :  { %v1637_v30 = vadd.f32 %v1635_v0, %v1615_v13  ;;  %v2191_v13 = vld [vmem:[#allocation3 + $0x30] sm:$0xff]  ;;  %v1788_v0 = vmul.f32 %v1780_v3, %v2620_v7 }
 0x4a7   :  { %v1655_v14 = vpop.permute.xlu1 %1654 }
 0x4a8   :  { %v1656_v49 = vrot.slane %v1655_v14, 6 }
 0x4aa   :  { %v1657_v51 = vsel %vm1517_vm0, %v1656_v49, %v1655_v14  ;;  %vm1740_vm0 = vcmask 220160   ;;  %v1786_v49 = vmul.f32 %v1778_v5, %v2622_v10 }
 0x4ab   :  { %v1677_v57 = vpop.permute.xlu0 %1676  ;;  %v1693_v15 = vpop.permute.xlu1 %1692  ;;  %v1659_v32 = vadd.f32 %v1657_v51, %v1637_v30  ;;  %v1790_v51 = vmul.f32 %v1782_v62, %v2636_v28 }
 0x4ac   :  { %v1678_v6 = vrot.slane %v1677_v57, 6  ;;  %v1694_v47 = vrot.slane %v1693_v15, 6 }
 0x4ae   :  { %v1679_v12 = vsel %vm1493_vm9, %v1678_v6, %v1677_v57  ;;  %v1695_v63 = vsel %vm1469_vm3, %v1694_v47, %v1693_v15  ;;  %v1779_v57 = vld [vmem:[#allocation3 + $0x8] sm:$0xff]  ;;  %v1781_v15 = vld [vmem:[#allocation3 + $0x18] sm:$0xff] }
 0x4af   :  { %v1681_v55 = vadd.f32 %v1679_v12, %v1659_v32  ;;  %v1714_v54 = vpop.permute.xlu0 %1713  ;;  %v1783_v6 = vld [vmem:[#allocation3 + $0x28] sm:$0xff] }
 0x4b0   :  { %v1738_v48 = vpop.permute.xlu1 %1737  ;;  %v1715_v24 = vrot.slane %v1714_v54, 6 }
 0x4b1   :  { %v1739_v35 = vrot.slane %v1738_v48, 6  ;;  %v1697_v2 = vadd.f32 %v1695_v63, %v1681_v55 }
 0x4b2   :  { %v1717_v17 = vsel %vm1716_vm1, %v1715_v24, %v1714_v54  ;;  %v2192_v54 = vld [vmem:[#allocation3 + $0x38] sm:$0xff]  ;;  %v1787_v24 = vmul.f32 %v1779_v57, %v2622_v10 }
 0x4b3   :  { %v1719_v38 = vadd.f32 %v1717_v17, %v1697_v2  ;;  %v1741_v40 = vsel %vm1740_vm0, %v1739_v35, %v1738_v48  ;;  %v1793_v48 = vmul.f32 %v2192_v54, %v2656_v36  ;;  %v1789_v35 = vmul.f32 %v1781_v15, %v2620_v7  ;;  %v2193_v7 = vld [vmem:[#allocation3 + $0x70] sm:$0xff] }
 0x4b4   :  { %v1762_v39 = vpop.permute.xlu0 %1761  ;;  %v1791_v2 = vmul.f32 %v1783_v6, %v2636_v28  ;;  %v1865_v28 = vmul.f32 %v2193_v7, %v2662_v45 }
 0x4b5   :  { %v1763_v44 = vrot.slane %v1762_v39, 6  ;;  %v1743_v61 = vadd.f32 %v1741_v40, %v1719_v38  ;;  %v1853_v38 = vld [vmem:[#allocation3 + $0x50] sm:$0xff] }
 0x4b7   :  { %v1765_v4 = vsel %vm1764_vm15, %v1763_v44, %v1762_v39  ;;  %v1854_v39 = vld [vmem:[#allocation3 + $0x58] sm:$0xff]  ;;  %v1851_v44 = vld [vmem:[#allocation3 + $0x40] sm:$0xff] }
 0x4b8   :  { %v1767_v8 = vadd.f32 %v1765_v4, %v1743_v61  ;;  %v1852_v61 = vld [vmem:[#allocation3 + $0x48] sm:$0xff]  ;;  %v1862_v10 = vmul.f32 %v1854_v39, %v2624_v11 }
 0x4ba   :  { %v1769_v9 = vmul.f32 %v1768_v43, %v1767_v8 }
 0x4bc   :  { %v1771_v31 = vadd.f32 %v1770_v50, %v1769_v9  ;;  %v1855_v50 = vld [vmem:[#allocation3 + $0x60] sm:$0xff]  ;;  %v1856_v9 = vld [vmem:[#allocation3 + $0x68] sm:$0xff] }
 0x4be   :  { %v2053_v46 = vmul.f32 -1.442695, %v1771_v31  ;;  %v1861_v31 = vmul.f32 %v1853_v38, %v2624_v11  ;;  %v1863_v11 = vmul.f32 %v1855_v50, %v2650_v34 }
 0x4c0   :  { %2187 = vpow2.f32 %v2053_v46  ;;  %v2194_v46 = vld [vmem:[#allocation3 + $0x78] sm:$0xff] }
 0x4cd   :  { %v2188_v1 = vpop.eup %2187 }
 0x4ce   :  { %v1775_v52 = vadd.f32 1.0, %v2188_v1  ;;  %v1866_v1 = vmul.f32 %v2194_v46, %v2662_v45 }
 0x4d0   :  { %2189 = vrcp.f32 %v1775_v52 }
 0x4dd   :  { %v2190_v27 = vpop.eup %2189 }
 0x4de   :  { %v1802_v16 = vrot.slane %v2190_v27, %v1801_v22  ;;  %v1798_v42 = vrot.slane %v2190_v27, %v2527_v23  ;;  %v1870_v37 = vrot.slane %v2190_v27, %v2530_v26  ;;  %v1806_v20 = vrot.slane %v2190_v27, %v1805_v33 }
 0x4df   :  { %v1878_v21 = vrot.slane %v2190_v27, %v1877_v59  ;;  %v1874_v25 = vrot.slane %v2190_v27, %v1873_v53  ;;  %v1859_v22 = vmul.f32 %v1851_v44, %v2630_v18  ;;  %v1860_v33 = vmul.f32 %v1852_v61, %v2630_v18 }
 0x4e0   :  { %v1817_v29 = vrot.slane %v1802_v16, %v2527_v23  ;;  %v1813_v58 = vrot.slane %v1798_v42, %v2527_v23  ;;  %v1885_v41 = vrot.slane %v1870_v37, %v2530_v26  ;;  %v1821_v60 = vrot.slane %v1806_v20, %v2527_v23 }
 0x4e1   :  { %v1893_v19 = vrot.slane %v1878_v21, %v2530_v26  ;;  %v1889_v56 = vrot.slane %v1874_v25, %v2530_v26  ;;  %v1792_v23 = vmul.f32 %v2191_v13, %v2656_v36  ;;  %v1864_v16 = vmul.f32 %v1856_v9, %v2650_v34 }
 0x4e2   :  { %1827 = vrot.lane.b32.xlu0 %v1817_v29, %s2326_s3  ;;  %1825 = vrot.lane.b32.xlu1 %v1813_v58, %s2326_s3 }
 0x4e6   :  { %1897 = vrot.lane.b32.xlu0 %v1885_v41, %s2326_s3  ;;  %1829 = vrot.lane.b32.xlu1 %v1821_v60, %s2326_s3 }
 0x4ea   :  { %1901 = vrot.lane.b32.xlu0 %v1893_v19, %s2326_s3  ;;  %1899 = vrot.lane.b32.xlu1 %v1889_v56, %s2326_s3  ;;  %s2349_s3 = smov [#allocation10]  }
 0x4eb   :  { %s1929_s17 = sshll.u32 %s2349_s3, 4  ;;  %s1930_s17 = int_to_ptr.vmem [resolvable:$true] %s1929_s17 }
 0x4ec   :  { %s2239_s0 = scalar_lea.vmem %s1930_s17, 2048  ;;  %p2244_p2 = scmp.lt.s32.totalorder %s1930_s17, %s1930_s17 }
 0x4ed   :  { %p2240_p1 = scmp.ne.s32.totalorder %s1930_s17, %s2239_s0  ;;  %p2245_p3 = scmp.lt.s32.totalorder %s2239_s0, %s2239_s0 }
 0x4ef   :  { %p2246_p4 = por %p2245_p3, %p2244_p2 }
 0x4f1   :  { %p2247_p5 = pnand %p2246_p4, %p2240_p1 }
 0x554   :  { %v1828_v14 = vpop.permute.xlu0 %1827  ;;  %v1826_v30 = vpop.permute.xlu1 %1825 }
 0x555   :  { %v1831_v26 = vsel %vm1756_vm5, %v1826_v30, %v1828_v14 }
 0x556   :  { %v1835_v47 = vmul.f32 %v1831_v26, %v1786_v49  ;;  %v1837_v32 = vmul.f32 %v1831_v26, %v1788_v0  ;;  %v1839_v12 = vmul.f32 %v1831_v26, %v1790_v51  ;;  %v1841_v55 = vmul.f32 %v1831_v26, %v1792_v23 }
 0x558   :  { %1843 = vst [vmem:[#allocation10] sm:$0xff] %v1835_v47  ;;  %1845 = vst [vmem:[#allocation10 + $0x10] sm:$0xff] %v1837_v32  ;;  %v1898_v63 = vpop.permute.xlu0 %1897  ;;  %v1830_v17 = vpop.permute.xlu1 %1829 }
 0x559   :  { %1847 = vst [vmem:[#allocation10 + $0x20] sm:$0xff] %v1839_v12  ;;  %1849 = vst [vmem:[#allocation10 + $0x30] sm:$0xff] %v1841_v55  ;;  %v1832_v40 = vsel %vm1756_vm5, %v1828_v14, %v1830_v17 }
 0x55a   :  { %v1836_v43 = vmul.f32 %v1832_v40, %v1787_v24  ;;  %v1838_v36 = vmul.f32 %v1832_v40, %v1789_v35  ;;  %v1840_v4 = vmul.f32 %v1832_v40, %v1791_v2  ;;  %v1842_v8 = vmul.f32 %v1832_v40, %v1793_v48 }
 0x55c   :  { %1844 = vst [vmem:[#allocation10 + $0x8] sm:$0xff] %v1836_v43  ;;  %1846 = vst [vmem:[#allocation10 + $0x18] sm:$0xff] %v1838_v36  ;;  %v1902_v52 = vpop.permute.xlu0 %1901  ;;  %v1900_v27 = vpop.permute.xlu1 %1899 }
 0x55d   :  { %1848 = vst [vmem:[#allocation10 + $0x28] sm:$0xff] %v1840_v4  ;;  %1850 = vst [vmem:[#allocation10 + $0x38] sm:$0xff] %v1842_v8  ;;  %v1903_v42 = vsel %vm1756_vm5, %v1898_v63, %v1900_v27  ;;  %v1904_v45 = vsel %vm1756_vm5, %v1900_v27, %v1902_v52 }
 0x55e   :  { %v1907_v59 = vmul.f32 %v1903_v42, %v1859_v22  ;;  %v1908_v53 = vmul.f32 %v1904_v45, %v1860_v33  ;;  %v1909_v29 = vmul.f32 %v1903_v42, %v1861_v31  ;;  %v1910_v58 = vmul.f32 %v1904_v45, %v1862_v10 }
 0x55f   :  { %v1911_v37 = vmul.f32 %v1903_v42, %v1863_v11  ;;  %v1912_v20 = vmul.f32 %v1904_v45, %v1864_v16  ;;  %v1913_v41 = vmul.f32 %v1903_v42, %v1865_v28  ;;  %v1914_v60 = vmul.f32 %v1904_v45, %v1866_v1 }
 0x560   :  { %1916 = vst [vmem:[#allocation10 + $0x40] sm:$0xff] %v1907_v59  ;;  %1917 = vst [vmem:[#allocation10 + $0x48] sm:$0xff] %v1908_v53 }
 0x561   :  { %1918 = vst [vmem:[#allocation10 + $0x50] sm:$0xff] %v1909_v29  ;;  %1919 = vst [vmem:[#allocation10 + $0x58] sm:$0xff] %v1910_v58 }
 0x562   :  { %1920 = vst [vmem:[#allocation10 + $0x60] sm:$0xff] %v1911_v37  ;;  %1921 = vst [vmem:[#allocation10 + $0x68] sm:$0xff] %v1912_v20 }
 0x563   :  { %1922 = vst [vmem:[#allocation10 + $0x70] sm:$0xff] %v1913_v41  ;;  %1923 = vst [vmem:[#allocation10 + $0x78] sm:$0xff] %v1914_v60 }
 0x564   :  { %2250 = shalt.err (!%p2247_p5)
}
 0x565   :  { %s3317_s5 = smov 16   ;;  %s3318_s18 = smov 256  }
 0x566   :  { %1935 = dma.vmem_to_hbm [thread:$0]  %s1930_s17, 2048, %s3280_s8, [#allocation5], %s3318_s18, %s3318_s18, %s3317_s5  }
 0x567   :  { %2265 = dma.done.wait [#allocation5], 2048  }
 0x568   :  { %2266 = vsyncadd [#allocation5], 4294965248 }
 0x569   :  { %1939 = vsyncpa [#allocation4], 1 }
 0x56a   :  { %1940 = vsyncpa [#allocation5], 1 }
 0x56b   :  { %1941 = vsyncpa [#allocation6], 1 }
 0x56c   :  { %1942 = vsyncpa [#allocation9], 1 }

</bundles_post_ra>
